<compile_context>
chip_gen: v7x
topology: tpu7x:2x2x1
jax: 0.10.0
libtpu: 0.0.40
codegen_flags: <defaults>
</compile_context>

<pallas_src>
import jax
import jax.numpy as jnp
from jax.experimental import pallas as pl
from jax.experimental.pallas import tpu as pltpu

D_IN, H1, H2, H3, D_OUT = 2800, 512, 256, 128, 28
D_IN_PAD = 2816    # 22 * 128, lane-aligned K for the first matmul
D_OUT_PAD = 128    # lane-dense output store, sliced back to 28 in the wrapper


def _round_up(x, m):
    return (x + m - 1) // m * m


def _vmem_limit_bytes():
    """Per-chip VMEM cap: <= 48 MiB and <= half of physical VMEM (v7x = 64 MiB)."""
    try:
        cap = int(pltpu.get_tpu_info().vmem_capacity_bytes)
    except Exception:
        cap = 128 << 20
    return int(min(48 << 20, max(16 << 20, cap // 2)))


def _choose_tm(B, tm):
    """16-aligned batch tile; >=2 grid steps for B>=64 so both v7x TCs work."""
    tm = int(max(16, min(int(tm), _round_up(B, 16))))
    tm = _round_up(tm, 16)
    if B >= 64 and pl.cdiv(B, tm) < 2:
        tm = max(16, _round_up(pl.cdiv(B, 2), 16))
    return tm


def _prelu(x, alpha):
    return jnp.where(x >= 0, x, alpha * x)


def encoder_kernel(
    # scalar PReLU alphas live in SMEM
    a1_ref, a2_ref, a3_ref,
    # streaming f32 input tile (tm, 2800)
    x_ref,
    # resident weights / biases (whole arrays in VMEM, single-buffered)
    w1_ref, b1_ref,
    w2_ref, b2_ref,
    w3_ref, b3_ref,
    w4_ref, b4_ref,
    # output tile (tm, 128) f32
    o_ref,
    # VMEM scratch: lane-aligned, compute-dtype copy of the x tile (tm, 2816)
    xpad_ref,
):
    cdt = w1_ref.dtype                    # compute dtype (bf16 by default)
    a1 = a1_ref[0, 0]                     # read SMEM scalars once
    a2 = a2_ref[0, 0]
    a3 = a3_ref[0, 0]

    tm_ = xpad_ref.shape[0]
    # Zero the K-pad tail (cols 2800:2816) every step (cheap, megacore-safe),
    # then cast the raw f32 tile into the lane-aligned compute-dtype scratch.
    xpad_ref[:, D_IN:] = jnp.zeros((tm_, D_IN_PAD - D_IN), xpad_ref.dtype)
    xpad_ref[:, :D_IN] = x_ref[...].astype(cdt)

    h = jnp.dot(xpad_ref[...], w1_ref[...],
                preferred_element_type=jnp.float32) + b1_ref[...]
    h = _prelu(h, a1).astype(cdt)                                    # (tm, 512)

    h = jnp.dot(h, w2_ref[...], preferred_element_type=jnp.float32) + b2_ref[...]
    h = _prelu(h, a2).astype(cdt)                                    # (tm, 256)

    h = jnp.dot(h, w3_ref[...], preferred_element_type=jnp.float32) + b3_ref[...]
    h = _prelu(h, a3).astype(cdt)                                    # (tm, 128)

    h = jnp.dot(h, w4_ref[...], preferred_element_type=jnp.float32) + b4_ref[...]
    o_ref[...] = h.astype(o_ref.dtype)                               # (tm, 128)


def prepare_params(params, compute_dtype=jnp.bfloat16):
    """One-time weight prep (pad + cast), hoisted out of the per-call path."""
    cdt = compute_dtype
    # Zero-pad K of layer 1 (2800 -> 2816) and N of layer 4 (28 -> 128).
    w1 = jnp.zeros((D_IN_PAD, H1), cdt).at[:D_IN, :].set(params["w1"].astype(cdt))
    w2 = params["w2"].astype(cdt)
    w3 = params["w3"].astype(cdt)
    w4 = jnp.zeros((H3, D_OUT_PAD), cdt).at[:, :D_OUT].set(params["w4"].astype(cdt))

    b1 = params["b1"].astype(jnp.float32).reshape(1, H1)
    b2 = params["b2"].astype(jnp.float32).reshape(1, H2)
    b3 = params["b3"].astype(jnp.float32).reshape(1, H3)
    b4 = jnp.zeros((1, D_OUT_PAD), jnp.float32).at[:, :D_OUT].set(
        params["b4"].astype(jnp.float32).reshape(1, D_OUT))

    a1 = params["a1"].astype(jnp.float32).reshape(1, 1)
    a2 = params["a2"].astype(jnp.float32).reshape(1, 1)
    a3 = params["a3"].astype(jnp.float32).reshape(1, 1)
    return dict(w1=w1, b1=b1, w2=w2, b2=b2, w3=w3, b3=b3, w4=w4, b4=b4,
                a1=a1, a2=a2, a3=a3)


def encoder_forward(x, prepped, *, tm=256):
    """x: (B, 2800) float32 (passed to the kernel as-is, no wrapper copy).
    prepped: output of prepare_params() (padded / pre-cast weights)."""
    B, d_in = x.shape
    assert d_in == D_IN
    tm = _choose_tm(B, tm)
    cdt = prepped["w1"].dtype                      # compute dtype

    smem_spec = pl.BlockSpec(memory_space=pltpu.MemorySpace.SMEM)
    vmem_full = pl.BlockSpec(memory_space=pltpu.MemorySpace.VMEM)  # resident, 1-buffered

    out = pl.pallas_call(
        encoder_kernel,
        out_shape=jax.ShapeDtypeStruct((B, D_OUT_PAD), jnp.float32),
        grid_spec=pltpu.PrefetchScalarGridSpec(
            num_scalar_prefetch=0,
            grid=(pl.cdiv(B, tm),),
            in_specs=[
                smem_spec, smem_spec, smem_spec,              # alphas (SMEM)
                pl.BlockSpec((tm, D_IN), lambda i: (i, 0)),   # x tile (f32, streamed)
                vmem_full, vmem_full,                         # w1, b1
                vmem_full, vmem_full,                         # w2, b2
                vmem_full, vmem_full,                         # w3, b3
                vmem_full, vmem_full,                         # w4, b4
            ],
            out_specs=pl.BlockSpec((tm, D_OUT_PAD), lambda i: (i, 0)),
            scratch_shapes=[pltpu.VMEM((tm, D_IN_PAD), cdt)],
        ),
        compiler_params=pltpu.CompilerParams(
            dimension_semantics=("parallel",),
            vmem_limit_bytes=_vmem_limit_bytes(),
        ),
    )(prepped["a1"], prepped["a2"], prepped["a3"],
      x,
      prepped["w1"], prepped["b1"],
      prepped["w2"], prepped["b2"],
      prepped["w3"], prepped["b3"],
      prepped["w4"], prepped["b4"])

    # TODO(synk): on v7x an fp8 path for the first (dominant) matmul could
    # further cut bytes; kept bf16/f32 here for accuracy.
    return out[:, :D_OUT]


def init_params(key):
    """Deterministic synthetic init (matches PyTorch Linear/PReLU shapes)."""
    ks = jax.random.split(key, 8)

    def linear(kw, kb, fan_in, fan_out):
        bound = 1.0 / jnp.sqrt(fan_in)
        w = jax.random.uniform(kw, (fan_in, fan_out), jnp.float32, -bound, bound)
        b = jax.random.uniform(kb, (1, fan_out), jnp.float32, -bound, bound)
        return w, b

    w1, b1 = linear(ks[0], ks[1], D_IN, H1)
    w2, b2 = linear(ks[2], ks[3], H1, H2)
    w3, b3 = linear(ks[4], ks[5], H2, H3)
    w4, b4 = linear(ks[6], ks[7], H3, D_OUT)
    alpha = jnp.full((1, 1), 0.25, jnp.float32)  # PReLU default init
    return dict(w1=w1, b1=b1, a1=alpha,
                w2=w2, b2=b2, a2=alpha,
                w3=w3, b3=b3, a3=alpha,
                w4=w4, b4=b4)


def encoder_reference(x, p):
    h = x @ p["w1"] + p["b1"]
    h = jnp.where(h >= 0, h, p["a1"][0, 0] * h)
    h = h @ p["w2"] + p["b2"]
    h = jnp.where(h >= 0, h, p["a2"][0, 0] * h)
    h = h @ p["w3"] + p["b3"]
    h = jnp.where(h >= 0, h, p["a3"][0, 0] * h)
    return h @ p["w4"] + p["b4"]


if __name__ == "__main__":
    key = jax.random.PRNGKey(0)
    kx, kp = jax.random.split(key)
    params = init_params(kp)

    fwd = jax.jit(encoder_forward)

    # --- small batch, f32 compute path: tight tolerance -------------------
    B = 16
    x = jax.random.normal(kx, (B, D_IN), jnp.float32)
    ref = encoder_reference(x, params)

    prepped_f32 = prepare_params(params, compute_dtype=jnp.float32)
    out_f32 = jax.block_until_ready(fwd(x, prepped_f32))
    assert out_f32.shape == (B, D_OUT)
    assert jnp.allclose(out_f32, ref, atol=1e-4, rtol=1e-4)

    # --- default fast path (bf16 weights/activations, f32 accumulation) ---
    prepped_bf16 = prepare_params(params, compute_dtype=jnp.bfloat16)
    out_bf16 = jax.block_until_ready(fwd(x, prepped_bf16))
    assert out_bf16.shape == (B, D_OUT)
    assert jnp.allclose(out_bf16, ref, atol=3e-2, rtol=3e-2)

    # --- larger, non-multiple batch: >=2 grid steps (both v7x cores) and a
    #     masked partial last block -----------------------------------------
    B2 = 100
    x2 = jax.random.normal(jax.random.PRNGKey(1), (B2, D_IN), jnp.float32)
    ref2 = encoder_reference(x2, params)
    out2 = jax.block_until_ready(fwd(x2, prepped_bf16))
    assert out2.shape == (B2, D_OUT)
    assert jnp.allclose(out2, ref2, atol=3e-2, rtol=3e-2)

    print("KERNEL_OK")
</pallas_src>

<mosaic_0001>
module attributes {stable_mosaic.version = 11 : i64} {
  func.func @encoder_kernel(%arg0: i32, %arg1: memref<1x1xf32, #tpu.memory_space<smem>>, %arg2: memref<1x1xf32, #tpu.memory_space<smem>>, %arg3: memref<1x1xf32, #tpu.memory_space<smem>>, %arg4: memref<16x2800xf32, #tpu.memory_space<vmem>>, %arg5: memref<2816x512xf32, #tpu.memory_space<vmem>>, %arg6: memref<1x512xf32, #tpu.memory_space<vmem>>, %arg7: memref<512x256xf32, #tpu.memory_space<vmem>>, %arg8: memref<1x256xf32, #tpu.memory_space<vmem>>, %arg9: memref<256x128xf32, #tpu.memory_space<vmem>>, %arg10: memref<1x128xf32, #tpu.memory_space<vmem>>, %arg11: memref<128x128xf32, #tpu.memory_space<vmem>>, %arg12: memref<1x128xf32, #tpu.memory_space<vmem>>, %arg13: memref<16x128xf32, #tpu.memory_space<vmem>>, %arg14: memref<16x2816xf32, #tpu.memory_space<vmem>>) attributes {dimension_semantics = [#tpu.dimension_semantics<parallel>], iteration_bounds = array<i64: 1>, scalar_prefetch = 0 : i64, scratch_operands = 1 : i64, tpu.core_type = #tpu.core_type<tc>, window_params = [{transform_indices = @transform_0, window_bounds = array<i64: 1, 1>}, {transform_indices = @transform_1, window_bounds = array<i64: 1, 1>}, {transform_indices = @transform_2, window_bounds = array<i64: 1, 1>}, {transform_indices = @transform_3, window_bounds = array<i64: 16, 2800>}, {pipeline_mode = #tpu.pipeline_mode<synchronous>, transform_indices = @transform_4, window_bounds = array<i64: 2816, 512>}, {pipeline_mode = #tpu.pipeline_mode<synchronous>, transform_indices = @transform_5, window_bounds = array<i64: 1, 512>}, {pipeline_mode = #tpu.pipeline_mode<synchronous>, transform_indices = @transform_6, window_bounds = array<i64: 512, 256>}, {pipeline_mode = #tpu.pipeline_mode<synchronous>, transform_indices = @transform_7, window_bounds = array<i64: 1, 256>}, {pipeline_mode = #tpu.pipeline_mode<synchronous>, transform_indices = @transform_8, window_bounds = array<i64: 256, 128>}, {pipeline_mode = #tpu.pipeline_mode<synchronous>, transform_indices = @transform_9, window_bounds = array<i64: 1, 128>}, {pipeline_mode = #tpu.pipeline_mode<synchronous>, transform_indices = @transform_10, window_bounds = array<i64: 128, 128>}, {pipeline_mode = #tpu.pipeline_mode<synchronous>, transform_indices = @transform_11, window_bounds = array<i64: 1, 128>}, {transform_indices = @transform_12, window_bounds = array<i64: 16, 128>}]} {
    %c0 = arith.constant 0 : index
    %c0_0 = arith.constant 0 : index
    %0 = memref.load %arg1[%c0, %c0_0] : memref<1x1xf32, #tpu.memory_space<smem>>
    %c0_1 = arith.constant 0 : index
    %c0_2 = arith.constant 0 : index
    %1 = memref.load %arg2[%c0_1, %c0_2] : memref<1x1xf32, #tpu.memory_space<smem>>
    %c0_3 = arith.constant 0 : index
    %c0_4 = arith.constant 0 : index
    %2 = memref.load %arg3[%c0_3, %c0_4] : memref<1x1xf32, #tpu.memory_space<smem>>
    %cst = arith.constant 0.000000e+00 : f32
    %3 = vector.broadcast %cst : f32 to vector<16x16xf32>
    %c0_5 = arith.constant 0 : index
    %c2800 = arith.constant 2800 : index
    %4 = vector.load %arg14[%c0_5, %c2800] : memref<16x2816xf32, #tpu.memory_space<vmem>>, vector<16x16xf32>
    tpu.vector_store %arg14[%c0_5, %c2800], %3 {strides = array<i32>} : memref<16x2816xf32, #tpu.memory_space<vmem>>, vector<16x16xf32>,
    %c0_6 = arith.constant 0 : index
    %c0_7 = arith.constant 0 : index
    %5 = vector.load %arg4[%c0_6, %c0_7] : memref<16x2800xf32, #tpu.memory_space<vmem>>, vector<16x2800xf32>
    %c0_8 = arith.constant 0 : index
    %c0_9 = arith.constant 0 : index
    %6 = vector.load %arg14[%c0_8, %c0_9] : memref<16x2816xf32, #tpu.memory_space<vmem>>, vector<16x2800xf32>
    tpu.vector_store %arg14[%c0_8, %c0_9], %5 {strides = array<i32>} : memref<16x2816xf32, #tpu.memory_space<vmem>>, vector<16x2800xf32>,
    %c0_10 = arith.constant 0 : index
    %c0_11 = arith.constant 0 : index
    %7 = vector.load %arg14[%c0_10, %c0_11] : memref<16x2816xf32, #tpu.memory_space<vmem>>, vector<16x2816xf32>
    %c0_12 = arith.constant 0 : index
    %c0_13 = arith.constant 0 : index
    %8 = vector.load %arg5[%c0_12, %c0_13] : memref<2816x512xf32, #tpu.memory_space<vmem>>, vector<2816x512xf32>
    %cst_14 = arith.constant dense<0.000000e+00> : vector<16x512xf32>
    %9 = tpu.matmul %7, %8, %cst_14 {dimension_numbers = #tpu.dot_dimension_numbers<[1], [0], [0], [1], [0, 0, 1, 1], [], []>} : vector<16x2816xf32>, vector<2816x512xf32>, vector<16x512xf32> -> vector<16x512xf32>
    %c0_15 = arith.constant 0 : index
    %c0_16 = arith.constant 0 : index
    %10 = vector.load %arg6[%c0_15, %c0_16] : memref<1x512xf32, #tpu.memory_space<vmem>>, vector<1x512xf32>
    %11 = vector.broadcast %10 : vector<1x512xf32> to vector<16x512xf32>
    %12 = arith.addf %9, %11 : vector<16x512xf32>
    %cst_17 = arith.constant 0.000000e+00 : f32
    %13 = vector.broadcast %cst_17 : f32 to vector<16x512xf32>
    %14 = arith.cmpf oge, %12, %13 : vector<16x512xf32>
    %15 = vector.broadcast %0 : f32 to vector<16x512xf32>
    %16 = arith.mulf %15, %12 : vector<16x512xf32>
    %17 = arith.select %14, %12, %16 : vector<16x512xi1>, vector<16x512xf32>
    %c0_18 = arith.constant 0 : index
    %c0_19 = arith.constant 0 : index
    %18 = vector.load %arg7[%c0_18, %c0_19] : memref<512x256xf32, #tpu.memory_space<vmem>>, vector<512x256xf32>
    %cst_20 = arith.constant dense<0.000000e+00> : vector<16x256xf32>
    %19 = tpu.matmul %17, %18, %cst_20 {dimension_numbers = #tpu.dot_dimension_numbers<[1], [0], [0], [1], [0, 0, 1, 1], [], []>} : vector<16x512xf32>, vector<512x256xf32>, vector<16x256xf32> -> vector<16x256xf32>
    %c0_21 = arith.constant 0 : index
    %c0_22 = arith.constant 0 : index
    %20 = vector.load %arg8[%c0_21, %c0_22] : memref<1x256xf32, #tpu.memory_space<vmem>>, vector<1x256xf32>
    %21 = vector.broadcast %20 : vector<1x256xf32> to vector<16x256xf32>
    %22 = arith.addf %19, %21 : vector<16x256xf32>
    %cst_23 = arith.constant 0.000000e+00 : f32
    %23 = vector.broadcast %cst_23 : f32 to vector<16x256xf32>
    %24 = arith.cmpf oge, %22, %23 : vector<16x256xf32>
    %25 = vector.broadcast %1 : f32 to vector<16x256xf32>
    %26 = arith.mulf %25, %22 : vector<16x256xf32>
    %27 = arith.select %24, %22, %26 : vector<16x256xi1>, vector<16x256xf32>
    %c0_24 = arith.constant 0 : index
    %c0_25 = arith.constant 0 : index
    %28 = vector.load %arg9[%c0_24, %c0_25] : memref<256x128xf32, #tpu.memory_space<vmem>>, vector<256x128xf32>
    %cst_26 = arith.constant dense<0.000000e+00> : vector<16x128xf32>
    %29 = tpu.matmul %27, %28, %cst_26 {dimension_numbers = #tpu.dot_dimension_numbers<[1], [0], [0], [1], [0, 0, 1, 1], [], []>} : vector<16x256xf32>, vector<256x128xf32>, vector<16x128xf32> -> vector<16x128xf32>
    %c0_27 = arith.constant 0 : index
    %c0_28 = arith.constant 0 : index
    %30 = vector.load %arg10[%c0_27, %c0_28] : memref<1x128xf32, #tpu.memory_space<vmem>>, vector<1x128xf32>
    %31 = vector.broadcast %30 : vector<1x128xf32> to vector<16x128xf32>
    %32 = arith.addf %29, %31 : vector<16x128xf32>
    %cst_29 = arith.constant 0.000000e+00 : f32
    %33 = vector.broadcast %cst_29 : f32 to vector<16x128xf32>
    %34 = arith.cmpf oge, %32, %33 : vector<16x128xf32>
    %35 = vector.broadcast %2 : f32 to vector<16x128xf32>
    %36 = arith.mulf %35, %32 : vector<16x128xf32>
    %37 = arith.select %34, %32, %36 : vector<16x128xi1>, vector<16x128xf32>
    %c0_30 = arith.constant 0 : index
    %c0_31 = arith.constant 0 : index
    %38 = vector.load %arg11[%c0_30, %c0_31] : memref<128x128xf32, #tpu.memory_space<vmem>>, vector<128x128xf32>
    %cst_32 = arith.constant dense<0.000000e+00> : vector<16x128xf32>
    %39 = tpu.matmul %37, %38, %cst_32 {dimension_numbers = #tpu.dot_dimension_numbers<[1], [0], [0], [1], [0, 0, 1, 1], [], []>} : vector<16x128xf32>, vector<128x128xf32>, vector<16x128xf32> -> vector<16x128xf32>
    %c0_33 = arith.constant 0 : index
    %c0_34 = arith.constant 0 : index
    %40 = vector.load %arg12[%c0_33, %c0_34] : memref<1x128xf32, #tpu.memory_space<vmem>>, vector<1x128xf32>
    %41 = vector.broadcast %40 : vector<1x128xf32> to vector<16x128xf32>
    %42 = arith.addf %39, %41 : vector<16x128xf32>
    %c0_35 = arith.constant 0 : index
    %c0_36 = arith.constant 0 : index
    %43 = vector.load %arg13[%c0_35, %c0_36] : memref<16x128xf32, #tpu.memory_space<vmem>>, vector<16x128xf32>
    tpu.vector_store %arg13[%c0_35, %c0_36], %42 {strides = array<i32>} : memref<16x128xf32, #tpu.memory_space<vmem>>, vector<16x128xf32>,
    return
  }
  func.func @transform_0(%arg0: i32) -> (i32, i32) {
    %c0_i32 = arith.constant 0 : i32
    %c0_i32_0 = arith.constant 0 : i32
    %c0_i32_1 = arith.constant 0 : i32
    return %c0_i32, %c0_i32_0 : i32, i32
  }
  func.func @transform_1(%arg0: i32) -> (i32, i32) {
    %c0_i32 = arith.constant 0 : i32
    %c0_i32_0 = arith.constant 0 : i32
    %c0_i32_1 = arith.constant 0 : i32
    return %c0_i32, %c0_i32_0 : i32, i32
  }
  func.func @transform_2(%arg0: i32) -> (i32, i32) {
    %c0_i32 = arith.constant 0 : i32
    %c0_i32_0 = arith.constant 0 : i32
    %c0_i32_1 = arith.constant 0 : i32
    return %c0_i32, %c0_i32_0 : i32, i32
  }
  func.func @transform_3(%arg0: i32) -> (i32, i32) {
    %c0_i32 = arith.constant 0 : i32
    %c0_i32_0 = arith.constant 0 : i32
    return %arg0, %c0_i32 : i32, i32
  }
  func.func @transform_4(%arg0: i32) -> (i32, i32) {
    %c0_i32 = arith.constant 0 : i32
    %c0_i32_0 = arith.constant 0 : i32
    %c0_i32_1 = arith.constant 0 : i32
    return %c0_i32, %c0_i32_0 : i32, i32
  }
  func.func @transform_5(%arg0: i32) -> (i32, i32) {
    %c0_i32 = arith.constant 0 : i32
    %c0_i32_0 = arith.constant 0 : i32
    %c0_i32_1 = arith.constant 0 : i32
    return %c0_i32, %c0_i32_0 : i32, i32
  }
  func.func @transform_6(%arg0: i32) -> (i32, i32) {
    %c0_i32 = arith.constant 0 : i32
    %c0_i32_0 = arith.constant 0 : i32
    %c0_i32_1 = arith.constant 0 : i32
    return %c0_i32, %c0_i32_0 : i32, i32
  }
  func.func @transform_7(%arg0: i32) -> (i32, i32) {
    %c0_i32 = arith.constant 0 : i32
    %c0_i32_0 = arith.constant 0 : i32
    %c0_i32_1 = arith.constant 0 : i32
    return %c0_i32, %c0_i32_0 : i32, i32
  }
  func.func @transform_8(%arg0: i32) -> (i32, i32) {
    %c0_i32 = arith.constant 0 : i32
    %c0_i32_0 = arith.constant 0 : i32
    %c0_i32_1 = arith.constant 0 : i32
    return %c0_i32, %c0_i32_0 : i32, i32
  }
  func.func @transform_9(%arg0: i32) -> (i32, i32) {
    %c0_i32 = arith.constant 0 : i32
    %c0_i32_0 = arith.constant 0 : i32
    %c0_i32_1 = arith.constant 0 : i32
    return %c0_i32, %c0_i32_0 : i32, i32
  }
  func.func @transform_10(%arg0: i32) -> (i32, i32) {
    %c0_i32 = arith.constant 0 : i32
    %c0_i32_0 = arith.constant 0 : i32
    %c0_i32_1 = arith.constant 0 : i32
    return %c0_i32, %c0_i32_0 : i32, i32
  }
  func.func @transform_11(%arg0: i32) -> (i32, i32) {
    %c0_i32 = arith.constant 0 : i32
    %c0_i32_0 = arith.constant 0 : i32
    %c0_i32_1 = arith.constant 0 : i32
    return %c0_i32, %c0_i32_0 : i32, i32
  }
  func.func @transform_12(%arg0: i32) -> (i32, i32) {
    %c0_i32 = arith.constant 0 : i32
    %c0_i32_0 = arith.constant 0 : i32
    return %arg0, %c0_i32 : i32, i32
  }
}

</mosaic_0001>

<bundles_post_ra>
// kernel: encoder_forward.1
= control target key start
LH: loop header
LB: loop body
LE: loop exit
PB: predicated region body
PF: predicated region fallthrough
CT: control target
= control target key end

     0   :  { %20 = vsyncpa [#allocation7], 0  ;;  %s6494_s0 = inlined_call_operand.<no memory space> [shape: f32[1,1], index: 0, kind: input, shape index: {}]   ;;  %s6495_s1 = inlined_call_operand.<no memory space> [shape: f32[1,1], index: 1, kind: input, shape index: {}]   ;;  %s6496_s2 = inlined_call_operand.<no memory space> [shape: f32[1,1], index: 2, kind: input, shape index: {}]   ;;  %s6497_s3 = inlined_call_operand.hbm [shape: f32[16,2800], index: 3, kind: input, shape index: {}]   ;;  %s6498_s4 = inlined_call_operand.hbm [shape: f32[2816,512], index: 4, kind: input, shape index: {}]   ;;  %s6499_s5 = inlined_call_operand.hbm [shape: f32[1,512], index: 5, kind: input, shape index: {}]   ;;  %s6500_s6 = inlined_call_operand.hbm [shape: f32[512,256], index: 6, kind: input, shape index: {}]   ;;  %s6501_s7 = inlined_call_operand.hbm [shape: f32[1,256], index: 7, kind: input, shape index: {}]   ;;  %s6502_s8 = inlined_call_operand.hbm [shape: f32[256,128], index: 8, kind: input, shape index: {}]   ;;  %s6503_s9 = inlined_call_operand.hbm [shape: f32[1,128], index: 9, kind: input, shape index: {}]   ;;  %s6504_s10 = inlined_call_operand.hbm [shape: f32[128,128], index: 10, kind: input, shape index: {}]   ;;  %s6505_s11 = inlined_call_operand.hbm [shape: f32[1,128], index: 11, kind: input, shape index: {}]   ;;  %s6506_s12 = inlined_call_operand.hbm [shape: f32[16,128], index: 12, kind: output, shape index: {}]  }
   0x1   :  { %21 = vsyncpa [#allocation10], 0 }
   0x2   :  { %22 = vsyncpa [#allocation13], 0 }
   0x3   :  { %23 = vsyncpa [#allocation16], 0 }
   0x4   :  { %24 = vsyncpa [#allocation19], 0 }
   0x5   :  { %25 = vsyncpa [#allocation8], 0  ;;  %s6072_s21 = smov [#allocation9]   ;;  %s5840_s25 = scalar_lea.hbm %s6498_s4, 180224 }
   0x6   :  { %s49_s22 = sshll.u32 %s6072_s21, 4  ;;  %p5841_p0 = scmp.ne.s32.totalorder %s6498_s4, %s5840_s25  ;;  %s50_s22 = int_to_ptr.vmem [resolvable:$true] %s49_s22 }
   0x7   :  { %p5844_p1 = scmp.lt.u32.totalorder %s5840_s25, %s6498_s4 }
   0x9   :  { %p5846_p2 = pnand %p5844_p1, %p5841_p0 }
   0xb   :  { %5849 = shalt.err (!%p5846_p2)
}
   0xc   :  { %s5850_s30 = scalar_lea.vmem %s50_s22, 180224  ;;  %p5855_p4 = scmp.lt.s32.totalorder %s50_s22, %s50_s22 }
   0xd   :  { %p5851_p3 = scmp.ne.s32.totalorder %s50_s22, %s5850_s30  ;;  %p5856_p5 = scmp.lt.s32.totalorder %s5850_s30, %s5850_s30 }
   0xf   :  { %p5857_p6 = por %p5856_p5, %p5855_p4 }
  0x11   :  { %p5858_p7 = pnand %p5857_p6, %p5851_p3 }
  0x13   :  { %5861 = shalt.err (!%p5858_p7)
}
  0x14   :  { %s6073_s13 = smov 512   ;;  %s6074_s14 = smov 32  }
  0x15   :  { %55 = dma.hbm_to_vmem [thread:$0]  %s6498_s4, 180224, %s50_s22, [#allocation10], %s6073_s13, %s6073_s13, %s6074_s14  }
  0x16   :  { %s6075_s17 = smov [#allocation12]   ;;  %s5862_s21 = scalar_lea.hbm %s6500_s6, 16384 }
  0x17   :  { %s71_s18 = sshll.u32 %s6075_s17, 4  ;;  %p5863_p8 = scmp.ne.s32.totalorder %s6500_s6, %s5862_s21  ;;  %s72_s18 = int_to_ptr.vmem [resolvable:$true] %s71_s18 }
  0x18   :  { %p5866_p9 = scmp.lt.u32.totalorder %s5862_s21, %s6500_s6 }
  0x1a   :  { %p5868_p10 = pnand %p5866_p9, %p5863_p8 }
  0x1c   :  { %5871 = shalt.err (!%p5868_p10)
}
  0x1d   :  { %s5872_s27 = scalar_lea.vmem %s72_s18, 16384  ;;  %p5877_p12 = scmp.lt.s32.totalorder %s72_s18, %s72_s18 }
  0x1e   :  { %p5873_p11 = scmp.ne.s32.totalorder %s72_s18, %s5872_s27  ;;  %p5878_p13 = scmp.lt.s32.totalorder %s5872_s27, %s5872_s27 }
  0x20   :  { %p5879_p0 = por %p5878_p13, %p5877_p12 }
  0x22   :  { %p5880_p1 = pnand %p5879_p0, %p5873_p11 }
  0x24   :  { %5883 = shalt.err (!%p5880_p1)
}
  0x25   :  { %s6076_s4 = smov 256   ;;  %s6077_s22 = smov 16  }
  0x26   :  { %77 = dma.hbm_to_vmem [thread:$0]  %s6500_s6, 16384, %s72_s18, [#allocation13], %s6076_s4, %s6076_s4, %s6077_s22  }
  0x27   :  { %s6078_s30 = smov [#allocation15]   ;;  %s5884_s16 = scalar_lea.hbm %s6502_s8, 4096 }
  0x28   :  { %s93_s13 = sshll.u32 %s6078_s30, 4  ;;  %p5885_p2 = scmp.ne.s32.totalorder %s6502_s8, %s5884_s16  ;;  %s94_s13 = int_to_ptr.vmem [resolvable:$true] %s93_s13 }
  0x29   :  { %p5888_p3 = scmp.lt.u32.totalorder %s5884_s16, %s6502_s8 }
  0x2b   :  { %p5890_p4 = pnand %p5888_p3, %p5885_p2 }
  0x2d   :  { %5893 = shalt.err (!%p5890_p4)
}
  0x2e   :  { %s5894_s23 = scalar_lea.vmem %s94_s13, 4096  ;;  %p5899_p6 = scmp.lt.s32.totalorder %s94_s13, %s94_s13 }
  0x2f   :  { %p5895_p5 = scmp.ne.s32.totalorder %s94_s13, %s5894_s23  ;;  %p5900_p7 = scmp.lt.s32.totalorder %s5894_s23, %s5894_s23 }
  0x31   :  { %p5901_p8 = por %p5900_p7, %p5899_p6 }
  0x33   :  { %p5902_p9 = pnand %p5901_p8, %p5895_p5 }
  0x35   :  { %5905 = shalt.err (!%p5902_p9)
}
  0x36   :  { %s6079_s6 = smov 128   ;;  %s6080_s18 = smov 8  }
  0x37   :  { %99 = dma.hbm_to_vmem [thread:$0]  %s6502_s8, 4096, %s94_s13, [#allocation16], %s6079_s6, %s6079_s6, %s6080_s18  }
  0x38   :  { %s6081_s26 = smov [#allocation18]   ;;  %s6082_s4 = smov [#allocation6]  }
  0x39   :  { %s115_s27 = sshll.u32 %s6081_s26, 4  ;;  %s37_s22 = sshll.u32 %s6082_s4, 4  ;;  %s116_s27 = int_to_ptr.vmem [resolvable:$true] %s115_s27  ;;  %s38_s22 = int_to_ptr.vmem [resolvable:$true] %s37_s22 }
  0x3a   :  { %s5906_s30 = scalar_lea.hbm %s6504_s10, 2048 }
  0x3b   :  { %p5907_p10 = scmp.ne.s32.totalorder %s6504_s10, %s5906_s30  ;;  %p5910_p11 = scmp.lt.u32.totalorder %s5906_s30, %s6504_s10 }
  0x3d   :  { %p5912_p12 = pnand %p5910_p11, %p5907_p10 }
  0x3f   :  { %5915 = shalt.err (!%p5912_p12)
}
  0x40   :  { %s5916_s8 = scalar_lea.vmem %s116_s27, 2048  ;;  %p5921_p0 = scmp.lt.s32.totalorder %s116_s27, %s116_s27 }
  0x41   :  { %p5917_p13 = scmp.ne.s32.totalorder %s116_s27, %s5916_s8  ;;  %p5922_p1 = scmp.lt.s32.totalorder %s5916_s8, %s5916_s8 }
  0x43   :  { %p5923_p2 = por %p5922_p1, %p5921_p0 }
  0x45   :  { %p5924_p3 = pnand %p5923_p2, %p5917_p13 }
  0x47   :  { %5927 = shalt.err (!%p5924_p3)
}
  0x48   :  { %121 = dma.hbm_to_vmem [thread:$0]  %s6504_s10, 2048, %s116_s27, [#allocation19], %s6079_s6, %s6079_s6, %s6080_s18  }
  0x49   :  { %s5928_s23 = scalar_lea.hbm %s6497_s3, 5632 }
  0x4a   :  { %p5929_p4 = scmp.ne.s32.totalorder %s6497_s3, %s5928_s23  ;;  %p5932_p5 = scmp.lt.u32.totalorder %s5928_s23, %s6497_s3 }
  0x4c   :  { %p5934_p6 = pnand %p5932_p5, %p5929_p4 }
  0x4e   :  { %5937 = shalt.err (!%p5934_p6)
}
  0x4f   :  { %s5938_s28 = scalar_lea.vmem %s38_s22, 5632  ;;  %p5943_p8 = scmp.lt.s32.totalorder %s38_s22, %s38_s22 }
  0x50   :  { %p5939_p7 = scmp.ne.s32.totalorder %s38_s22, %s5938_s28  ;;  %p5944_p9 = scmp.lt.s32.totalorder %s5938_s28, %s5938_s28 }
  0x52   :  { %p5945_p10 = por %p5944_p9, %p5943_p8 }
  0x54   :  { %p5946_p11 = pnand %p5945_p10, %p5939_p7 }
  0x56   :  { %5949 = shalt.err (!%p5946_p11)
}
  0x57   :  { %s6083_s10 = smov 2816   ;;  %s6084_s27 = smov 176  }
  0x58   :  { %43 = dma.hbm_to_vmem [thread:$0]  %s6497_s3, 5632, %s38_s22, [#allocation7], %s6083_s10, %s6083_s10, %s6084_s27  }
  0x59   :  { %s6085_s14 = smov [#allocation11]   ;;  %s6086_s16 = smov [#allocation14]  }
  0x5a   :  { %s62_s15 = sshll.u32 %s6085_s14, 4  ;;  %s84_s17 = sshll.u32 %s6086_s16, 4  ;;  %s63_s15 = int_to_ptr.vmem [resolvable:$true] %s62_s15  ;;  %s85_s17 = int_to_ptr.vmem [resolvable:$true] %s84_s17 }
  0x5b   :  { %s5950_s19 = scalar_lea.hbm %s6499_s5, 64 }
  0x5c   :  { %p5951_p12 = scmp.ne.s32.totalorder %s6499_s5, %s5950_s19  ;;  %p5954_p13 = scmp.lt.u32.totalorder %s5950_s19, %s6499_s5 }
  0x5e   :  { %p5956_p0 = pnand %p5954_p13, %p5951_p12 }
  0x60   :  { %5959 = shalt.err (!%p5956_p0)
}
  0x61   :  { %s5960_s3 = scalar_lea.vmem %s63_s15, 64  ;;  %p5965_p2 = scmp.lt.s32.totalorder %s63_s15, %s63_s15 }
  0x62   :  { %p5961_p1 = scmp.ne.s32.totalorder %s63_s15, %s5960_s3  ;;  %p5966_p3 = scmp.lt.s32.totalorder %s5960_s3, %s5960_s3 }
  0x64   :  { %p5967_p4 = por %p5966_p3, %p5965_p2 }
  0x66   :  { %p5968_p5 = pnand %p5967_p4, %p5961_p1 }
  0x68   :  { %5971 = shalt.err (!%p5968_p5)
}
  0x69   :  { %65 = dma.hbm_to_vmem [thread:$0]  %s6499_s5, 64, %s63_s15, [#allocation10]  }
  0x6a   :  { %s5972_s28 = scalar_lea.hbm %s6501_s7, 32 }
  0x6b   :  { %p5973_p6 = scmp.ne.s32.totalorder %s6501_s7, %s5972_s28  ;;  %p5976_p7 = scmp.lt.u32.totalorder %s5972_s28, %s6501_s7 }
  0x6d   :  { %p5978_p8 = pnand %p5976_p7, %p5973_p6 }
  0x6f   :  { %5981 = shalt.err (!%p5978_p8)
}
  0x70   :  { %s5982_s14 = scalar_lea.vmem %s85_s17, 32  ;;  %p5987_p10 = scmp.lt.s32.totalorder %s85_s17, %s85_s17 }
  0x71   :  { %p5983_p9 = scmp.ne.s32.totalorder %s85_s17, %s5982_s14  ;;  %p5988_p11 = scmp.lt.s32.totalorder %s5982_s14, %s5982_s14 }
  0x73   :  { %p5989_p12 = por %p5988_p11, %p5987_p10 }
  0x75   :  { %p5990_p13 = pnand %p5989_p12, %p5983_p9 }
  0x77   :  { %5993 = shalt.err (!%p5990_p13)
}
  0x78   :  { %87 = dma.hbm_to_vmem [thread:$0]  %s6501_s7, 32, %s85_s17, [#allocation13]  }
  0x79   :  { %s6087_s16 = smov [#allocation17]   ;;  %s6088_s13 = smov [#allocation20]  }
  0x7a   :  { %s106_s8 = sshll.u32 %s6087_s16, 4  ;;  %s128_s19 = sshll.u32 %s6088_s13, 4  ;;  %s107_s8 = int_to_ptr.vmem [resolvable:$true] %s106_s8  ;;  %s129_s19 = int_to_ptr.vmem [resolvable:$true] %s128_s19 }
  0x7b   :  { %s5994_s23 = scalar_lea.hbm %s6503_s9, 16 }
  0x7c   :  { %p5995_p0 = scmp.ne.s32.totalorder %s6503_s9, %s5994_s23  ;;  %p5998_p1 = scmp.lt.u32.totalorder %s5994_s23, %s6503_s9 }
  0x7e   :  { %p6000_p2 = pnand %p5998_p1, %p5995_p0 }
  0x80   :  { %6003 = shalt.err (!%p6000_p2)
}
  0x81   :  { %s6004_s7 = scalar_lea.vmem %s107_s8, 16  ;;  %s6008_s17 = scalar_lea.vmem %s107_s8, 32 }
  0x82   :  { %p6005_p3 = scmp.ne.s32.totalorder %s107_s8, %s6004_s7  ;;  %p6009_p4 = scmp.lt.s32.totalorder %s107_s8, %s107_s8 }
  0x83   :  { %p6010_p5 = scmp.lt.s32.totalorder %s6008_s17, %s6004_s7 }
  0x85   :  { %p6011_p6 = por %p6010_p5, %p6009_p4 }
  0x87   :  { %p6012_p7 = pnand %p6011_p6, %p6005_p3 }
  0x89   :  { %6015 = shalt.err (!%p6012_p7)
}
  0x8a   :  { %109 = dma.hbm_to_vmem [thread:$0]  %s6503_s9, 16, %s107_s8, [#allocation16]  }
  0x8b   :  { %s6016_s27 = scalar_lea.hbm %s6505_s11, 16 }
  0x8c   :  { %p6017_p8 = scmp.ne.s32.totalorder %s6505_s11, %s6016_s27  ;;  %p6020_p9 = scmp.lt.u32.totalorder %s6016_s27, %s6505_s11 }
  0x8e   :  { %p6022_p10 = pnand %p6020_p9, %p6017_p8 }
  0x90   :  { %6025 = shalt.err (!%p6022_p10)
}
  0x91   :  { %s6026_s15 = scalar_lea.vmem %s129_s19, 16  ;;  %s6030_s16 = scalar_lea.vmem %s129_s19, 32 }
  0x92   :  { %p6027_p11 = scmp.ne.s32.totalorder %s129_s19, %s6026_s15  ;;  %p6031_p12 = scmp.lt.s32.totalorder %s129_s19, %s129_s19 }
  0x93   :  { %p6032_p13 = scmp.lt.s32.totalorder %s6030_s16, %s6026_s15 }
  0x95   :  { %p6033_p0 = por %p6032_p13, %p6031_p12 }
  0x97   :  { %p6034_p1 = pnand %p6033_p0, %p6027_p11 }
  0x99   :  { %6037 = shalt.err (!%p6034_p1)
}
  0x9a   :  { %131 = dma.hbm_to_vmem [thread:$0]  %s6505_s11, 16, %s129_s19, [#allocation19]  }
  0x9b   :  { %6060 = dma.done.wait [#allocation7], 5632  }
  0x9c   :  { %6061 = vsyncadd [#allocation7], 4294961664 }
  0x9d   :  { %6062 = dma.done.wait [#allocation10], 180288  }
  0x9e   :  { %6063 = vsyncadd [#allocation10], 4294787008 }
  0x9f   :  { %6064 = dma.done.wait [#allocation13], 16416  }
  0xa0   :  { %6065 = vsyncadd [#allocation13], 4294950880 }
  0xa1   :  { %6066 = dma.done.wait [#allocation16], 4112  }
  0xa2   :  { %6067 = vsyncadd [#allocation16], 4294963184 }
  0xa3   :  { %6068 = dma.done.wait [#allocation19], 2064  }
  0xa4   :  { %6069 = vsyncadd [#allocation19], 4294965232  ;;  %v299_v0 = vld [vmem:[#allocation9 + $0x8] sm:$0xff]  ;;  %v298_v5 = vld [vmem:[#allocation9] sm:$0xff]  ;;  %vm162_vm0 = vcmask 1048448   ;;  %vm230_vm1 = vcmask 916480  }
  0xa5   :  { %v303_v1 = vld [vmem:[#allocation9 + $0x28] sm:$0xff]  ;;  %v302_v6 = vld [vmem:[#allocation9 + $0x20] sm:$0xff]  ;;  %s6090_s21 = smov [#allocation21]  }
  0xa6   :  { %v427_v2 = vld [vmem:[#allocation9 + $0x408] sm:$0xff]  ;;  %v4089_v3 = vpack.c.bf16 %v303_v1, %v299_v0  ;;  %v4091_v8 = vpack.c.bf16 %v302_v6, %v298_v5  ;;  %v426_v9 = vld [vmem:[#allocation9 + $0x400] sm:$0xff]  ;;  %s3980_s23 = sshll.u32 %s6090_s21, 4  ;;  %s3981_s23 = int_to_ptr.vmem [resolvable:$true] %s3980_s23 }
  0xa7   :  { %v431_v4 = vld [vmem:[#allocation9 + $0x428] sm:$0xff]  ;;  %v430_v10 = vld [vmem:[#allocation9 + $0x420] sm:$0xff]  ;;  %p6043_p3 = scmp.lt.s32.totalorder %s3981_s23, %s3981_s23 }
  0xa8   :  { %v4153_v7 = vpack.c.bf16 %v431_v4, %v427_v2  ;;  %v307_v11 = vld [vmem:[#allocation9 + $0x48] sm:$0xff]  ;;  %4090 = vmatprep.subr.bf16.mxu1 %v4089_v3  ;;  %v4155_v12 = vpack.c.bf16 %v430_v10, %v426_v9  ;;  %v306_v18 = vld [vmem:[#allocation9 + $0x40] sm:$0xff] }
  0xa9   :  { %v311_v13 = vld [vmem:[#allocation9 + $0x68] sm:$0xff]  ;;  %4092 = vmatpush1.bf16.msra.mxu1 %v4091_v8  ;;  %v310_v19 = vld [vmem:[#allocation9 + $0x60] sm:$0xff] }
  0xaa   :  { %v435_v14 = vld [vmem:[#allocation9 + $0x448] sm:$0xff]  ;;  %4154 = vmatprep.subr.bf16.mxu0 %v4153_v7  ;;  %v4093_v16 = vpack.c.bf16 %v311_v13, %v307_v11  ;;  %v434_v20 = vld [vmem:[#allocation9 + $0x440] sm:$0xff]  ;;  %v4095_v21 = vpack.c.bf16 %v310_v19, %v306_v18 }
  0xab   :  { %v439_v15 = vld [vmem:[#allocation9 + $0x468] sm:$0xff]  ;;  %4156 = vmatpush1.bf16.msra.mxu0 %v4155_v12  ;;  %v438_v22 = vld [vmem:[#allocation9 + $0x460] sm:$0xff] }
  0xac   :  { %v4157_v17 = vpack.c.bf16 %v439_v15, %v435_v14  ;;  %v315_v23 = vld [vmem:[#allocation9 + $0x88] sm:$0xff]  ;;  %4094 = vmatprep.subr.bf16.mxu1 %v4093_v16  ;;  %v4159_v25 = vpack.c.bf16 %v438_v22, %v434_v20  ;;  %v314_v29 = vld [vmem:[#allocation9 + $0x80] sm:$0xff] }
  0xad   :  { %v319_v24 = vld [vmem:[#allocation9 + $0xa8] sm:$0xff]  ;;  %v318_v31 = vld [vmem:[#allocation9 + $0xa0] sm:$0xff]  ;;  %4096 = vmatpush1.bf16.msra.mxu1 %v4095_v21 }
  0xae   :  { %4158 = vmatprep.subr.bf16.mxu0 %v4157_v17  ;;  %v4097_v26 = vpack.c.bf16 %v319_v24, %v315_v23  ;;  %v443_v27 = vld [vmem:[#allocation9 + $0x488] sm:$0xff]  ;;  %v442_v32 = vld [vmem:[#allocation9 + $0x480] sm:$0xff]  ;;  %v4099_v34 = vpack.c.bf16 %v318_v31, %v314_v29 }
  0xaf   :  { %v447_v28 = vld [vmem:[#allocation9 + $0x4a8] sm:$0xff]  ;;  %v446_v33 = vld [vmem:[#allocation9 + $0x4a0] sm:$0xff]  ;;  %4160 = vmatpush1.bf16.msra.mxu0 %v4159_v25 }
  0xb0   :  { %v4161_v30 = vpack.c.bf16 %v447_v28, %v443_v27  ;;  %v323_v35 = vld [vmem:[#allocation9 + $0xc8] sm:$0xff]  ;;  %4098 = vmatprep.subr.bf16.mxu1 %v4097_v26  ;;  %v4163_v38 = vpack.c.bf16 %v446_v33, %v442_v32  ;;  %v322_v41 = vld [vmem:[#allocation9 + $0xc0] sm:$0xff] }
  0xb1   :  { %v327_v36 = vld [vmem:[#allocation9 + $0xe8] sm:$0xff]  ;;  %v326_v42 = vld [vmem:[#allocation9 + $0xe0] sm:$0xff]  ;;  %4100 = vmatpush1.bf16.msra.mxu1 %v4099_v34 }
  0xb2   :  { %v451_v37 = vld [vmem:[#allocation9 + $0x4c8] sm:$0xff]  ;;  %v4101_v39 = vpack.c.bf16 %v327_v36, %v323_v35  ;;  %4162 = vmatprep.subr.bf16.mxu0 %v4161_v30  ;;  %v450_v44 = vld [vmem:[#allocation9 + $0x4c0] sm:$0xff]  ;;  %v4103_v50 = vpack.c.bf16 %v326_v42, %v322_v41 }
  0xb3   :  { %v455_v40 = vld [vmem:[#allocation9 + $0x4e8] sm:$0xff]  ;;  %v454_v45 = vld [vmem:[#allocation9 + $0x4e0] sm:$0xff]  ;;  %4164 = vmatpush1.bf16.msra.mxu0 %v4163_v38 }
  0xb4   :  { %v4165_v43 = vpack.c.bf16 %v455_v40, %v451_v37  ;;  %v331_v46 = vld [vmem:[#allocation9 + $0x108] sm:$0xff]  ;;  %4102 = vmatprep.subr.bf16.mxu1 %v4101_v39  ;;  %v4167_v51 = vpack.c.bf16 %v454_v45, %v450_v44  ;;  %v330_v53 = vld [vmem:[#allocation9 + $0x100] sm:$0xff] }
  0xb5   :  { %v335_v47 = vld [vmem:[#allocation9 + $0x128] sm:$0xff]  ;;  %v334_v54 = vld [vmem:[#allocation9 + $0x120] sm:$0xff]  ;;  %4104 = vmatpush1.bf16.msra.mxu1 %v4103_v50 }
  0xb6   :  { %v459_v48 = vld [vmem:[#allocation9 + $0x508] sm:$0xff]  ;;  %v4105_v52 = vpack.c.bf16 %v335_v47, %v331_v46  ;;  %v458_v55 = vld [vmem:[#allocation9 + $0x500] sm:$0xff]  ;;  %4166 = vmatprep.subr.bf16.mxu0 %v4165_v43  ;;  %v4107_v62 = vpack.c.bf16 %v334_v54, %v330_v53 }
  0xb7   :  { %v463_v49 = vld [vmem:[#allocation9 + $0x528] sm:$0xff]  ;;  %v462_v57 = vld [vmem:[#allocation9 + $0x520] sm:$0xff]  ;;  %4168 = vmatpush1.bf16.msra.mxu0 %v4167_v51 }
  0xb8   :  { %v4169_v56 = vpack.c.bf16 %v463_v49, %v459_v48  ;;  %v339_v58 = vld [vmem:[#allocation9 + $0x148] sm:$0xff]  ;;  %4106 = vmatprep.subr.bf16.mxu1 %v4105_v52  ;;  %v4171_v63 = vpack.c.bf16 %v462_v57, %v458_v55  ;;  %v338_v1 = vld [vmem:[#allocation9 + $0x140] sm:$0xff] }
  0xb9   :  { %v343_v59 = vld [vmem:[#allocation9 + $0x168] sm:$0xff]  ;;  %v342_v2 = vld [vmem:[#allocation9 + $0x160] sm:$0xff]  ;;  %4108 = vmatpush1.bf16.msra.mxu1 %v4107_v62 }
  0xba   :  { %v467_v60 = vld [vmem:[#allocation9 + $0x548] sm:$0xff]  ;;  %v4109_v0 = vpack.c.bf16 %v343_v59, %v339_v58  ;;  %v466_v3 = vld [vmem:[#allocation9 + $0x540] sm:$0xff]  ;;  %4170 = vmatprep.subr.bf16.mxu0 %v4169_v56  ;;  %v4111_v10 = vpack.c.bf16 %v342_v2, %v338_v1 }
  0xbb   :  { %v471_v61 = vld [vmem:[#allocation9 + $0x568] sm:$0xff]  ;;  %v470_v5 = vld [vmem:[#allocation9 + $0x560] sm:$0xff]  ;;  %4172 = vmatpush1.bf16.msra.mxu0 %v4171_v63 }
  0xbc   :  { %v4173_v4 = vpack.c.bf16 %v471_v61, %v467_v60  ;;  %v347_v6 = vld [vmem:[#allocation9 + $0x188] sm:$0xff]  ;;  %4110 = vmatprep.subr.bf16.mxu1 %v4109_v0  ;;  %v4175_v11 = vpack.c.bf16 %v470_v5, %v466_v3  ;;  %v346_v13 = vld [vmem:[#allocation9 + $0x180] sm:$0xff] }
  0xbd   :  { %v351_v7 = vld [vmem:[#allocation9 + $0x1a8] sm:$0xff]  ;;  %v350_v14 = vld [vmem:[#allocation9 + $0x1a0] sm:$0xff]  ;;  %4112 = vmatpush1.bf16.msra.mxu1 %v4111_v10 }
  0xbe   :  { %v475_v8 = vld [vmem:[#allocation9 + $0x588] sm:$0xff]  ;;  %v4113_v12 = vpack.c.bf16 %v351_v7, %v347_v6  ;;  %v474_v15 = vld [vmem:[#allocation9 + $0x580] sm:$0xff]  ;;  %4174 = vmatprep.subr.bf16.mxu0 %v4173_v4  ;;  %v4115_v22 = vpack.c.bf16 %v350_v14, %v346_v13 }
  0xbf   :  { %v479_v9 = vld [vmem:[#allocation9 + $0x5a8] sm:$0xff]  ;;  %v478_v17 = vld [vmem:[#allocation9 + $0x5a0] sm:$0xff]  ;;  %4176 = vmatpush1.bf16.msra.mxu0 %v4175_v11 }
  0xc0   :  { %v4177_v16 = vpack.c.bf16 %v479_v9, %v475_v8  ;;  %v355_v18 = vld [vmem:[#allocation9 + $0x1c8] sm:$0xff]  ;;  %4114 = vmatprep.subr.bf16.mxu1 %v4113_v12  ;;  %v4179_v23 = vpack.c.bf16 %v478_v17, %v474_v15  ;;  %v354_v25 = vld [vmem:[#allocation9 + $0x1c0] sm:$0xff] }
  0xc1   :  { %v359_v19 = vld [vmem:[#allocation9 + $0x1e8] sm:$0xff]  ;;  %v358_v26 = vld [vmem:[#allocation9 + $0x1e0] sm:$0xff]  ;;  %4116 = vmatpush1.bf16.msra.mxu1 %v4115_v22 }
  0xc2   :  { %v483_v20 = vld [vmem:[#allocation9 + $0x5c8] sm:$0xff]  ;;  %v4117_v24 = vpack.c.bf16 %v359_v19, %v355_v18  ;;  %v482_v27 = vld [vmem:[#allocation9 + $0x5c0] sm:$0xff]  ;;  %4178 = vmatprep.subr.bf16.mxu0 %v4177_v16  ;;  %v4119_v34 = vpack.c.bf16 %v358_v26, %v354_v25 }
  0xc3   :  { %v487_v21 = vld [vmem:[#allocation9 + $0x5e8] sm:$0xff]  ;;  %v486_v29 = vld [vmem:[#allocation9 + $0x5e0] sm:$0xff]  ;;  %4180 = vmatpush1.bf16.msra.mxu0 %v4179_v23 }
  0xc4   :  { %v4181_v28 = vpack.c.bf16 %v487_v21, %v483_v20  ;;  %v363_v30 = vld [vmem:[#allocation9 + $0x208] sm:$0xff]  ;;  %4118 = vmatprep.subr.bf16.mxu1 %v4117_v24  ;;  %v4183_v35 = vpack.c.bf16 %v486_v29, %v482_v27  ;;  %v362_v37 = vld [vmem:[#allocation9 + $0x200] sm:$0xff]  ;;  %v6275_v20 = vld [vmem:[#allocation6 + $0x18] sm:$0xff] }
  0xc5   :  { %v367_v31 = vld [vmem:[#allocation9 + $0x228] sm:$0xff]  ;;  %v366_v38 = vld [vmem:[#allocation9 + $0x220] sm:$0xff]  ;;  %4120 = vmatpush1.bf16.msra.mxu1 %v4119_v34  ;;  %1869 = vmatprep.mubr.f32.mxu0 %v6275_v20  ;;  %v6278_v27 = vld [vmem:[#allocation6 + $0x10] sm:$0xff] }
  0xc6   :  { %v491_v32 = vld [vmem:[#allocation9 + $0x608] sm:$0xff]  ;;  %v4121_v36 = vpack.c.bf16 %v367_v31, %v363_v30  ;;  %v490_v39 = vld [vmem:[#allocation9 + $0x600] sm:$0xff]  ;;  %4182 = vmatprep.subr.bf16.mxu0 %v4181_v28  ;;  %v4123_v46 = vpack.c.bf16 %v366_v38, %v362_v37  ;;  %211 = vst [vmem:[#allocation2 + $0x10] sm:$0xff] %v6278_v27 }
  0xc7   :  { %v495_v33 = vld [vmem:[#allocation9 + $0x628] sm:$0xff]  ;;  %v494_v41 = vld [vmem:[#allocation9 + $0x620] sm:$0xff]  ;;  %4184 = vmatpush1.bf16.msra.mxu0 %v4183_v35 }
  0xc8   :  { %v4185_v40 = vpack.c.bf16 %v495_v33, %v491_v32  ;;  %v371_v42 = vld [vmem:[#allocation9 + $0x248] sm:$0xff]  ;;  %4122 = vmatprep.subr.bf16.mxu1 %v4121_v36  ;;  %v4187_v47 = vpack.c.bf16 %v494_v41, %v490_v39  ;;  %v370_v49 = vld [vmem:[#allocation9 + $0x240] sm:$0xff] }
  0xc9   :  { %v375_v43 = vld [vmem:[#allocation9 + $0x268] sm:$0xff]  ;;  %v374_v50 = vld [vmem:[#allocation9 + $0x260] sm:$0xff]  ;;  %4124 = vmatpush1.bf16.msra.mxu1 %v4123_v46 }
  0xca   :  { %v499_v44 = vld [vmem:[#allocation9 + $0x648] sm:$0xff]  ;;  %v4125_v48 = vpack.c.bf16 %v375_v43, %v371_v42  ;;  %v498_v51 = vld [vmem:[#allocation9 + $0x640] sm:$0xff]  ;;  %4186 = vmatprep.subr.bf16.mxu0 %v4185_v40  ;;  %v4127_v58 = vpack.c.bf16 %v374_v50, %v370_v49 }
  0xcb   :  { %v503_v45 = vld [vmem:[#allocation9 + $0x668] sm:$0xff]  ;;  %v502_v53 = vld [vmem:[#allocation9 + $0x660] sm:$0xff]  ;;  %4188 = vmatpush1.bf16.msra.mxu0 %v4187_v47 }
  0xcc   :  { %v4189_v52 = vpack.c.bf16 %v503_v45, %v499_v44  ;;  %v379_v54 = vld [vmem:[#allocation9 + $0x288] sm:$0xff]  ;;  %4126 = vmatprep.subr.bf16.mxu1 %v4125_v48  ;;  %v4191_v59 = vpack.c.bf16 %v502_v53, %v498_v51  ;;  %v378_v61 = vld [vmem:[#allocation9 + $0x280] sm:$0xff] }
  0xcd   :  { %v383_v55 = vld [vmem:[#allocation9 + $0x2a8] sm:$0xff]  ;;  %v382_v62 = vld [vmem:[#allocation9 + $0x2a0] sm:$0xff]  ;;  %4128 = vmatpush1.bf16.msra.mxu1 %v4127_v58 }
  0xce   :  { %v507_v56 = vld [vmem:[#allocation9 + $0x688] sm:$0xff]  ;;  %v4129_v60 = vpack.c.bf16 %v383_v55, %v379_v54  ;;  %v506_v63 = vld [vmem:[#allocation9 + $0x680] sm:$0xff]  ;;  %4190 = vmatprep.subr.bf16.mxu0 %v4189_v52  ;;  %v4131_v6 = vpack.c.bf16 %v382_v62, %v378_v61 }
  0xcf   :  { %v511_v57 = vld [vmem:[#allocation9 + $0x6a8] sm:$0xff]  ;;  %v510_v1 = vld [vmem:[#allocation9 + $0x6a0] sm:$0xff]  ;;  %4192 = vmatpush1.bf16.msra.mxu0 %v4191_v59 }
  0xd0   :  { %v4193_v0 = vpack.c.bf16 %v511_v57, %v507_v56  ;;  %v387_v2 = vld [vmem:[#allocation9 + $0x2c8] sm:$0xff]  ;;  %v386_v7 = vld [vmem:[#allocation9 + $0x2c0] sm:$0xff]  ;;  %4130 = vmatprep.subr.bf16.mxu1 %v4129_v60  ;;  %v4195_v9 = vpack.c.bf16 %v510_v1, %v506_v63 }
  0xd1   :  { %v391_v3 = vld [vmem:[#allocation9 + $0x2e8] sm:$0xff]  ;;  %v390_v8 = vld [vmem:[#allocation9 + $0x2e0] sm:$0xff]  ;;  %4132 = vmatpush1.bf16.msra.mxu1 %v4131_v6 }
  0xd2   :  { %v515_v4 = vld [vmem:[#allocation9 + $0x6c8] sm:$0xff]  ;;  %v4133_v10 = vpack.c.bf16 %v391_v3, %v387_v2  ;;  %v514_v11 = vld [vmem:[#allocation9 + $0x6c0] sm:$0xff]  ;;  %4194 = vmatprep.subr.bf16.mxu0 %v4193_v0  ;;  %v4135_v21 = vpack.c.bf16 %v390_v8, %v386_v7  ;;  %v301_v2 = vld [vmem:[#allocation9 + $0x18] sm:$0xff] }
  0xd3   :  { %v519_v5 = vld [vmem:[#allocation9 + $0x6e8] sm:$0xff]  ;;  %v518_v12 = vld [vmem:[#allocation9 + $0x6e0] sm:$0xff]  ;;  %4196 = vmatpush1.bf16.msra.mxu0 %v4195_v9  ;;  %v305_v3 = vld [vmem:[#allocation9 + $0x38] sm:$0xff] }
  0xd4   :  { %v395_v13 = vld [vmem:[#allocation9 + $0x308] sm:$0xff]  ;;  %v4197_v14 = vpack.c.bf16 %v519_v5, %v515_v4  ;;  %v6273_v19 = vld [vmem:[#allocation6] sm:$0xff]  ;;  %4134 = vmatprep.subr.bf16.mxu1 %v4133_v10  ;;  %v4199_v23 = vpack.c.bf16 %v518_v12, %v514_v11  ;;  %v4793_v8 = vpack.c.bf16 %v305_v3, %v301_v2  ;;  %v300_v10 = vld [vmem:[#allocation9 + $0x10] sm:$0xff] }
  0xd5   :  { %v399_v15 = vld [vmem:[#allocation9 + $0x328] sm:$0xff]  ;;  %v394_v22 = vld [vmem:[#allocation9 + $0x300] sm:$0xff]  ;;  %4136 = vmatpush1.bf16.msra.mxu1 %v4135_v21  ;;  %v304_v11 = vld [vmem:[#allocation9 + $0x30] sm:$0xff] }
  0xd6   :  { %v523_v16 = vld [vmem:[#allocation9 + $0x708] sm:$0xff]  ;;  %v4137_v24 = vpack.c.bf16 %v399_v15, %v395_v13  ;;  %v398_v25 = vld [vmem:[#allocation9 + $0x320] sm:$0xff]  ;;  %4198 = vmatprep.subr.bf16.mxu0 %v4197_v14  ;;  %v309_v14 = vld [vmem:[#allocation9 + $0x58] sm:$0xff]  ;;  %v4795_v21 = vpack.c.bf16 %v304_v11, %v300_v10 }
  0xd7   :  { %v6270_v17 = vld [vmem:[#allocation6 + $0x8] sm:$0xff]  ;;  %v522_v26 = vld [vmem:[#allocation9 + $0x700] sm:$0xff]  ;;  %v4139_v34 = vpack.c.bf16 %v398_v25, %v394_v22  ;;  %4200 = vmatpush1.bf16.msra.mxu0 %v4199_v23  ;;  %v313_v15 = vld [vmem:[#allocation9 + $0x78] sm:$0xff] }
  0xd8   :  { %v527_v18 = vld [vmem:[#allocation9 + $0x728] sm:$0xff]  ;;  %1792 = vmatprep.mubr.f32.mxu1 %v6270_v17  ;;  %v526_v29 = vld [vmem:[#allocation9 + $0x720] sm:$0xff]  ;;  %4138 = vmatprep.subr.bf16.mxu1 %v4137_v24  ;;  %v4797_v23 = vpack.c.bf16 %v313_v15, %v309_v14  ;;  %v308_v25 = vld [vmem:[#allocation9 + $0x50] sm:$0xff] }
  0xd9   :  { %v4201_v28 = vpack.c.bf16 %v527_v18, %v523_v16  ;;  %v403_v30 = vld [vmem:[#allocation9 + $0x348] sm:$0xff]  ;;  %v4203_v35 = vpack.c.bf16 %v526_v29, %v522_v26  ;;  %v402_v37 = vld [vmem:[#allocation9 + $0x340] sm:$0xff]  ;;  %4140 = vmatpush1.bf16.msra.mxu1 %v4139_v34  ;;  %v312_v26 = vld [vmem:[#allocation9 + $0x70] sm:$0xff] }
  0xda   :  { %v407_v31 = vld [vmem:[#allocation9 + $0x368] sm:$0xff]  ;;  %v406_v38 = vld [vmem:[#allocation9 + $0x360] sm:$0xff]  ;;  %v4799_v34 = vpack.c.bf16 %v312_v26, %v308_v25  ;;  %v345_v2 = vld [vmem:[#allocation9 + $0x178] sm:$0xff] }
  0xdb   :  { %v531_v32 = vld [vmem:[#allocation9 + $0x748] sm:$0xff]  ;;  %v4141_v36 = vpack.c.bf16 %v407_v31, %v403_v30  ;;  %v530_v39 = vld [vmem:[#allocation9 + $0x740] sm:$0xff]  ;;  %4202 = vmatprep.subr.bf16.mxu0 %v4201_v28  ;;  %v4143_v46 = vpack.c.bf16 %v406_v38, %v402_v37  ;;  %v317_v30 = vld [vmem:[#allocation9 + $0x98] sm:$0xff] }
  0xdc   :  { %v535_v33 = vld [vmem:[#allocation9 + $0x768] sm:$0xff]  ;;  %v534_v41 = vld [vmem:[#allocation9 + $0x760] sm:$0xff]  ;;  %4204 = vmatpush1.bf16.msra.mxu0 %v4203_v35  ;;  %v321_v31 = vld [vmem:[#allocation9 + $0xb8] sm:$0xff] }
  0xdd   :  { %v4205_v40 = vpack.c.bf16 %v535_v33, %v531_v32  ;;  %v411_v42 = vld [vmem:[#allocation9 + $0x388] sm:$0xff]  ;;  %4142 = vmatprep.subr.bf16.mxu1 %v4141_v36  ;;  %v4207_v47 = vpack.c.bf16 %v534_v41, %v530_v39  ;;  %v410_v49 = vld [vmem:[#allocation9 + $0x380] sm:$0xff]  ;;  %v4801_v36 = vpack.c.bf16 %v321_v31, %v317_v30  ;;  %v316_v38 = vld [vmem:[#allocation9 + $0x90] sm:$0xff] }
  0xde   :  { %v415_v43 = vld [vmem:[#allocation9 + $0x3a8] sm:$0xff]  ;;  %v414_v50 = vld [vmem:[#allocation9 + $0x3a0] sm:$0xff]  ;;  %4144 = vmatpush1.bf16.msra.mxu1 %v4143_v46  ;;  %v320_v39 = vld [vmem:[#allocation9 + $0xb0] sm:$0xff] }
  0xdf   :  { %v539_v44 = vld [vmem:[#allocation9 + $0x788] sm:$0xff]  ;;  %v4145_v48 = vpack.c.bf16 %v415_v43, %v411_v42  ;;  %v538_v51 = vld [vmem:[#allocation9 + $0x780] sm:$0xff]  ;;  %4206 = vmatprep.subr.bf16.mxu0 %v4205_v40  ;;  %v4147_v58 = vpack.c.bf16 %v414_v50, %v410_v49  ;;  %v325_v42 = vld [vmem:[#allocation9 + $0xd8] sm:$0xff]  ;;  %v4803_v46 = vpack.c.bf16 %v320_v39, %v316_v38 }
  0xe0   :  { %v543_v45 = vld [vmem:[#allocation9 + $0x7a8] sm:$0xff]  ;;  %v542_v53 = vld [vmem:[#allocation9 + $0x7a0] sm:$0xff]  ;;  %4208 = vmatpush1.bf16.msra.mxu0 %v4207_v47  ;;  %v329_v43 = vld [vmem:[#allocation9 + $0xf8] sm:$0xff] }
  0xe1   :  { %v4209_v52 = vpack.c.bf16 %v543_v45, %v539_v44  ;;  %v419_v54 = vld [vmem:[#allocation9 + $0x3c8] sm:$0xff]  ;;  %4146 = vmatprep.subr.bf16.mxu1 %v4145_v48  ;;  %v4211_v59 = vpack.c.bf16 %v542_v53, %v538_v51  ;;  %v418_v61 = vld [vmem:[#allocation9 + $0x3c0] sm:$0xff]  ;;  %v4805_v47 = vpack.c.bf16 %v329_v43, %v325_v42  ;;  %v324_v49 = vld [vmem:[#allocation9 + $0xd0] sm:$0xff] }
  0xe2   :  { %v423_v55 = vld [vmem:[#allocation9 + $0x3e8] sm:$0xff]  ;;  %v422_v62 = vld [vmem:[#allocation9 + $0x3e0] sm:$0xff]  ;;  %4148 = vmatpush1.bf16.msra.mxu1 %v4147_v58  ;;  %v328_v50 = vld [vmem:[#allocation9 + $0xf0] sm:$0xff] }
  0xe3   :  { %v547_v56 = vld [vmem:[#allocation9 + $0x7c8] sm:$0xff]  ;;  %v4149_v60 = vpack.c.bf16 %v423_v55, %v419_v54  ;;  %v546_v63 = vld [vmem:[#allocation9 + $0x7c0] sm:$0xff]  ;;  %4210 = vmatprep.subr.bf16.mxu0 %v4209_v52  ;;  %v4151_v6 = vpack.c.bf16 %v422_v62, %v418_v61  ;;  %v333_v53 = vld [vmem:[#allocation9 + $0x118] sm:$0xff] }
  0xe4   :  { %v551_v57 = vld [vmem:[#allocation9 + $0x7e8] sm:$0xff]  ;;  %v550_v1 = vld [vmem:[#allocation9 + $0x7e0] sm:$0xff]  ;;  %4212 = vmatpush1.bf16.msra.mxu0 %v4211_v59  ;;  %v337_v54 = vld [vmem:[#allocation9 + $0x138] sm:$0xff] }
  0xe5   :  { %v4213_v0 = vpack.c.bf16 %v551_v57, %v547_v56  ;;  %v555_v4 = vld [vmem:[#allocation9 + $0x808] sm:$0xff]  ;;  %4150 = vmatprep.subr.bf16.mxu1 %v4149_v60  ;;  %v4215_v7 = vpack.c.bf16 %v550_v1, %v546_v63  ;;  %v554_v9 = vld [vmem:[#allocation9 + $0x800] sm:$0xff]  ;;  %v4807_v57 = vpack.c.bf16 %v328_v50, %v324_v49  ;;  %v4809_v59 = vpack.c.bf16 %v337_v54, %v333_v53  ;;  %v332_v61 = vld [vmem:[#allocation9 + $0x110] sm:$0xff] }
  0xe6   :  { %v559_v5 = vld [vmem:[#allocation9 + $0x828] sm:$0xff]  ;;  %v558_v13 = vld [vmem:[#allocation9 + $0x820] sm:$0xff]  ;;  %4152 = vmatpush1.bf16.msra.mxu1 %v4151_v6  ;;  %v336_v62 = vld [vmem:[#allocation9 + $0x130] sm:$0xff] }
  0xe7   :  { %4214 = vmatprep.subr.bf16.mxu0 %v4213_v0  ;;  %v4217_v12 = vpack.c.bf16 %v559_v5, %v555_v4  ;;  %v563_v16 = vld [vmem:[#allocation9 + $0x848] sm:$0xff]  ;;  %4794 = vmatprep.subr.bf16.mxu1 %v4793_v8  ;;  %v4219_v22 = vpack.c.bf16 %v558_v13, %v554_v9  ;;  %v562_v24 = vld [vmem:[#allocation9 + $0x840] sm:$0xff]  ;;  %v341_v1 = vld [vmem:[#allocation9 + $0x158] sm:$0xff]  ;;  %v4811_v5 = vpack.c.bf16 %v336_v62, %v332_v61 }
  0xe8   :  { %v567_v18 = vld [vmem:[#allocation9 + $0x868] sm:$0xff]  ;;  %4216 = vmatpush1.bf16.msra.mxu0 %v4215_v7  ;;  %v566_v29 = vld [vmem:[#allocation9 + $0x860] sm:$0xff]  ;;  %v4813_v7 = vpack.c.bf16 %v345_v2, %v341_v1  ;;  %v340_v9 = vld [vmem:[#allocation9 + $0x150] sm:$0xff] }
  0xe9   :  { %4218 = vmatprep.subr.bf16.mxu0 %v4217_v12  ;;  %v4221_v28 = vpack.c.bf16 %v567_v18, %v563_v16  ;;  %1793 = vmatmul.mubr.f32.vlgmr.msra.gmra.mrb[0].mxu1 %v6273_v19  ;;  %v571_v32 = vld [vmem:[#allocation9 + $0x888] sm:$0xff]  ;;  %v4223_v35 = vpack.c.bf16 %v566_v29, %v562_v24  ;;  %v570_v37 = vld [vmem:[#allocation9 + $0x880] sm:$0xff]  ;;  %v344_v10 = vld [vmem:[#allocation9 + $0x170] sm:$0xff] }
  0xea   :  { %v575_v33 = vld [vmem:[#allocation9 + $0x8a8] sm:$0xff]  ;;  %4796 = vmatpush1.bf16.msra.mxu1 %v4795_v21  ;;  %v574_v41 = vld [vmem:[#allocation9 + $0x8a0] sm:$0xff]  ;;  %v349_v13 = vld [vmem:[#allocation9 + $0x198] sm:$0xff]  ;;  %v4815_v18 = vpack.c.bf16 %v344_v10, %v340_v9 }
  0xeb   :  { %1870 = vmatmul.mubr.f32.vlgmr.msra.gmra.mrb[0].mxu0 %v6278_v27  ;;  %4798 = vmatprep.subr.bf16.mxu1 %v4797_v23  ;;  %v4225_v40 = vpack.c.bf16 %v575_v33, %v571_v32  ;;  %v579_v44 = vld [vmem:[#allocation9 + $0x8c8] sm:$0xff]  ;;  %v4227_v27 = vpack.c.bf16 %v574_v41, %v570_v37  ;;  %v578_v48 = vld [vmem:[#allocation9 + $0x8c0] sm:$0xff]  ;;  %v353_v14 = vld [vmem:[#allocation9 + $0x1b8] sm:$0xff] }
  0xec   :  { %4220 = vmatpush1.bf16.msra.mxu0 %v4219_v22  ;;  %v583_v45 = vld [vmem:[#allocation9 + $0x8e8] sm:$0xff]  ;;  %v582_v52 = vld [vmem:[#allocation9 + $0x8e0] sm:$0xff]  ;;  %v6283_v22 = vld [vmem:[#allocation6 + $0xb8] sm:$0xff]  ;;  %v4817_v26 = vpack.c.bf16 %v353_v14, %v349_v13 }
  0xed   :  { %4222 = vmatprep.subr.bf16.mxu0 %v4221_v28  ;;  %v4229_v51 = vpack.c.bf16 %v583_v45, %v579_v44  ;;  %v587_v55 = vld [vmem:[#allocation9 + $0x908] sm:$0xff]  ;;  %v4231_v58 = vpack.c.bf16 %v582_v52, %v578_v48  ;;  %v586_v60 = vld [vmem:[#allocation9 + $0x900] sm:$0xff]  ;;  %v6285_v23 = vld [vmem:[#allocation6 + $0xb0] sm:$0xff]  ;;  %1798 = vmatprep.mubr.f32.mxu1 %v6283_v22 }
  0xee   :  { %4800 = vmatpush1.bf16.msra.mxu1 %v4799_v34  ;;  %v591_v56 = vld [vmem:[#allocation9 + $0x928] sm:$0xff]  ;;  %v590_v0 = vld [vmem:[#allocation9 + $0x920] sm:$0xff]  ;;  %v348_v29 = vld [vmem:[#allocation9 + $0x190] sm:$0xff] }
  0xef   :  { %4802 = vmatprep.subr.bf16.mxu1 %v4801_v36  ;;  %v4233_v63 = vpack.c.bf16 %v591_v56, %v587_v55  ;;  %v595_v3 = vld [vmem:[#allocation9 + $0x948] sm:$0xff]  ;;  %v4235_v6 = vpack.c.bf16 %v590_v0, %v586_v60  ;;  %v594_v8 = vld [vmem:[#allocation9 + $0x940] sm:$0xff]  ;;  %v352_v30 = vld [vmem:[#allocation9 + $0x1b0] sm:$0xff]  ;;  %1799 = vmatmul.mubr.f32.gmra.mrb[2].mxu1 %v6285_v23 }
  0xf0   :  { %4224 = vmatpush1.bf16.msra.mxu0 %v4223_v35  ;;  %v599_v4 = vld [vmem:[#allocation9 + $0x968] sm:$0xff]  ;;  %v598_v12 = vld [vmem:[#allocation9 + $0x960] sm:$0xff]  ;;  %v357_v32 = vld [vmem:[#allocation9 + $0x1d8] sm:$0xff]  ;;  %v4819_v37 = vpack.c.bf16 %v352_v30, %v348_v29  ;;  %2639 = vmatprep.mubr.f32.mxu1 %v6270_v17 }
  0xf1   :  { %4226 = vmatprep.subr.bf16.mxu0 %v4225_v40  ;;  %v4237_v11 = vpack.c.bf16 %v599_v4, %v595_v3  ;;  %v603_v15 = vld [vmem:[#allocation9 + $0x988] sm:$0xff]  ;;  %v602_v21 = vld [vmem:[#allocation9 + $0x980] sm:$0xff]  ;;  %v4239_v25 = vpack.c.bf16 %v598_v12, %v594_v8  ;;  %v361_v33 = vld [vmem:[#allocation9 + $0x1f8] sm:$0xff] }
  0xf2   :  { %4804 = vmatpush1.bf16.msra.mxu1 %v4803_v46  ;;  %v607_v16 = vld [vmem:[#allocation9 + $0x9a8] sm:$0xff]  ;;  %v606_v28 = vld [vmem:[#allocation9 + $0x9a0] sm:$0xff]  ;;  %v4821_v41 = vpack.c.bf16 %v361_v33, %v357_v32  ;;  %v356_v42 = vld [vmem:[#allocation9 + $0x1d0] sm:$0xff] }
  0xf3   :  { %4806 = vmatprep.subr.bf16.mxu1 %v4805_v47  ;;  %v6287_v24 = vld [vmem:[#allocation6 + $0xc8] sm:$0xff]  ;;  %v4241_v31 = vpack.c.bf16 %v607_v16, %v603_v15  ;;  %v6290_v34 = vld [vmem:[#allocation6 + $0xc0] sm:$0xff]  ;;  %v4243_v40 = vpack.c.bf16 %v606_v28, %v602_v21  ;;  %v360_v43 = vld [vmem:[#allocation9 + $0x1f0] sm:$0xff] }
  0xf4   :  { %4228 = vmatpush1.bf16.msra.mxu0 %v4227_v27  ;;  %v611_v35 = vld [vmem:[#allocation9 + $0x9c8] sm:$0xff]  ;;  %1875 = vmatprep.mubr.f32.mxu0 %v6287_v24  ;;  %v610_v38 = vld [vmem:[#allocation9 + $0x9c0] sm:$0xff]  ;;  %v365_v27 = vld [vmem:[#allocation9 + $0x218] sm:$0xff]  ;;  %v4823_v50 = vpack.c.bf16 %v360_v43, %v356_v42 }
  0xf5   :  { %4230 = vmatprep.subr.bf16.mxu0 %v4229_v51  ;;  %v615_v36 = vld [vmem:[#allocation9 + $0x9e8] sm:$0xff]  ;;  %1876 = vmatmul.mubr.f32.gmra.mrb[2].mxu0 %v6290_v34  ;;  %v6297_v44 = vld [vmem:[#allocation6 + $0x20] sm:$0xff]  ;;  %v369_v47 = vld [vmem:[#allocation9 + $0x238] sm:$0xff] }
  0xf6   :  { %4808 = vmatpush1.bf16.msra.mxu1 %v4807_v57  ;;  %v6295_v39 = vld [vmem:[#allocation6 + $0x28] sm:$0xff]  ;;  %v4245_v45 = vpack.c.bf16 %v615_v36, %v611_v35  ;;  %v614_v46 = vld [vmem:[#allocation9 + $0x9e0] sm:$0xff]  ;;  %213 = vst [vmem:[#allocation2 + $0x20] sm:$0xff] %v6297_v44  ;;  %v4825_v52 = vpack.c.bf16 %v369_v47, %v365_v27  ;;  %v364_v54 = vld [vmem:[#allocation9 + $0x210] sm:$0xff] }
  0xf7   :  { %4810 = vmatprep.subr.bf16.mxu1 %v4809_v59  ;;  %1946 = vmatprep.mubr.f32.mxu0 %v6295_v39  ;;  %v619_v48 = vld [vmem:[#allocation9 + $0xa08] sm:$0xff]  ;;  %v4247_v51 = vpack.c.bf16 %v614_v46, %v610_v38  ;;  %v618_v53 = vld [vmem:[#allocation9 + $0xa00] sm:$0xff]  ;;  %v368_v55 = vld [vmem:[#allocation9 + $0x230] sm:$0xff] }
  0xf8   :  { %4232 = vmatpush1.bf16.msra.mxu0 %v4231_v58  ;;  %v623_v49 = vld [vmem:[#allocation9 + $0xa28] sm:$0xff]  ;;  %v622_v57 = vld [vmem:[#allocation9 + $0xa20] sm:$0xff]  ;;  %v373_v58 = vld [vmem:[#allocation9 + $0x258] sm:$0xff]  ;;  %v4827_v62 = vpack.c.bf16 %v368_v55, %v364_v54 }
  0xf9   :  { %4234 = vmatprep.subr.bf16.mxu0 %v4233_v63  ;;  %v4249_v56 = vpack.c.bf16 %v623_v49, %v619_v48  ;;  %v377_v59 = vld [vmem:[#allocation9 + $0x278] sm:$0xff]  ;;  %v627_v60 = vld [vmem:[#allocation9 + $0xa48] sm:$0xff]  ;;  %v4251_v17 = vpack.c.bf16 %v622_v57, %v618_v53  ;;  %v626_v0 = vld [vmem:[#allocation9 + $0xa40] sm:$0xff] }
  0xfa   :  { %4812 = vmatpush1.bf16.msra.mxu1 %v4811_v5  ;;  %v631_v61 = vld [vmem:[#allocation9 + $0xa68] sm:$0xff]  ;;  %v4829_v63 = vpack.c.bf16 %v377_v59, %v373_v58  ;;  %v372_v1 = vld [vmem:[#allocation9 + $0x250] sm:$0xff]  ;;  %v630_v4 = vld [vmem:[#allocation9 + $0xa60] sm:$0xff] }
  0xfb   :  { %4814 = vmatprep.subr.bf16.mxu1 %v4813_v7  ;;  %v376_v2 = vld [vmem:[#allocation9 + $0x270] sm:$0xff]  ;;  %v4253_v3 = vpack.c.bf16 %v631_v61, %v627_v60  ;;  %v381_v5 = vld [vmem:[#allocation9 + $0x298] sm:$0xff]  ;;  %v635_v7 = vld [vmem:[#allocation9 + $0xa88] sm:$0xff]  ;;  %v4255_v10 = vpack.c.bf16 %v630_v4, %v626_v0 }
  0xfc   :  { %4236 = vmatpush1.bf16.msra.mxu0 %v4235_v6  ;;  %v385_v6 = vld [vmem:[#allocation9 + $0x2b8] sm:$0xff]  ;;  %v639_v8 = vld [vmem:[#allocation9 + $0xaa8] sm:$0xff]  ;;  %v4831_v9 = vpack.c.bf16 %v376_v2, %v372_v1  ;;  %v634_v12 = vld [vmem:[#allocation9 + $0xa80] sm:$0xff] }
  0xfd   :  { %4238 = vmatprep.subr.bf16.mxu0 %v4237_v11  ;;  %v4833_v11 = vpack.c.bf16 %v385_v6, %v381_v5  ;;  %v380_v13 = vld [vmem:[#allocation9 + $0x290] sm:$0xff]  ;;  %v4257_v15 = vpack.c.bf16 %v639_v8, %v635_v7  ;;  %v638_v16 = vld [vmem:[#allocation9 + $0xaa0] sm:$0xff]  ;;  %v393_v21 = vld [vmem:[#allocation9 + $0x2f8] sm:$0xff] }
  0xfe   :  { %4816 = vmatpush1.bf16.msra.mxu1 %v4815_v18  ;;  %v384_v14 = vld [vmem:[#allocation9 + $0x2b0] sm:$0xff]  ;;  %v389_v18 = vld [vmem:[#allocation9 + $0x2d8] sm:$0xff]  ;;  %v4259_v29 = vpack.c.bf16 %v638_v16, %v634_v12  ;;  %v646_v36 = vld [vmem:[#allocation9 + $0xae0] sm:$0xff] }
  0xff   :  { %4818 = vmatprep.subr.bf16.mxu1 %v4817_v26  ;;  %v647_v26 = vld [vmem:[#allocation9 + $0xae8] sm:$0xff]  ;;  %v4835_v28 = vpack.c.bf16 %v384_v14, %v380_v13  ;;  %v4837_v30 = vpack.c.bf16 %v393_v21, %v389_v18  ;;  %v388_v32 = vld [vmem:[#allocation9 + $0x2d0] sm:$0xff]  ;;  %v401_v38 = vld [vmem:[#allocation9 + $0x338] sm:$0xff] }
 0x100   :  { %4240 = vmatpush1.bf16.msra.mxu0 %v4239_v25  ;;  %v643_v25 = vld [vmem:[#allocation9 + $0xac8] sm:$0xff]  ;;  %v392_v33 = vld [vmem:[#allocation9 + $0x2f0] sm:$0xff]  ;;  %v650_v46 = vld [vmem:[#allocation9 + $0xb00] sm:$0xff] }
 0x101   :  { %4242 = vmatprep.subr.bf16.mxu0 %v4241_v31  ;;  %v642_v31 = vld [vmem:[#allocation9 + $0xac0] sm:$0xff]  ;;  %v4261_v35 = vpack.c.bf16 %v647_v26, %v643_v25  ;;  %v4839_v42 = vpack.c.bf16 %v392_v33, %v388_v32  ;;  %v396_v27 = vld [vmem:[#allocation9 + $0x310] sm:$0xff]  ;;  %v663_v53 = vld [vmem:[#allocation9 + $0xb68] sm:$0xff] }
 0x102   :  { %4820 = vmatpush1.bf16.msra.mxu1 %v4819_v37  ;;  %v397_v37 = vld [vmem:[#allocation9 + $0x318] sm:$0xff]  ;;  %v4263_v43 = vpack.c.bf16 %v646_v36, %v642_v31  ;;  %v400_v47 = vld [vmem:[#allocation9 + $0x330] sm:$0xff]  ;;  %v654_v49 = vld [vmem:[#allocation9 + $0xb20] sm:$0xff] }
 0x103   :  { %4822 = vmatprep.subr.bf16.mxu1 %v4821_v41  ;;  %v655_v41 = vld [vmem:[#allocation9 + $0xb28] sm:$0xff]  ;;  %v4843_v54 = vpack.c.bf16 %v400_v47, %v396_v27  ;;  %v4267_v55 = vpack.c.bf16 %v654_v49, %v650_v46  ;;  %v658_v57 = vld [vmem:[#allocation9 + $0xb40] sm:$0xff]  ;;  %v404_v58 = vld [vmem:[#allocation9 + $0x350] sm:$0xff] }
 0x104   :  { %4244 = vmatpush1.bf16.msra.mxu0 %v4243_v40  ;;  %v651_v40 = vld [vmem:[#allocation9 + $0xb08] sm:$0xff]  ;;  %v408_v59 = vld [vmem:[#allocation9 + $0x370] sm:$0xff]  ;;  %v662_v61 = vld [vmem:[#allocation9 + $0xb60] sm:$0xff] }
 0x105   :  { %4246 = vmatprep.subr.bf16.mxu0 %v4245_v45  ;;  %v4841_v45 = vpack.c.bf16 %v401_v38, %v397_v37  ;;  %v4265_v48 = vpack.c.bf16 %v655_v41, %v651_v40  ;;  %v671_v0 = vld [vmem:[#allocation9 + $0xba8] sm:$0xff]  ;;  %v4847_v1 = vpack.c.bf16 %v408_v59, %v404_v58  ;;  %v4271_v2 = vpack.c.bf16 %v662_v61, %v658_v57  ;;  %v666_v4 = vld [vmem:[#allocation9 + $0xb80] sm:$0xff]  ;;  %v412_v5 = vld [vmem:[#allocation9 + $0x390] sm:$0xff] }
 0x106   :  { %4824 = vmatpush1.bf16.msra.mxu1 %v4823_v50  ;;  %v405_v50 = vld [vmem:[#allocation9 + $0x358] sm:$0xff]  ;;  %v416_v6 = vld [vmem:[#allocation9 + $0x3b0] sm:$0xff]  ;;  %v670_v8 = vld [vmem:[#allocation9 + $0xba0] sm:$0xff] }
 0x107   :  { %4826 = vmatprep.subr.bf16.mxu1 %v4825_v52  ;;  %v659_v52 = vld [vmem:[#allocation9 + $0xb48] sm:$0xff]  ;;  %v4851_v13 = vpack.c.bf16 %v416_v6, %v412_v5  ;;  %v4275_v14 = vpack.c.bf16 %v670_v8, %v666_v4  ;;  %v674_v16 = vld [vmem:[#allocation9 + $0xbc0] sm:$0xff]  ;;  %v420_v18 = vld [vmem:[#allocation9 + $0x3d0] sm:$0xff] }
 0x108   :  { %4248 = vmatpush1.bf16.msra.mxu0 %v4247_v51  ;;  %v409_v51 = vld [vmem:[#allocation9 + $0x378] sm:$0xff]  ;;  %v4269_v60 = vpack.c.bf16 %v663_v53, %v659_v52  ;;  %v679_v12 = vld [vmem:[#allocation9 + $0xbe8] sm:$0xff]  ;;  %v424_v21 = vld [vmem:[#allocation9 + $0x3f0] sm:$0xff] }
 0x109   :  { %4250 = vmatprep.subr.bf16.mxu0 %v4249_v56  ;;  %v4845_v56 = vpack.c.bf16 %v409_v51, %v405_v50  ;;  %v678_v26 = vld [vmem:[#allocation9 + $0xbe0] sm:$0xff]  ;;  %v687_v31 = vld [vmem:[#allocation9 + $0xc28] sm:$0xff]  ;;  %v4855_v32 = vpack.c.bf16 %v424_v21, %v420_v18  ;;  %v428_v37 = vld [vmem:[#allocation9 + $0x410] sm:$0xff] }
 0x10a   :  { %4828 = vmatpush1.bf16.msra.mxu1 %v4827_v62  ;;  %v413_v62 = vld [vmem:[#allocation9 + $0x398] sm:$0xff]  ;;  %v4279_v33 = vpack.c.bf16 %v678_v26, %v674_v16  ;;  %v682_v36 = vld [vmem:[#allocation9 + $0xc00] sm:$0xff]  ;;  %v432_v38 = vld [vmem:[#allocation9 + $0x430] sm:$0xff] }
 0x10b   :  { %4830 = vmatprep.subr.bf16.mxu1 %v4829_v63  ;;  %v667_v63 = vld [vmem:[#allocation9 + $0xb88] sm:$0xff]  ;;  %v686_v41 = vld [vmem:[#allocation9 + $0xc20] sm:$0xff]  ;;  %v4859_v27 = vpack.c.bf16 %v432_v38, %v428_v37  ;;  %v436_v52 = vld [vmem:[#allocation9 + $0x450] sm:$0xff] }
 0x10c   :  { %4252 = vmatpush1.bf16.msra.mxu0 %v4251_v17  ;;  %v417_v17 = vld [vmem:[#allocation9 + $0x3b8] sm:$0xff]  ;;  %v4273_v7 = vpack.c.bf16 %v671_v0, %v667_v63  ;;  %v695_v46 = vld [vmem:[#allocation9 + $0xc68] sm:$0xff]  ;;  %v690_v47 = vld [vmem:[#allocation9 + $0xc40] sm:$0xff]  ;;  %v4283_v49 = vpack.c.bf16 %v686_v41, %v682_v36 }
 0x10d   :  { %4254 = vmatprep.subr.bf16.mxu0 %v4253_v3  ;;  %v4849_v3 = vpack.c.bf16 %v417_v17, %v413_v62  ;;  %v694_v51 = vld [vmem:[#allocation9 + $0xc60] sm:$0xff]  ;;  %v440_v53 = vld [vmem:[#allocation9 + $0x470] sm:$0xff]  ;;  %v699_v58 = vld [vmem:[#allocation9 + $0xc88] sm:$0xff] }
 0x10e   :  { %4832 = vmatpush1.bf16.msra.mxu1 %v4831_v9  ;;  %v421_v9 = vld [vmem:[#allocation9 + $0x3d8] sm:$0xff]  ;;  %v191_v57 = vld [vmem:[#allocation6 + $0xd0] sm:$0xff]  ;;  %v703_v59 = vld [vmem:[#allocation9 + $0xca8] sm:$0xff]  ;;  %v4287_v17 = vpack.c.bf16 %v694_v51, %v690_v47 }
 0x10f   :  { %4834 = vmatprep.subr.bf16.mxu1 %v4833_v11  ;;  %v675_v11 = vld [vmem:[#allocation9 + $0xbc8] sm:$0xff]  ;;  %236 = vst [vmem:[#allocation2 + $0xd0] sm:$0xff] %v191_v57  ;;  %v698_v61 = vld [vmem:[#allocation9 + $0xc80] sm:$0xff]  ;;  %v172_v62 = vld [vmem:[#allocation6 + $0x38] sm:$0xff] }
 0x110   :  { %4256 = vmatpush1.bf16.msra.mxu0 %v4255_v10  ;;  %v425_v10 = vld [vmem:[#allocation9 + $0x3f8] sm:$0xff]  ;;  %v4277_v25 = vpack.c.bf16 %v679_v12, %v675_v11  ;;  %v444_v0 = vld [vmem:[#allocation9 + $0x490] sm:$0xff]  ;;  %216 = vst [vmem:[#allocation2 + $0x38] sm:$0xff] %v172_v62  ;;  %v711_v6 = vld [vmem:[#allocation9 + $0xce8] sm:$0xff] }
 0x111   :  { %4258 = vmatprep.subr.bf16.mxu0 %v4257_v15  ;;  %v4853_v15 = vpack.c.bf16 %v425_v10, %v421_v9  ;;  %v453_v4 = vld [vmem:[#allocation9 + $0x4d8] sm:$0xff]  ;;  %v706_v10 = vld [vmem:[#allocation9 + $0xcc0] sm:$0xff]  ;;  %v452_v11 = vld [vmem:[#allocation9 + $0x4d0] sm:$0xff] }
 0x112   :  { %4836 = vmatpush1.bf16.msra.mxu1 %v4835_v28  ;;  %v429_v28 = vld [vmem:[#allocation9 + $0x418] sm:$0xff]  ;;  %v456_v12 = vld [vmem:[#allocation9 + $0x4f0] sm:$0xff]  ;;  %v715_v18 = vld [vmem:[#allocation9 + $0xd08] sm:$0xff] }
 0x113   :  { %4838 = vmatprep.subr.bf16.mxu1 %v4837_v30  ;;  %v683_v30 = vld [vmem:[#allocation9 + $0xc08] sm:$0xff]  ;;  %v457_v5 = vld [vmem:[#allocation9 + $0x4f8] sm:$0xff]  ;;  %v468_v41 = vld [vmem:[#allocation9 + $0x550] sm:$0xff] }
 0x114   :  { %4260 = vmatpush1.bf16.msra.mxu0 %v4259_v29  ;;  %v433_v29 = vld [vmem:[#allocation9 + $0x438] sm:$0xff]  ;;  %v4281_v40 = vpack.c.bf16 %v687_v31, %v683_v30  ;;  %v4869_v9 = vpack.c.bf16 %v457_v5, %v453_v4  ;;  %v719_v21 = vld [vmem:[#allocation9 + $0xd28] sm:$0xff]  ;;  %v464_v30 = vld [vmem:[#allocation9 + $0x530] sm:$0xff] }
 0x115   :  { %4262 = vmatprep.subr.bf16.mxu0 %v4261_v35  ;;  %v4857_v35 = vpack.c.bf16 %v433_v29, %v429_v28  ;;  %v465_v16 = vld [vmem:[#allocation9 + $0x538] sm:$0xff]  ;;  %v714_v28 = vld [vmem:[#allocation9 + $0xd00] sm:$0xff]  ;;  %v460_v29 = vld [vmem:[#allocation9 + $0x510] sm:$0xff]  ;;  %v4297_v31 = vpack.c.bf16 %v719_v21, %v715_v18 }
 0x116   :  { %4840 = vmatpush1.bf16.msra.mxu1 %v4839_v42  ;;  %v437_v42 = vld [vmem:[#allocation9 + $0x458] sm:$0xff]  ;;  %v727_v36 = vld [vmem:[#allocation9 + $0xd68] sm:$0xff]  ;;  %v4875_v37 = vpack.c.bf16 %v464_v30, %v460_v29  ;;  %v500_v29 = vld [vmem:[#allocation9 + $0x650] sm:$0xff] }
 0x117   :  { %4842 = vmatprep.subr.bf16.mxu1 %v4841_v45  ;;  %v691_v45 = vld [vmem:[#allocation9 + $0xc48] sm:$0xff]  ;;  %v493_v4 = vld [vmem:[#allocation9 + $0x618] sm:$0xff]  ;;  %v504_v30 = vld [vmem:[#allocation9 + $0x670] sm:$0xff] }
 0x118   :  { %4264 = vmatpush1.bf16.msra.mxu0 %v4263_v43  ;;  %v441_v43 = vld [vmem:[#allocation9 + $0x478] sm:$0xff]  ;;  %v731_v47 = vld [vmem:[#allocation9 + $0xd88] sm:$0xff] }
 0x119   :  { %4266 = vmatprep.subr.bf16.mxu0 %v4265_v48  ;;  %v192_v48 = vld [vmem:[#allocation6 + $0xd8] sm:$0xff]  ;;  %v4861_v50 = vpack.c.bf16 %v441_v43, %v437_v42  ;;  %v472_v42 = vld [vmem:[#allocation9 + $0x570] sm:$0xff]  ;;  %v755_v18 = vld [vmem:[#allocation9 + $0xe48] sm:$0xff] }
 0x11a   :  { %4844 = vmatpush1.bf16.msra.mxu1 %v4843_v54  ;;  %237 = vst [vmem:[#allocation2 + $0xd8] sm:$0xff] %v192_v48  ;;  %v4285_v54 = vpack.c.bf16 %v695_v46, %v691_v45  ;;  %v726_v45 = vld [vmem:[#allocation9 + $0xd60] sm:$0xff]  ;;  %v477_v46 = vld [vmem:[#allocation9 + $0x598] sm:$0xff]  ;;  %v759_v21 = vld [vmem:[#allocation9 + $0xe68] sm:$0xff] }
 0x11b   :  { %4846 = vmatprep.subr.bf16.mxu1 %v4845_v56  ;;  %v449_v56 = vld [vmem:[#allocation9 + $0x4b8] sm:$0xff] }
 0x11c   :  { %4268 = vmatpush1.bf16.msra.mxu0 %v4267_v55  ;;  %v445_v55 = vld [vmem:[#allocation9 + $0x498] sm:$0xff] }
 0x11d   :  { %4270 = vmatprep.subr.bf16.mxu0 %v4269_v60  ;;  %v4863_v60 = vpack.c.bf16 %v440_v53, %v436_v52  ;;  %v4865_v63 = vpack.c.bf16 %v449_v56, %v445_v55  ;;  %v730_v52 = vld [vmem:[#allocation9 + $0xd80] sm:$0xff]  ;;  %v476_v53 = vld [vmem:[#allocation9 + $0x590] sm:$0xff]  ;;  %v497_v5 = vld [vmem:[#allocation9 + $0x638] sm:$0xff] }
 0x11e   :  { %4848 = vmatpush1.bf16.msra.mxu1 %v4847_v1  ;;  %v448_v1 = vld [vmem:[#allocation9 + $0x4b0] sm:$0xff]  ;;  %v734_v56 = vld [vmem:[#allocation9 + $0xda0] sm:$0xff] }
 0x11f   :  { %4850 = vmatprep.subr.bf16.mxu1 %v4849_v3  ;;  %v702_v3 = vld [vmem:[#allocation9 + $0xca0] sm:$0xff] }
 0x120   :  { %4272 = vmatpush1.bf16.msra.mxu0 %v4271_v2  ;;  %v6304_v2 = vld [vmem:[#allocation6 + $0x30] sm:$0xff]  ;;  %v4291_v8 = vpack.c.bf16 %v702_v3, %v698_v61  ;;  %v742_v3 = vld [vmem:[#allocation9 + $0xde0] sm:$0xff] }
 0x121   :  { %4274 = vmatprep.subr.bf16.mxu0 %v4273_v7  ;;  %215 = vst [vmem:[#allocation2 + $0x30] sm:$0xff] %v6304_v2  ;;  %v4867_v7 = vpack.c.bf16 %v448_v1, %v444_v0  ;;  %v484_v0 = vld [vmem:[#allocation9 + $0x5d0] sm:$0xff] }
 0x122   :  { %4852 = vmatpush1.bf16.msra.mxu1 %v4851_v13  ;;  %v488_v1 = vld [vmem:[#allocation9 + $0x5f0] sm:$0xff] }
 0x123   :  { %4854 = vmatprep.subr.bf16.mxu1 %v4853_v15  ;;  %v461_v15 = vld [vmem:[#allocation9 + $0x518] sm:$0xff] }
 0x124   :  { %4276 = vmatpush1.bf16.msra.mxu0 %v4275_v14  ;;  %v710_v14 = vld [vmem:[#allocation9 + $0xce0] sm:$0xff]  ;;  %v4873_v26 = vpack.c.bf16 %v465_v16, %v461_v15  ;;  %v501_v15 = vld [vmem:[#allocation9 + $0x658] sm:$0xff] }
 0x125   :  { %4278 = vmatprep.subr.bf16.mxu0 %v4277_v25  ;;  %v4295_v25 = vpack.c.bf16 %v710_v14, %v706_v10  ;;  %v746_v10 = vld [vmem:[#allocation9 + $0xe00] sm:$0xff]  ;;  %v505_v16 = vld [vmem:[#allocation9 + $0x678] sm:$0xff] }
 0x126   :  { %4856 = vmatpush1.bf16.msra.mxu1 %v4855_v32  ;;  %v718_v32 = vld [vmem:[#allocation9 + $0xd20] sm:$0xff] }
 0x127   :  { %4858 = vmatprep.subr.bf16.mxu1 %v4857_v35  ;;  %v473_v35 = vld [vmem:[#allocation9 + $0x578] sm:$0xff]  ;;  %v750_v14 = vld [vmem:[#allocation9 + $0xe20] sm:$0xff] }
 0x128   :  { %4280 = vmatpush1.bf16.msra.mxu0 %v4279_v33  ;;  %v469_v33 = vld [vmem:[#allocation9 + $0x558] sm:$0xff] }
 0x129   :  { %4282 = vmatprep.subr.bf16.mxu0 %v4281_v40  ;;  %2640 = vmatmul.mubr.f32.vlgmr.msra.gmra.mrb[4].mxu1 %v6273_v19  ;;  %v4289_v19 = vpack.c.bf16 %v703_v59, %v699_v58  ;;  %v4877_v38 = vpack.c.bf16 %v473_v35, %v469_v33  ;;  %v722_v40 = vld [vmem:[#allocation9 + $0xd40] sm:$0xff]  ;;  %v489_v58 = vld [vmem:[#allocation9 + $0x5f8] sm:$0xff]  ;;  %v739_v59 = vld [vmem:[#allocation9 + $0xdc8] sm:$0xff] }
 0x12a   :  { %4860 = vmatpush1.bf16.msra.mxu1 %v4859_v27  ;;  %2645 = vmatprep.mubr.f32.mxu1 %v6283_v22  ;;  %v4871_v22 = vpack.c.bf16 %v456_v12, %v452_v11  ;;  %v481_v27 = vld [vmem:[#allocation9 + $0x5b8] sm:$0xff]  ;;  %v492_v11 = vld [vmem:[#allocation9 + $0x610] sm:$0xff] }
 0x12b   :  { %1947 = vmatmul.mubr.f32.vlgmr.msra.gmra.mrb[0].mxu0 %v6297_v44  ;;  %4862 = vmatprep.subr.bf16.mxu1 %v4861_v50  ;;  %v707_v44 = vld [vmem:[#allocation9 + $0xcc8] sm:$0xff]  ;;  %v4303_v50 = vpack.c.bf16 %v726_v45, %v722_v40  ;;  %v4881_v51 = vpack.c.bf16 %v481_v27, %v477_v46  ;;  %v496_v12 = vld [vmem:[#allocation9 + $0x630] sm:$0xff]  ;;  %v509_v33 = vld [vmem:[#allocation9 + $0x698] sm:$0xff] }
 0x12c   :  { %4284 = vmatpush1.bf16.msra.mxu0 %v4283_v49  ;;  %1952 = vmatprep.mubr.f32.mxu0 %v192_v48  ;;  %v4293_v13 = vpack.c.bf16 %v711_v6, %v707_v44  ;;  %v735_v48 = vld [vmem:[#allocation9 + $0xda8] sm:$0xff]  ;;  %v4879_v49 = vpack.c.bf16 %v472_v42, %v468_v41  ;;  %v513_v35 = vld [vmem:[#allocation9 + $0x6b8] sm:$0xff]  ;;  %v762_v40 = vld [vmem:[#allocation9 + $0xe80] sm:$0xff] }
 0x12d   :  { %4286 = vmatprep.subr.bf16.mxu0 %v4285_v54  ;;  %2646 = vmatmul.mubr.f32.gmra.mrb[6].mxu1 %v6285_v23  ;;  %v723_v23 = vld [vmem:[#allocation9 + $0xd48] sm:$0xff]  ;;  %v480_v54 = vld [vmem:[#allocation9 + $0x5b0] sm:$0xff]  ;;  %v4305_v55 = vpack.c.bf16 %v735_v48, %v731_v47  ;;  %v766_v45 = vld [vmem:[#allocation9 + $0xea0] sm:$0xff] }
 0x12e   :  { %4864 = vmatpush1.bf16.msra.mxu1 %v4863_v60  ;;  %2716 = vmatprep.mubr.f32.mxu1 %v6275_v20  ;;  %v4299_v20 = vpack.c.bf16 %v718_v32, %v714_v28  ;;  %v4301_v43 = vpack.c.bf16 %v727_v36, %v723_v23  ;;  %v743_v60 = vld [vmem:[#allocation9 + $0xde8] sm:$0xff]  ;;  %v4883_v61 = vpack.c.bf16 %v480_v54, %v476_v53  ;;  %v754_v28 = vld [vmem:[#allocation9 + $0xe40] sm:$0xff]  ;;  %v508_v41 = vld [vmem:[#allocation9 + $0x690] sm:$0xff] }
 0x12f   :  { %1953 = vmatmul.mubr.f32.gmra.mrb[2].mxu0 %v191_v57  ;;  %4866 = vmatprep.subr.bf16.mxu1 %v4865_v63  ;;  %v485_v57 = vld [vmem:[#allocation9 + $0x5d8] sm:$0xff]  ;;  %v738_v63 = vld [vmem:[#allocation9 + $0xdc0] sm:$0xff]  ;;  %v747_v44 = vld [vmem:[#allocation9 + $0xe08] sm:$0xff] }
 0x130   :  { %4288 = vmatpush1.bf16.msra.mxu0 %v4287_v17  ;;  %2023 = vmatprep.mubr.f32.mxu0 %v172_v62  ;;  %v4307_v62 = vpack.c.bf16 %v734_v56, %v730_v52  ;;  %v4885_v17 = vpack.c.bf16 %v489_v58, %v485_v57  ;;  %v751_v6 = vld [vmem:[#allocation9 + $0xe28] sm:$0xff]  ;;  %v758_v32 = vld [vmem:[#allocation9 + $0xe60] sm:$0xff]  ;;  %v512_v42 = vld [vmem:[#allocation9 + $0x6b0] sm:$0xff] }
 0x131   :  { %4290 = vmatprep.subr.bf16.mxu0 %v4289_v19  ;;  %v4309_v19 = vpack.c.bf16 %v743_v60, %v739_v59  ;;  %v763_v23 = vld [vmem:[#allocation9 + $0xe88] sm:$0xff]  ;;  %v517_v46 = vld [vmem:[#allocation9 + $0x6d8] sm:$0xff]  ;;  %v770_v52 = vld [vmem:[#allocation9 + $0xec0] sm:$0xff] }
 0x132   :  { %4868 = vmatpush1.bf16.msra.mxu1 %v4867_v7  ;;  %v4887_v7 = vpack.c.bf16 %v488_v1, %v484_v0  ;;  %v767_v36 = vld [vmem:[#allocation9 + $0xea8] sm:$0xff]  ;;  %v521_v27 = vld [vmem:[#allocation9 + $0x6f8] sm:$0xff]  ;;  %v516_v53 = vld [vmem:[#allocation9 + $0x6d0] sm:$0xff] }
 0x133   :  { %4870 = vmatprep.subr.bf16.mxu1 %v4869_v9  ;;  %v4889_v9 = vpack.c.bf16 %v497_v5, %v493_v4  ;;  %v771_v47 = vld [vmem:[#allocation9 + $0xec8] sm:$0xff]  ;;  %v520_v54 = vld [vmem:[#allocation9 + $0x6f0] sm:$0xff]  ;;  %v774_v56 = vld [vmem:[#allocation9 + $0xee0] sm:$0xff] }
 0x134   :  { %4292 = vmatpush1.bf16.msra.mxu0 %v4291_v8  ;;  %v4311_v8 = vpack.c.bf16 %v742_v3, %v738_v63  ;;  %v775_v48 = vld [vmem:[#allocation9 + $0xee8] sm:$0xff]  ;;  %v525_v57 = vld [vmem:[#allocation9 + $0x718] sm:$0xff]  ;;  %v4327_v63 = vpack.c.bf16 %v774_v56, %v770_v52  ;;  %v782_v1 = vld [vmem:[#allocation9 + $0xf20] sm:$0xff] }
 0x135   :  { %4294 = vmatprep.subr.bf16.mxu0 %v4293_v13  ;;  %v4313_v13 = vpack.c.bf16 %v751_v6, %v747_v44  ;;  %v529_v58 = vld [vmem:[#allocation9 + $0x738] sm:$0xff]  ;;  %v779_v59 = vld [vmem:[#allocation9 + $0xf08] sm:$0xff]  ;;  %v528_v3 = vld [vmem:[#allocation9 + $0x730] sm:$0xff] }
 0x136   :  { %4872 = vmatpush1.bf16.msra.mxu1 %v4871_v22  ;;  %v4891_v22 = vpack.c.bf16 %v496_v12, %v492_v11  ;;  %v783_v60 = vld [vmem:[#allocation9 + $0xf28] sm:$0xff]  ;;  %v4905_v0 = vpack.c.bf16 %v529_v58, %v525_v57  ;;  %v533_v5 = vld [vmem:[#allocation9 + $0x758] sm:$0xff]  ;;  %v6313_v6 = vld [vmem:[#allocation6 + $0xe0] sm:$0xff] }
 0x137   :  { %4874 = vmatprep.subr.bf16.mxu1 %v4873_v26  ;;  %v4893_v26 = vpack.c.bf16 %v505_v16, %v501_v15  ;;  %v4329_v4 = vpack.c.bf16 %v783_v60, %v779_v59  ;;  %v537_v44 = vld [vmem:[#allocation9 + $0x778] sm:$0xff]  ;;  %238 = vst [vmem:[#allocation2 + $0xe0] sm:$0xff] %v6313_v6  ;;  %v6316_v11 = vld [vmem:[#allocation6 + $0x48] sm:$0xff]  ;;  %v536_v15 = vld [vmem:[#allocation9 + $0x770] sm:$0xff] }
 0x138   :  { %4296 = vmatpush1.bf16.msra.mxu0 %v4295_v25  ;;  %v4315_v25 = vpack.c.bf16 %v750_v14, %v746_v10  ;;  %v786_v10 = vld [vmem:[#allocation9 + $0xf40] sm:$0xff]  ;;  %v532_v14 = vld [vmem:[#allocation9 + $0x750] sm:$0xff]  ;;  %218 = vst [vmem:[#allocation2 + $0x48] sm:$0xff] %v6316_v11  ;;  %v815_v52 = vld [vmem:[#allocation9 + $0x1028] sm:$0xff] }
 0x139   :  { %4298 = vmatprep.subr.bf16.mxu0 %v4297_v31  ;;  %v4317_v31 = vpack.c.bf16 %v759_v21, %v755_v18  ;;  %v6319_v16 = vld [vmem:[#allocation6 + $0x40] sm:$0xff]  ;;  %v556_v57 = vld [vmem:[#allocation9 + $0x810] sm:$0xff] }
 0x13a   :  { %4876 = vmatpush1.bf16.msra.mxu1 %v4875_v37  ;;  %v4895_v37 = vpack.c.bf16 %v504_v30, %v500_v29  ;;  %v790_v21 = vld [vmem:[#allocation9 + $0xf60] sm:$0xff]  ;;  %217 = vst [vmem:[#allocation2 + $0x40] sm:$0xff] %v6319_v16  ;;  %v4911_v29 = vpack.c.bf16 %v536_v15, %v532_v14  ;;  %v560_v58 = vld [vmem:[#allocation9 + $0x830] sm:$0xff]  ;;  %v831_v14 = vld [vmem:[#allocation9 + $0x10a8] sm:$0xff] }
 0x13b   :  { %4878 = vmatprep.subr.bf16.mxu1 %v4877_v38  ;;  %v4897_v38 = vpack.c.bf16 %v513_v35, %v509_v33  ;;  %v4335_v30 = vpack.c.bf16 %v790_v21, %v786_v10  ;;  %v540_v33 = vld [vmem:[#allocation9 + $0x790] sm:$0xff]  ;;  %v810_v56 = vld [vmem:[#allocation9 + $0x1000] sm:$0xff]  ;;  %v577_v10 = vld [vmem:[#allocation9 + $0x8b8] sm:$0xff] }
 0x13c   :  { %4300 = vmatpush1.bf16.msra.mxu0 %v4299_v20  ;;  %v4319_v20 = vpack.c.bf16 %v758_v32, %v754_v28  ;;  %v799_v28 = vld [vmem:[#allocation9 + $0xfa8] sm:$0xff]  ;;  %v794_v32 = vld [vmem:[#allocation9 + $0xf80] sm:$0xff]  ;;  %v544_v35 = vld [vmem:[#allocation9 + $0x7b0] sm:$0xff] }
 0x13d   :  { %4302 = vmatprep.subr.bf16.mxu0 %v4301_v43  ;;  %v4321_v43 = vpack.c.bf16 %v767_v36, %v763_v23  ;;  %v798_v36 = vld [vmem:[#allocation9 + $0xfa0] sm:$0xff] }
 0x13e   :  { %4880 = vmatpush1.bf16.msra.mxu1 %v4879_v49  ;;  %v4899_v49 = vpack.c.bf16 %v512_v42, %v508_v41  ;;  %v4915_v41 = vpack.c.bf16 %v544_v35, %v540_v33  ;;  %v4339_v42 = vpack.c.bf16 %v798_v36, %v794_v32  ;;  %v814_v60 = vld [vmem:[#allocation9 + $0x1020] sm:$0xff]  ;;  %v835_v32 = vld [vmem:[#allocation9 + $0x10c8] sm:$0xff] }
 0x13f   :  { %4882 = vmatprep.subr.bf16.mxu1 %v4881_v51  ;;  %v4901_v51 = vpack.c.bf16 %v521_v27, %v517_v46  ;;  %v548_v46 = vld [vmem:[#allocation9 + $0x7d0] sm:$0xff]  ;;  %v839_v33 = vld [vmem:[#allocation9 + $0x10e8] sm:$0xff]  ;;  %v834_v36 = vld [vmem:[#allocation9 + $0x10c0] sm:$0xff] }
 0x140   :  { %4304 = vmatpush1.bf16.msra.mxu0 %v4303_v50  ;;  %v4323_v50 = vpack.c.bf16 %v766_v45, %v762_v40  ;;  %v807_v40 = vld [vmem:[#allocation9 + $0xfe8] sm:$0xff]  ;;  %v802_v45 = vld [vmem:[#allocation9 + $0xfc0] sm:$0xff]  ;;  %v552_v27 = vld [vmem:[#allocation9 + $0x7f0] sm:$0xff] }
 0x141   :  { %4306 = vmatprep.subr.bf16.mxu0 %v4305_v55  ;;  %v4325_v55 = vpack.c.bf16 %v775_v48, %v771_v47  ;;  %v806_v48 = vld [vmem:[#allocation9 + $0xfe0] sm:$0xff] }
 0x142   :  { %4884 = vmatpush1.bf16.msra.mxu1 %v4883_v61  ;;  %v4903_v61 = vpack.c.bf16 %v520_v54, %v516_v53  ;;  %v4919_v53 = vpack.c.bf16 %v552_v27, %v548_v46  ;;  %v4343_v54 = vpack.c.bf16 %v806_v48, %v802_v45  ;;  %v842_v46 = vld [vmem:[#allocation9 + $0x1100] sm:$0xff]  ;;  %v588_v27 = vld [vmem:[#allocation9 + $0x910] sm:$0xff] }
 0x143   :  { %4886 = vmatprep.subr.bf16.mxu1 %v4885_v17  ;;  %v6310_v17 = vld [vmem:[#allocation6 + $0xe8] sm:$0xff] }
 0x144   :  { %4308 = vmatpush1.bf16.msra.mxu0 %v4307_v62  ;;  %v778_v62 = vld [vmem:[#allocation9 + $0xf00] sm:$0xff]  ;;  %239 = vst [vmem:[#allocation2 + $0xe8] sm:$0xff] %v6310_v17 }
 0x145   :  { %4310 = vmatprep.subr.bf16.mxu0 %v4309_v19  ;;  %v524_v19 = vld [vmem:[#allocation9 + $0x710] sm:$0xff]  ;;  %v4331_v12 = vpack.c.bf16 %v782_v1, %v778_v62  ;;  %v569_v62 = vld [vmem:[#allocation9 + $0x878] sm:$0xff]  ;;  %v4923_v1 = vpack.c.bf16 %v560_v58, %v556_v57  ;;  %v854_v58 = vld [vmem:[#allocation9 + $0x1160] sm:$0xff] }
 0x146   :  { %4888 = vmatpush1.bf16.msra.mxu1 %v4887_v7  ;;  %v787_v7 = vld [vmem:[#allocation9 + $0xf48] sm:$0xff] }
 0x147   :  { %4890 = vmatprep.subr.bf16.mxu1 %v4889_v9  ;;  %v4907_v9 = vpack.c.bf16 %v528_v3, %v524_v19  ;;  %v4347_v19 = vpack.c.bf16 %v814_v60, %v810_v56  ;;  %v600_v56 = vld [vmem:[#allocation9 + $0x970] sm:$0xff]  ;;  %v609_v60 = vld [vmem:[#allocation9 + $0x9b8] sm:$0xff] }
 0x148   :  { %4312 = vmatpush1.bf16.msra.mxu0 %v4311_v8  ;;  %v791_v8 = vld [vmem:[#allocation9 + $0xf68] sm:$0xff] }
 0x149   :  { %4314 = vmatprep.subr.bf16.mxu0 %v4313_v13  ;;  %v4909_v13 = vpack.c.bf16 %v537_v44, %v533_v5  ;;  %v4333_v18 = vpack.c.bf16 %v791_v8, %v787_v7  ;;  %v564_v5 = vld [vmem:[#allocation9 + $0x850] sm:$0xff]  ;;  %v822_v8 = vld [vmem:[#allocation9 + $0x1060] sm:$0xff] }
 0x14a   :  { %4892 = vmatpush1.bf16.msra.mxu1 %v4891_v22  ;;  %v541_v22 = vld [vmem:[#allocation9 + $0x798] sm:$0xff]  ;;  %v568_v44 = vld [vmem:[#allocation9 + $0x870] sm:$0xff] }
 0x14b   :  { %4894 = vmatprep.subr.bf16.mxu1 %v4893_v26  ;;  %v795_v26 = vld [vmem:[#allocation9 + $0xf88] sm:$0xff]  ;;  %v4927_v15 = vpack.c.bf16 %v568_v44, %v564_v5  ;;  %v862_v44 = vld [vmem:[#allocation9 + $0x11a0] sm:$0xff] }
 0x14c   :  { %4316 = vmatpush1.bf16.msra.mxu0 %v4315_v25  ;;  %v545_v25 = vld [vmem:[#allocation9 + $0x7b8] sm:$0xff]  ;;  %v4337_v23 = vpack.c.bf16 %v799_v28, %v795_v26  ;;  %v576_v26 = vld [vmem:[#allocation9 + $0x8b0] sm:$0xff] }
 0x14d   :  { %4318 = vmatprep.subr.bf16.mxu0 %v4317_v31  ;;  %v4913_v31 = vpack.c.bf16 %v545_v25, %v541_v22  ;;  %v826_v22 = vld [vmem:[#allocation9 + $0x1080] sm:$0xff]  ;;  %v572_v25 = vld [vmem:[#allocation9 + $0x890] sm:$0xff] }
 0x14e   :  { %4896 = vmatpush1.bf16.msra.mxu1 %v4895_v37  ;;  %v549_v37 = vld [vmem:[#allocation9 + $0x7d8] sm:$0xff] }
 0x14f   :  { %4898 = vmatprep.subr.bf16.mxu1 %v4897_v38  ;;  %v803_v38 = vld [vmem:[#allocation9 + $0xfc8] sm:$0xff] }
 0x150   :  { %4320 = vmatpush1.bf16.msra.mxu0 %v4319_v20  ;;  %v553_v20 = vld [vmem:[#allocation9 + $0x7f8] sm:$0xff]  ;;  %v4341_v47 = vpack.c.bf16 %v807_v40, %v803_v38  ;;  %v4357_v38 = vpack.c.bf16 %v839_v33, %v835_v32  ;;  %v838_v40 = vld [vmem:[#allocation9 + $0x10e0] sm:$0xff]  ;;  %v879_v32 = vld [vmem:[#allocation9 + $0x1228] sm:$0xff] }
 0x151   :  { %4322 = vmatprep.subr.bf16.mxu0 %v4321_v43  ;;  %v4917_v43 = vpack.c.bf16 %v553_v20, %v549_v37  ;;  %v580_v37 = vld [vmem:[#allocation9 + $0x8d0] sm:$0xff] }
 0x152   :  { %4900 = vmatpush1.bf16.msra.mxu1 %v4899_v49  ;;  %v557_v49 = vld [vmem:[#allocation9 + $0x818] sm:$0xff]  ;;  %v584_v20 = vld [vmem:[#allocation9 + $0x8f0] sm:$0xff] }
 0x153   :  { %4902 = vmatprep.subr.bf16.mxu1 %v4901_v51  ;;  %v811_v51 = vld [vmem:[#allocation9 + $0x1008] sm:$0xff] }
 0x154   :  { %4324 = vmatpush1.bf16.msra.mxu0 %v4323_v50  ;;  %v561_v50 = vld [vmem:[#allocation9 + $0x838] sm:$0xff]  ;;  %v4345_v59 = vpack.c.bf16 %v815_v52, %v811_v51  ;;  %v851_v51 = vld [vmem:[#allocation9 + $0x1148] sm:$0xff] }
 0x155   :  { %4326 = vmatprep.subr.bf16.mxu0 %v4325_v55  ;;  %v4921_v55 = vpack.c.bf16 %v561_v50, %v557_v49  ;;  %v846_v49 = vld [vmem:[#allocation9 + $0x1120] sm:$0xff]  ;;  %v597_v50 = vld [vmem:[#allocation9 + $0x958] sm:$0xff]  ;;  %v855_v52 = vld [vmem:[#allocation9 + $0x1168] sm:$0xff] }
 0x156   :  { %4904 = vmatpush1.bf16.msra.mxu1 %v4903_v61  ;;  %v565_v61 = vld [vmem:[#allocation9 + $0x858] sm:$0xff]  ;;  %v4365_v57 = vpack.c.bf16 %v855_v52, %v851_v51  ;;  %v891_v52 = vld [vmem:[#allocation9 + $0x1288] sm:$0xff] }
 0x157   :  { %4906 = vmatprep.subr.bf16.mxu1 %v4905_v0  ;;  %v823_v0 = vld [vmem:[#allocation9 + $0x1068] sm:$0xff]  ;;  %v4925_v3 = vpack.c.bf16 %v569_v62, %v565_v61  ;;  %v641_v51 = vld [vmem:[#allocation9 + $0xab8] sm:$0xff] }
 0x158   :  { %4328 = vmatpush1.bf16.msra.mxu0 %v4327_v63  ;;  %v819_v63 = vld [vmem:[#allocation9 + $0x1048] sm:$0xff] }
 0x159   :  { %4330 = vmatprep.subr.bf16.mxu0 %v4329_v4  ;;  %v818_v4 = vld [vmem:[#allocation9 + $0x1040] sm:$0xff]  ;;  %v4349_v7 = vpack.c.bf16 %v823_v0, %v819_v63  ;;  %v859_v61 = vld [vmem:[#allocation9 + $0x1188] sm:$0xff] }
 0x15a   :  { %4908 = vmatpush1.bf16.msra.mxu1 %v4907_v9  ;;  %v573_v9 = vld [vmem:[#allocation9 + $0x898] sm:$0xff]  ;;  %v863_v62 = vld [vmem:[#allocation9 + $0x11a8] sm:$0xff] }
 0x15b   :  { %4910 = vmatprep.subr.bf16.mxu1 %v4909_v13  ;;  %v827_v13 = vld [vmem:[#allocation9 + $0x1088] sm:$0xff]  ;;  %v4929_v21 = vpack.c.bf16 %v577_v10, %v573_v9  ;;  %v4369_v5 = vpack.c.bf16 %v863_v62, %v859_v61  ;;  %v649_v61 = vld [vmem:[#allocation9 + $0xaf8] sm:$0xff] }
 0x15c   :  { %4332 = vmatpush1.bf16.msra.mxu0 %v4331_v12  ;;  %v5804_v12 = vld [vmem:[#allocation2 + $0x10] sm:$0xff]  ;;  %v4353_v28 = vpack.c.bf16 %v831_v14, %v827_v13  ;;  %v867_v9 = vld [vmem:[#allocation9 + $0x11c8] sm:$0xff]  ;;  %v866_v13 = vld [vmem:[#allocation9 + $0x11c0] sm:$0xff] }
 0x15d   :  { %4334 = vmatprep.subr.bf16.mxu0 %v4333_v18  ;;  %v4351_v18 = vpack.c.bf16 %v822_v8, %v818_v4  ;;  %v608_v4 = vld [vmem:[#allocation9 + $0x9b0] sm:$0xff]  ;;  %v617_v8 = vld [vmem:[#allocation9 + $0x9f8] sm:$0xff]  ;;  %v871_v10 = vld [vmem:[#allocation9 + $0x11e8] sm:$0xff] }
 0x15e   :  { %4912 = vmatpush1.bf16.msra.mxu1 %v4911_v29  ;;  %v830_v29 = vld [vmem:[#allocation9 + $0x10a0] sm:$0xff]  ;;  %v899_v62 = vld [vmem:[#allocation9 + $0x12c8] sm:$0xff] }
 0x15f   :  { %4914 = vmatprep.subr.bf16.mxu1 %v4913_v31  ;;  %v585_v31 = vld [vmem:[#allocation9 + $0x8f8] sm:$0xff]  ;;  %v4355_v35 = vpack.c.bf16 %v830_v29, %v826_v22  ;;  %v870_v14 = vld [vmem:[#allocation9 + $0x11e0] sm:$0xff]  ;;  %v616_v22 = vld [vmem:[#allocation9 + $0x9f0] sm:$0xff] }
 0x160   :  { %4336 = vmatpush1.bf16.msra.mxu0 %v4335_v30  ;;  %v581_v30 = vld [vmem:[#allocation9 + $0x8d8] sm:$0xff] }
 0x161   :  { %4338 = vmatprep.subr.bf16.mxu0 %v4337_v23  ;;  %v4933_v23 = vpack.c.bf16 %v585_v31, %v581_v30  ;;  %v625_v29 = vld [vmem:[#allocation9 + $0xa38] sm:$0xff]  ;;  %v6332_v30 = vld [vmem:[#allocation6 + $0xf0] sm:$0xff]  ;;  %v875_v31 = vld [vmem:[#allocation9 + $0x1208] sm:$0xff] }
 0x162   :  { %4916 = vmatpush1.bf16.msra.mxu1 %v4915_v41  ;;  %v589_v41 = vld [vmem:[#allocation9 + $0x918] sm:$0xff]  ;;  %240 = vst [vmem:[#allocation2 + $0xf0] sm:$0xff] %v6332_v30 }
 0x163   :  { %4918 = vmatprep.subr.bf16.mxu1 %v4917_v43  ;;  %v4359_v43 = vpack.c.bf16 %v838_v40, %v834_v36  ;;  %v4377_v40 = vpack.c.bf16 %v879_v32, %v875_v31  ;;  %v665_v31 = vld [vmem:[#allocation9 + $0xb78] sm:$0xff]  ;;  %v915_v32 = vld [vmem:[#allocation9 + $0x1348] sm:$0xff] }
 0x164   :  { %4340 = vmatpush1.bf16.msra.mxu0 %v4339_v42  ;;  %v843_v42 = vld [vmem:[#allocation9 + $0x1108] sm:$0xff] }
 0x165   :  { %4342 = vmatprep.subr.bf16.mxu0 %v4341_v47  ;;  %v592_v47 = vld [vmem:[#allocation9 + $0x930] sm:$0xff] }
 0x166   :  { %4920 = vmatpush1.bf16.msra.mxu1 %v4919_v53 }
 0x167   :  { %4922 = vmatprep.subr.bf16.mxu1 %v4921_v55  ;;  %v596_v55 = vld [vmem:[#allocation9 + $0x950] sm:$0xff] }
 0x168   :  { %4344 = vmatpush1.bf16.msra.mxu0 %v4343_v54  ;;  %v850_v54 = vld [vmem:[#allocation9 + $0x1140] sm:$0xff]  ;;  %v4943_v63 = vpack.c.bf16 %v600_v56, %v596_v55  ;;  %v636_v56 = vld [vmem:[#allocation9 + $0xa90] sm:$0xff] }
 0x169   :  { %4346 = vmatprep.subr.bf16.mxu0 %v4345_v59  ;;  %2717 = vmatmul.mubr.f32.vlgmr.msra.gmra.mrb[4].mxu1 %v5804_v12  ;;  %v605_v59 = vld [vmem:[#allocation9 + $0x998] sm:$0xff]  ;;  %v4367_v0 = vpack.c.bf16 %v854_v58, %v850_v54  ;;  %v890_v55 = vld [vmem:[#allocation9 + $0x1280] sm:$0xff] }
 0x16a   :  { %4924 = vmatpush1.bf16.msra.mxu1 %v4923_v1  ;;  %2722 = vmatprep.mubr.f32.mxu1 %v6287_v24  ;;  %v847_v24 = vld [vmem:[#allocation9 + $0x1128] sm:$0xff]  ;;  %v4945_v1 = vpack.c.bf16 %v609_v60, %v605_v59  ;;  %v894_v59 = vld [vmem:[#allocation9 + $0x12a0] sm:$0xff]  ;;  %v645_v60 = vld [vmem:[#allocation9 + $0xad8] sm:$0xff] }
 0x16b   :  { %2024 = vmatmul.mubr.f32.vlgmr.msra.gmra.mrb[0].mxu0 %v6304_v2  ;;  %4926 = vmatprep.subr.bf16.mxu1 %v4925_v3  ;;  %v4931_v2 = vpack.c.bf16 %v576_v26, %v572_v25  ;;  %v4361_v48 = vpack.c.bf16 %v847_v24, %v843_v42  ;;  %v604_v3 = vld [vmem:[#allocation9 + $0x990] sm:$0xff]  ;;  %v6329_v25 = vld [vmem:[#allocation6 + $0xf8] sm:$0xff]  ;;  %v4373_v26 = vpack.c.bf16 %v871_v10, %v867_v9  ;;  %v883_v24 = vld [vmem:[#allocation9 + $0x1248] sm:$0xff] }
 0x16c   :  { %4348 = vmatpush1.bf16.msra.mxu0 %v4347_v19  ;;  %2029 = vmatprep.mubr.f32.mxu0 %v6310_v17  ;;  %v593_v17 = vld [vmem:[#allocation9 + $0x938] sm:$0xff]  ;;  %v858_v19 = vld [vmem:[#allocation9 + $0x1180] sm:$0xff]  ;;  %v4947_v12 = vpack.c.bf16 %v608_v4, %v604_v3  ;;  %241 = vst [vmem:[#allocation2 + $0xf8] sm:$0xff] %v6329_v25  ;;  %v6338_v42 = vld [vmem:[#allocation6 + $0x50] sm:$0xff] }
 0x16d   :  { %4350 = vmatprep.subr.bf16.mxu0 %v4349_v7  ;;  %2723 = vmatmul.mubr.f32.gmra.mrb[6].mxu1 %v6290_v34  ;;  %v4937_v45 = vpack.c.bf16 %v593_v17, %v589_v41  ;;  %v601_v34 = vld [vmem:[#allocation9 + $0x978] sm:$0xff]  ;;  %219 = vst [vmem:[#allocation2 + $0x50] sm:$0xff] %v6338_v42  ;;  %v898_v3 = vld [vmem:[#allocation9 + $0x12c0] sm:$0xff]  ;;  %v644_v4 = vld [vmem:[#allocation9 + $0xad0] sm:$0xff] }
 0x16e   :  { %4928 = vmatpush1.bf16.msra.mxu1 %v4927_v15  ;;  %2793 = vmatprep.mubr.f32.mxu1 %v6295_v39  ;;  %v4363_v39 = vpack.c.bf16 %v846_v49, %v842_v46  ;;  %v4941_v53 = vpack.c.bf16 %v601_v34, %v597_v50  ;;  %v613_v7 = vld [vmem:[#allocation9 + $0x9d8] sm:$0xff]  ;;  %v4371_v15 = vpack.c.bf16 %v862_v44, %v858_v19  ;;  %v886_v50 = vld [vmem:[#allocation9 + $0x1260] sm:$0xff]  ;;  %v907_v10 = vld [vmem:[#allocation9 + $0x1308] sm:$0xff] }
 0x16f   :  { %2030 = vmatmul.mubr.f32.gmra.mrb[2].mxu0 %v6313_v6  ;;  %4930 = vmatprep.subr.bf16.mxu1 %v4929_v21  ;;  %v4935_v6 = vpack.c.bf16 %v584_v20, %v580_v37  ;;  %v612_v21 = vld [vmem:[#allocation9 + $0x9d0] sm:$0xff]  ;;  %v878_v37 = vld [vmem:[#allocation9 + $0x1220] sm:$0xff]  ;;  %v629_v41 = vld [vmem:[#allocation9 + $0xa58] sm:$0xff]  ;;  %v4965_v19 = vpack.c.bf16 %v649_v61, %v645_v60 }
 0x170   :  { %4352 = vmatpush1.bf16.msra.mxu0 %v4351_v18  ;;  %2100 = vmatprep.mubr.f32.mxu0 %v6316_v11  ;;  %v4939_v11 = vpack.c.bf16 %v592_v47, %v588_v27  ;;  %v4949_v18 = vpack.c.bf16 %v617_v8, %v613_v7  ;;  %v4951_v33 = vpack.c.bf16 %v616_v22, %v612_v21  ;;  %v620_v20 = vld [vmem:[#allocation9 + $0xa10] sm:$0xff]  ;;  %v633_v17 = vld [vmem:[#allocation9 + $0xa78] sm:$0xff]  ;;  %v882_v27 = vld [vmem:[#allocation9 + $0x1240] sm:$0xff] }
 0x171   :  { %4354 = vmatprep.subr.bf16.mxu0 %v4353_v28  ;;  %v621_v28 = vld [vmem:[#allocation9 + $0xa18] sm:$0xff]  ;;  %v4957_v46 = vpack.c.bf16 %v633_v17, %v629_v41  ;;  %v628_v47 = vld [vmem:[#allocation9 + $0xa50] sm:$0xff]  ;;  %v902_v7 = vld [vmem:[#allocation9 + $0x12e0] sm:$0xff] }
 0x172   :  { %4932 = vmatpush1.bf16.msra.mxu1 %v4931_v2  ;;  %v874_v2 = vld [vmem:[#allocation9 + $0x1200] sm:$0xff]  ;;  %v4953_v36 = vpack.c.bf16 %v625_v29, %v621_v28  ;;  %v637_v34 = vld [vmem:[#allocation9 + $0xa98] sm:$0xff]  ;;  %v652_v21 = vld [vmem:[#allocation9 + $0xb10] sm:$0xff] }
 0x173   :  { %4934 = vmatprep.subr.bf16.mxu1 %v4933_v23  ;;  %v4375_v23 = vpack.c.bf16 %v870_v14, %v866_v13  ;;  %v4961_v54 = vpack.c.bf16 %v641_v51, %v637_v34  ;;  %v653_v8 = vld [vmem:[#allocation9 + $0xb18] sm:$0xff]  ;;  %v4391_v14 = vpack.c.bf16 %v902_v7, %v898_v3  ;;  %v656_v22 = vld [vmem:[#allocation9 + $0xb30] sm:$0xff]  ;;  %v910_v28 = vld [vmem:[#allocation9 + $0x1320] sm:$0xff] }
 0x174   :  { %4356 = vmatpush1.bf16.msra.mxu0 %v4355_v35  ;;  %v6335_v35 = vld [vmem:[#allocation6 + $0x58] sm:$0xff]  ;;  %v918_v41 = vld [vmem:[#allocation9 + $0x1360] sm:$0xff] }
 0x175   :  { %4358 = vmatprep.subr.bf16.mxu0 %v4357_v38  ;;  %v624_v38 = vld [vmem:[#allocation9 + $0xa30] sm:$0xff]  ;;  %220 = vst [vmem:[#allocation2 + $0x58] sm:$0xff] %v6335_v35  ;;  %v657_v9 = vld [vmem:[#allocation9 + $0xb38] sm:$0xff]  ;;  %v926_v34 = vld [vmem:[#allocation9 + $0x13a0] sm:$0xff] }
 0x176   :  { %4936 = vmatpush1.bf16.msra.mxu1 %v4935_v6  ;;  %v887_v6 = vld [vmem:[#allocation9 + $0x1268] sm:$0xff]  ;;  %v661_v29 = vld [vmem:[#allocation9 + $0xb58] sm:$0xff]  ;;  %v934_v60 = vld [vmem:[#allocation9 + $0x13e0] sm:$0xff] }
 0x177   :  { %4938 = vmatprep.subr.bf16.mxu1 %v4937_v45  ;;  %v4379_v45 = vpack.c.bf16 %v878_v37, %v874_v2  ;;  %v4381_v49 = vpack.c.bf16 %v887_v6, %v883_v24  ;;  %v4971_v2 = vpack.c.bf16 %v656_v22, %v652_v21  ;;  %v914_v37 = vld [vmem:[#allocation9 + $0x1340] sm:$0xff]  ;;  %v669_v17 = vld [vmem:[#allocation9 + $0xb98] sm:$0xff]  ;;  %v923_v6 = vld [vmem:[#allocation9 + $0x1388] sm:$0xff] }
 0x178   :  { %4360 = vmatpush1.bf16.msra.mxu0 %v4359_v43  ;;  %v4955_v43 = vpack.c.bf16 %v624_v38, %v620_v20  ;;  %v660_v20 = vld [vmem:[#allocation9 + $0xb50] sm:$0xff]  ;;  %v673_v24 = vld [vmem:[#allocation9 + $0xbb8] sm:$0xff]  ;;  %v946_v21 = vld [vmem:[#allocation9 + $0x1440] sm:$0xff] }
 0x179   :  { %4362 = vmatprep.subr.bf16.mxu0 %v4361_v48  ;;  %v632_v48 = vld [vmem:[#allocation9 + $0xa70] sm:$0xff]  ;;  %v677_v51 = vld [vmem:[#allocation9 + $0xbd8] sm:$0xff] }
 0x17a   :  { %4940 = vmatpush1.bf16.msra.mxu1 %v4939_v11  ;;  %v895_v11 = vld [vmem:[#allocation9 + $0x12a8] sm:$0xff]  ;;  %v664_v38 = vld [vmem:[#allocation9 + $0xb70] sm:$0xff]  ;;  %v685_v61 = vld [vmem:[#allocation9 + $0xc18] sm:$0xff] }
 0x17b   :  { %4942 = vmatprep.subr.bf16.mxu1 %v4941_v53  ;;  %v4383_v53 = vpack.c.bf16 %v886_v50, %v882_v27  ;;  %v4385_v58 = vpack.c.bf16 %v895_v11, %v891_v52  ;;  %v4977_v27 = vpack.c.bf16 %v673_v24, %v669_v17  ;;  %v681_v52 = vld [vmem:[#allocation9 + $0xbf8] sm:$0xff]  ;;  %v931_v11 = vld [vmem:[#allocation9 + $0x13c8] sm:$0xff]  ;;  %v692_v22 = vld [vmem:[#allocation9 + $0xc50] sm:$0xff] }
 0x17c   :  { %4364 = vmatpush1.bf16.msra.mxu0 %v4363_v39  ;;  %v4959_v39 = vpack.c.bf16 %v632_v48, %v628_v47  ;;  %v922_v47 = vld [vmem:[#allocation9 + $0x1380] sm:$0xff]  ;;  %v668_v48 = vld [vmem:[#allocation9 + $0xb90] sm:$0xff]  ;;  %v6342_v24 = vld [vmem:[#allocation6 + $0x108] sm:$0xff] }
 0x17d   :  { %4366 = vmatprep.subr.bf16.mxu0 %v4365_v57  ;;  %v640_v57 = vld [vmem:[#allocation9 + $0xab0] sm:$0xff]  ;;  %243 = vst [vmem:[#allocation2 + $0x108] sm:$0xff] %v6342_v24 }
 0x17e   :  { %4944 = vmatpush1.bf16.msra.mxu1 %v4943_v63  ;;  %v903_v63 = vld [vmem:[#allocation9 + $0x12e8] sm:$0xff]  ;;  %v704_v17 = vld [vmem:[#allocation9 + $0xcb0] sm:$0xff] }
 0x17f   :  { %4946 = vmatprep.subr.bf16.mxu1 %v4945_v1  ;;  %v4387_v1 = vpack.c.bf16 %v894_v59, %v890_v55  ;;  %v4389_v44 = vpack.c.bf16 %v903_v63, %v899_v62  ;;  %v4981_v55 = vpack.c.bf16 %v681_v52, %v677_v51  ;;  %v689_v62 = vld [vmem:[#allocation9 + $0xc38] sm:$0xff]  ;;  %v939_v63 = vld [vmem:[#allocation9 + $0x1408] sm:$0xff]  ;;  %v966_v51 = vld [vmem:[#allocation9 + $0x14e0] sm:$0xff] }
 0x180   :  { %4368 = vmatpush1.bf16.msra.mxu0 %v4367_v0  ;;  %v4963_v0 = vpack.c.bf16 %v640_v57, %v636_v56  ;;  %v930_v56 = vld [vmem:[#allocation9 + $0x13c0] sm:$0xff]  ;;  %v676_v57 = vld [vmem:[#allocation9 + $0xbd0] sm:$0xff]  ;;  %v4985_v3 = vpack.c.bf16 %v689_v62, %v685_v61 }
 0x181   :  { %4370 = vmatprep.subr.bf16.mxu0 %v4369_v5  ;;  %v648_v5 = vld [vmem:[#allocation9 + $0xaf0] sm:$0xff]  ;;  %v970_v62 = vld [vmem:[#allocation9 + $0x1500] sm:$0xff] }
 0x182   :  { %4948 = vmatpush1.bf16.msra.mxu1 %v4947_v12  ;;  %v911_v12 = vld [vmem:[#allocation9 + $0x1328] sm:$0xff]  ;;  %v4967_v13 = vpack.c.bf16 %v648_v5, %v644_v4  ;;  %v938_v4 = vld [vmem:[#allocation9 + $0x1400] sm:$0xff]  ;;  %v684_v5 = vld [vmem:[#allocation9 + $0xc10] sm:$0xff] }
 0x183   :  { %4950 = vmatprep.subr.bf16.mxu1 %v4949_v18  ;;  %v906_v18 = vld [vmem:[#allocation9 + $0x1300] sm:$0xff]  ;;  %v708_v52 = vld [vmem:[#allocation9 + $0xcd0] sm:$0xff] }
 0x184   :  { %4372 = vmatpush1.bf16.msra.mxu0 %v4371_v15  ;;  %v4969_v15 = vpack.c.bf16 %v657_v9, %v653_v8  ;;  %v942_v8 = vld [vmem:[#allocation9 + $0x1420] sm:$0xff]  ;;  %v693_v9 = vld [vmem:[#allocation9 + $0xc58] sm:$0xff] }
 0x185   :  { %4374 = vmatprep.subr.bf16.mxu0 %v4373_v26  ;;  %v4393_v26 = vpack.c.bf16 %v911_v12, %v907_v10  ;;  %v697_v10 = vld [vmem:[#allocation9 + $0xc78] sm:$0xff]  ;;  %v947_v12 = vld [vmem:[#allocation9 + $0x1448] sm:$0xff] }
 0x186   :  { %4952 = vmatpush1.bf16.msra.mxu1 %v4951_v33  ;;  %v919_v33 = vld [vmem:[#allocation9 + $0x1368] sm:$0xff] }
 0x187   :  { %4954 = vmatprep.subr.bf16.mxu1 %v4953_v36  ;;  %v4973_v36 = vpack.c.bf16 %v665_v31, %v661_v29  ;;  %v950_v29 = vld [vmem:[#allocation9 + $0x1460] sm:$0xff]  ;;  %v701_v31 = vld [vmem:[#allocation9 + $0xc98] sm:$0xff] }
 0x188   :  { %4376 = vmatpush1.bf16.msra.mxu0 %v4375_v23  ;;  %v4395_v23 = vpack.c.bf16 %v910_v28, %v906_v18  ;;  %v4989_v18 = vpack.c.bf16 %v697_v10, %v693_v9  ;;  %v978_v9 = vld [vmem:[#allocation9 + $0x1540] sm:$0xff]  ;;  %v724_v10 = vld [vmem:[#allocation9 + $0xd50] sm:$0xff] }
 0x189   :  { %4378 = vmatprep.subr.bf16.mxu0 %v4377_v40  ;;  %v4397_v40 = vpack.c.bf16 %v919_v33, %v915_v32  ;;  %v705_v32 = vld [vmem:[#allocation9 + $0xcb8] sm:$0xff]  ;;  %v5805_v33 = vld [vmem:[#allocation2 + $0x20] sm:$0xff] }
 0x18a   :  { %4956 = vmatpush1.bf16.msra.mxu1 %v4955_v43  ;;  %v927_v43 = vld [vmem:[#allocation9 + $0x13a8] sm:$0xff] }
 0x18b   :  { %4958 = vmatprep.subr.bf16.mxu1 %v4957_v46  ;;  %v4399_v46 = vpack.c.bf16 %v918_v41, %v914_v37  ;;  %v4401_v50 = vpack.c.bf16 %v927_v43, %v923_v6  ;;  %v954_v37 = vld [vmem:[#allocation9 + $0x1480] sm:$0xff]  ;;  %v700_v41 = vld [vmem:[#allocation9 + $0xc90] sm:$0xff]  ;;  %v709_v43 = vld [vmem:[#allocation9 + $0xcd8] sm:$0xff] }
 0x18c   :  { %4380 = vmatpush1.bf16.msra.mxu0 %v4379_v45  ;;  %v4975_v45 = vpack.c.bf16 %v664_v38, %v660_v20  ;;  %v958_v20 = vld [vmem:[#allocation9 + $0x14a0] sm:$0xff]  ;;  %v4415_v38 = vpack.c.bf16 %v950_v29, %v946_v21  ;;  %v987_v21 = vld [vmem:[#allocation9 + $0x1588] sm:$0xff] }
 0x18d   :  { %4382 = vmatprep.subr.bf16.mxu0 %v4381_v49  ;;  %v672_v49 = vld [vmem:[#allocation9 + $0xbb0] sm:$0xff] }
 0x18e   :  { %4960 = vmatpush1.bf16.msra.mxu1 %v4959_v39  ;;  %v935_v39 = vld [vmem:[#allocation9 + $0x13e8] sm:$0xff] }
 0x18f   :  { %4962 = vmatprep.subr.bf16.mxu1 %v4961_v54  ;;  %v4403_v54 = vpack.c.bf16 %v926_v34, %v922_v47  ;;  %v4405_v59 = vpack.c.bf16 %v935_v39, %v931_v11  ;;  %v5806_v47 = vld [vmem:[#allocation2 + $0xd8] sm:$0xff]  ;;  %v712_v11 = vld [vmem:[#allocation9 + $0xcf0] sm:$0xff] }
 0x190   :  { %4384 = vmatpush1.bf16.msra.mxu0 %v4383_v53  ;;  %v4979_v53 = vpack.c.bf16 %v672_v49, %v668_v48  ;;  %v4995_v48 = vpack.c.bf16 %v704_v17, %v700_v41  ;;  %v962_v49 = vld [vmem:[#allocation9 + $0x14c0] sm:$0xff]  ;;  %v999_v41 = vld [vmem:[#allocation9 + $0x15e8] sm:$0xff] }
 0x191   :  { %4386 = vmatprep.subr.bf16.mxu0 %v4385_v58  ;;  %v680_v58 = vld [vmem:[#allocation9 + $0xbf0] sm:$0xff] }
 0x192   :  { %4964 = vmatpush1.bf16.msra.mxu1 %v4963_v0  ;;  %v943_v0 = vld [vmem:[#allocation9 + $0x1428] sm:$0xff] }
 0x193   :  { %4966 = vmatprep.subr.bf16.mxu1 %v4965_v19  ;;  %v4407_v19 = vpack.c.bf16 %v934_v60, %v930_v56  ;;  %v4409_v7 = vpack.c.bf16 %v943_v0, %v939_v63  ;;  %v6353_v56 = vld [vmem:[#allocation6 + $0x60] sm:$0xff]  ;;  %v4423_v60 = vpack.c.bf16 %v966_v51, %v962_v49  ;;  %v716_v63 = vld [vmem:[#allocation9 + $0xd10] sm:$0xff]  ;;  %v749_v49 = vld [vmem:[#allocation9 + $0xe18] sm:$0xff] }
 0x194   :  { %4388 = vmatpush1.bf16.msra.mxu0 %v4387_v1  ;;  %v4983_v1 = vpack.c.bf16 %v680_v58, %v676_v57  ;;  %v975_v57 = vld [vmem:[#allocation9 + $0x1528] sm:$0xff]  ;;  %v5808_v58 = vld [vmem:[#allocation2 + $0x38] sm:$0xff]  ;;  %221 = vst [vmem:[#allocation2 + $0x60] sm:$0xff] %v6353_v56  ;;  %v720_v0 = vld [vmem:[#allocation9 + $0xd30] sm:$0xff] }
 0x195   :  { %4390 = vmatprep.subr.bf16.mxu0 %v4389_v44  ;;  %v688_v44 = vld [vmem:[#allocation9 + $0xc30] sm:$0xff]  ;;  %v1007_v51 = vld [vmem:[#allocation9 + $0x1628] sm:$0xff] }
 0x196   :  { %4968 = vmatpush1.bf16.msra.mxu1 %v4967_v13  ;;  %v951_v13 = vld [vmem:[#allocation9 + $0x1468] sm:$0xff] }
 0x197   :  { %4970 = vmatprep.subr.bf16.mxu1 %v4969_v15  ;;  %v4411_v15 = vpack.c.bf16 %v942_v8, %v938_v4  ;;  %v4413_v28 = vpack.c.bf16 %v951_v13, %v947_v12  ;;  %v729_v4 = vld [vmem:[#allocation9 + $0xd78] sm:$0xff]  ;;  %v728_v12 = vld [vmem:[#allocation9 + $0xd70] sm:$0xff] }
 0x198   :  { %4392 = vmatpush1.bf16.msra.mxu0 %v4391_v14  ;;  %v4987_v14 = vpack.c.bf16 %v688_v44, %v684_v5  ;;  %v979_v5 = vld [vmem:[#allocation9 + $0x1548] sm:$0xff]  ;;  %v5003_v44 = vpack.c.bf16 %v720_v0, %v716_v63 }
 0x199   :  { %4394 = vmatprep.subr.bf16.mxu0 %v4393_v26  ;;  %v696_v26 = vld [vmem:[#allocation9 + $0xc70] sm:$0xff] }
 0x19a   :  { %4972 = vmatpush1.bf16.msra.mxu1 %v4971_v2  ;;  %v955_v2 = vld [vmem:[#allocation9 + $0x1488] sm:$0xff] }
 0x19b   :  { %4974 = vmatprep.subr.bf16.mxu1 %v4973_v36  ;;  %v4991_v36 = vpack.c.bf16 %v696_v26, %v692_v22  ;;  %v991_v22 = vld [vmem:[#allocation9 + $0x15a8] sm:$0xff]  ;;  %v5007_v26 = vpack.c.bf16 %v728_v12, %v724_v10 }
 0x19c   :  { %4396 = vmatpush1.bf16.msra.mxu0 %v4395_v23  ;;  %v959_v23 = vld [vmem:[#allocation9 + $0x14a8] sm:$0xff] }
 0x19d   :  { %4398 = vmatprep.subr.bf16.mxu0 %v4397_v40  ;;  %v4993_v40 = vpack.c.bf16 %v705_v32, %v701_v31  ;;  %v4417_v6 = vpack.c.bf16 %v959_v23, %v955_v2  ;;  %v986_v31 = vld [vmem:[#allocation9 + $0x1580] sm:$0xff]  ;;  %v732_v32 = vld [vmem:[#allocation9 + $0xd90] sm:$0xff]  ;;  %v4433_v23 = vpack.c.bf16 %v991_v22, %v987_v21  ;;  %v773_v22 = vld [vmem:[#allocation9 + $0xed8] sm:$0xff] }
 0x19e   :  { %4976 = vmatpush1.bf16.msra.mxu1 %v4975_v45  ;;  %v713_v45 = vld [vmem:[#allocation9 + $0xcf8] sm:$0xff]  ;;  %v1022_v21 = vld [vmem:[#allocation9 + $0x16a0] sm:$0xff] }
 0x19f   :  { %4978 = vmatprep.subr.bf16.mxu1 %v4977_v27  ;;  %v967_v27 = vld [vmem:[#allocation9 + $0x14e8] sm:$0xff]  ;;  %v4997_v34 = vpack.c.bf16 %v713_v45, %v709_v43  ;;  %v994_v45 = vld [vmem:[#allocation9 + $0x15c0] sm:$0xff] }
 0x1a0   :  { %4400 = vmatpush1.bf16.msra.mxu0 %v4399_v46  ;;  %v963_v46 = vld [vmem:[#allocation9 + $0x14c8] sm:$0xff] }
 0x1a1   :  { %4402 = vmatprep.subr.bf16.mxu0 %v4401_v50  ;;  %v6350_v50 = vld [vmem:[#allocation6 + $0x68] sm:$0xff]  ;;  %v4421_v39 = vpack.c.bf16 %v967_v27, %v963_v46  ;;  %v740_v46 = vld [vmem:[#allocation9 + $0xdd0] sm:$0xff] }
 0x1a2   :  { %4980 = vmatpush1.bf16.msra.mxu1 %v4979_v53  ;;  %222 = vst [vmem:[#allocation2 + $0x68] sm:$0xff] %v6350_v50  ;;  %v717_v53 = vld [vmem:[#allocation9 + $0xd18] sm:$0xff]  ;;  %v744_v27 = vld [vmem:[#allocation9 + $0xdf0] sm:$0xff] }
 0x1a3   :  { %4982 = vmatprep.subr.bf16.mxu1 %v4981_v55  ;;  %v5807_v55 = vld [vmem:[#allocation2 + $0xd0] sm:$0xff] }
 0x1a4   :  { %4404 = vmatpush1.bf16.msra.mxu0 %v4403_v54  ;;  %v721_v54 = vld [vmem:[#allocation9 + $0xd38] sm:$0xff] }
 0x1a5   :  { %4406 = vmatprep.subr.bf16.mxu0 %v4405_v59  ;;  %v4999_v59 = vpack.c.bf16 %v712_v11, %v708_v52  ;;  %v5001_v61 = vpack.c.bf16 %v721_v54, %v717_v53  ;;  %v5015_v52 = vpack.c.bf16 %v744_v27, %v740_v46  ;;  %v1002_v53 = vld [vmem:[#allocation9 + $0x1600] sm:$0xff]  ;;  %v748_v54 = vld [vmem:[#allocation9 + $0xe10] sm:$0xff] }
 0x1a6   :  { %4984 = vmatpush1.bf16.msra.mxu1 %v4983_v1 }
 0x1a7   :  { %4986 = vmatprep.subr.bf16.mxu1 %v4985_v3  ;;  %v725_v3 = vld [vmem:[#allocation9 + $0xd58] sm:$0xff] }
 0x1a8   :  { %4408 = vmatpush1.bf16.msra.mxu0 %v4407_v19  ;;  %v974_v19 = vld [vmem:[#allocation9 + $0x1520] sm:$0xff]  ;;  %v5005_v8 = vpack.c.bf16 %v729_v4, %v725_v3  ;;  %v760_v3 = vld [vmem:[#allocation9 + $0xe70] sm:$0xff] }
 0x1a9   :  { %4410 = vmatprep.subr.bf16.mxu0 %v4409_v7  ;;  %2794 = vmatmul.mubr.f32.vlgmr.msra.gmra.mrb[4].mxu1 %v5805_v33  ;;  %v4427_v7 = vpack.c.bf16 %v974_v19, %v970_v62  ;;  %v736_v33 = vld [vmem:[#allocation9 + $0xdb0] sm:$0xff] }
 0x1aa   :  { %4988 = vmatpush1.bf16.msra.mxu1 %v4987_v14  ;;  %2799 = vmatprep.mubr.f32.mxu1 %v5806_v47  ;;  %v982_v14 = vld [vmem:[#allocation9 + $0x1560] sm:$0xff]  ;;  %v5011_v17 = vpack.c.bf16 %v736_v33, %v732_v32  ;;  %v756_v19 = vld [vmem:[#allocation9 + $0xe50] sm:$0xff] }
 0x1ab   :  { %2101 = vmatmul.mubr.f32.vlgmr.msra.gmra.mrb[0].mxu0 %v6319_v16  ;;  %4990 = vmatprep.subr.bf16.mxu1 %v4989_v18  ;;  %v6346_v16 = vld [vmem:[#allocation6 + $0x100] sm:$0xff]  ;;  %v737_v18 = vld [vmem:[#allocation9 + $0xdb8] sm:$0xff] }
 0x1ac   :  { %4412 = vmatpush1.bf16.msra.mxu0 %v4411_v15  ;;  %2106 = vmatprep.mubr.f32.mxu0 %v6329_v25  ;;  %242 = vst [vmem:[#allocation2 + $0x100] sm:$0xff] %v6346_v16  ;;  %v4419_v25 = vpack.c.bf16 %v958_v20, %v954_v37  ;;  %v733_v15 = vld [vmem:[#allocation9 + $0xd98] sm:$0xff] }
 0x1ad   :  { %4414 = vmatprep.subr.bf16.mxu0 %v4413_v28  ;;  %2800 = vmatmul.mubr.f32.gmra.mrb[6].mxu1 %v5807_v55  ;;  %v4431_v28 = vpack.c.bf16 %v982_v14, %v978_v9  ;;  %v5009_v29 = vpack.c.bf16 %v737_v18, %v733_v15  ;;  %v741_v37 = vld [vmem:[#allocation9 + $0xdd8] sm:$0xff]  ;;  %v752_v55 = vld [vmem:[#allocation9 + $0xe30] sm:$0xff]  ;;  %v5023_v9 = vpack.c.bf16 %v760_v3, %v756_v19  ;;  %v1055_v19 = vld [vmem:[#allocation9 + $0x17a8] sm:$0xff] }
 0x1ae   :  { %4992 = vmatpush1.bf16.msra.mxu1 %v4991_v36  ;;  %2870 = vmatprep.mubr.f32.mxu1 %v5808_v58  ;;  %v990_v36 = vld [vmem:[#allocation9 + $0x15a0] sm:$0xff]  ;;  %v745_v20 = vld [vmem:[#allocation9 + $0xdf8] sm:$0xff]  ;;  %v5019_v62 = vpack.c.bf16 %v752_v55, %v748_v54  ;;  %v764_v14 = vld [vmem:[#allocation9 + $0xe90] sm:$0xff] }
 0x1af   :  { %2107 = vmatmul.mubr.f32.gmra.mrb[2].mxu0 %v6332_v30  ;;  %4994 = vmatprep.subr.bf16.mxu1 %v4993_v40  ;;  %v971_v30 = vld [vmem:[#allocation9 + $0x1508] sm:$0xff]  ;;  %v5013_v43 = vpack.c.bf16 %v745_v20, %v741_v37  ;;  %v757_v58 = vld [vmem:[#allocation9 + $0xe58] sm:$0xff]  ;;  %v768_v15 = vld [vmem:[#allocation9 + $0xeb0] sm:$0xff] }
 0x1b0   :  { %4416 = vmatpush1.bf16.msra.mxu0 %v4415_v38  ;;  %2177 = vmatprep.mubr.f32.mxu0 %v6335_v35  ;;  %v4425_v1 = vpack.c.bf16 %v975_v57, %v971_v30  ;;  %v983_v35 = vld [vmem:[#allocation9 + $0x1568] sm:$0xff]  ;;  %v1006_v57 = vld [vmem:[#allocation9 + $0x1620] sm:$0xff]  ;;  %v776_v37 = vld [vmem:[#allocation9 + $0xef0] sm:$0xff] }
 0x1b1   :  { %4418 = vmatprep.subr.bf16.mxu0 %v4417_v6  ;;  %v4429_v13 = vpack.c.bf16 %v983_v35, %v979_v5  ;;  %v995_v40 = vld [vmem:[#allocation9 + $0x15c8] sm:$0xff]  ;;  %v4435_v6 = vpack.c.bf16 %v990_v36, %v986_v31  ;;  %v4443_v63 = vpack.c.bf16 %v1006_v57, %v1002_v53  ;;  %v1014_v5 = vld [vmem:[#allocation9 + $0x1660] sm:$0xff]  ;;  %v765_v35 = vld [vmem:[#allocation9 + $0xe98] sm:$0xff]  ;;  %v5027_v31 = vpack.c.bf16 %v768_v15, %v764_v14 }
 0x1b2   :  { %4996 = vmatpush1.bf16.msra.mxu1 %v4995_v48  ;;  %v4437_v47 = vpack.c.bf16 %v999_v41, %v995_v40  ;;  %v998_v48 = vld [vmem:[#allocation9 + $0x15e0] sm:$0xff]  ;;  %v772_v36 = vld [vmem:[#allocation9 + $0xed0] sm:$0xff]  ;;  %v781_v41 = vld [vmem:[#allocation9 + $0xf18] sm:$0xff] }
 0x1b3   :  { %4998 = vmatprep.subr.bf16.mxu1 %v4997_v34  ;;  %v1003_v34 = vld [vmem:[#allocation9 + $0x1608] sm:$0xff]  ;;  %v4439_v11 = vpack.c.bf16 %v998_v48, %v994_v45  ;;  %v1030_v40 = vld [vmem:[#allocation9 + $0x16e0] sm:$0xff]  ;;  %v5031_v27 = vpack.c.bf16 %v776_v37, %v772_v36 }
 0x1b4   :  { %4420 = vmatpush1.bf16.msra.mxu0 %v4419_v25  ;;  %v753_v25 = vld [vmem:[#allocation9 + $0xe38] sm:$0xff]  ;;  %v4441_v30 = vpack.c.bf16 %v1007_v51, %v1003_v34  ;;  %v1039_v45 = vld [vmem:[#allocation9 + $0x1728] sm:$0xff]  ;;  %v784_v34 = vld [vmem:[#allocation9 + $0xf30] sm:$0xff] }
 0x1b5   :  { %4422 = vmatprep.subr.bf16.mxu0 %v4421_v39  ;;  %v5017_v39 = vpack.c.bf16 %v753_v25, %v749_v49  ;;  %v1034_v49 = vld [vmem:[#allocation9 + $0x1700] sm:$0xff]  ;;  %v780_v25 = vld [vmem:[#allocation9 + $0xf10] sm:$0xff]  ;;  %v1043_v53 = vld [vmem:[#allocation9 + $0x1748] sm:$0xff] }
 0x1b6   :  { %5000 = vmatpush1.bf16.msra.mxu1 %v4999_v59  ;;  %v761_v59 = vld [vmem:[#allocation9 + $0xe78] sm:$0xff]  ;;  %v1047_v54 = vld [vmem:[#allocation9 + $0x1768] sm:$0xff]  ;;  %v5035_v55 = vpack.c.bf16 %v784_v34, %v780_v25  ;;  %v6368_v25 = vld [vmem:[#allocation6 + $0x110] sm:$0xff] }
 0x1b7   :  { %5002 = vmatprep.subr.bf16.mxu1 %v5001_v61  ;;  %v1015_v61 = vld [vmem:[#allocation9 + $0x1668] sm:$0xff]  ;;  %v5021_v0 = vpack.c.bf16 %v761_v59, %v757_v58  ;;  %v1042_v58 = vld [vmem:[#allocation9 + $0x1740] sm:$0xff]  ;;  %v788_v59 = vld [vmem:[#allocation9 + $0xf50] sm:$0xff]  ;;  %244 = vst [vmem:[#allocation2 + $0x110] sm:$0xff] %v6368_v25 }
 0x1b8   :  { %4424 = vmatpush1.bf16.msra.mxu0 %v4423_v60  ;;  %v1011_v60 = vld [vmem:[#allocation9 + $0x1648] sm:$0xff] }
 0x1b9   :  { %4426 = vmatprep.subr.bf16.mxu0 %v4425_v1  ;;  %v1010_v1 = vld [vmem:[#allocation9 + $0x1640] sm:$0xff]  ;;  %v4445_v4 = vpack.c.bf16 %v1015_v61, %v1011_v60  ;;  %v792_v60 = vld [vmem:[#allocation9 + $0xf70] sm:$0xff]  ;;  %v4461_v61 = vpack.c.bf16 %v1047_v54, %v1043_v53  ;;  %v1063_v14 = vld [vmem:[#allocation9 + $0x17e8] sm:$0xff] }
 0x1ba   :  { %5004 = vmatpush1.bf16.msra.mxu1 %v5003_v44  ;;  %v769_v44 = vld [vmem:[#allocation9 + $0xeb8] sm:$0xff]  ;;  %v4447_v10 = vpack.c.bf16 %v1014_v5, %v1010_v1  ;;  %v1051_v1 = vld [vmem:[#allocation9 + $0x1788] sm:$0xff]  ;;  %v5039_v3 = vpack.c.bf16 %v792_v60, %v788_v59 }
 0x1bb   :  { %5006 = vmatprep.subr.bf16.mxu1 %v5005_v8  ;;  %v1023_v8 = vld [vmem:[#allocation9 + $0x16a8] sm:$0xff]  ;;  %v5025_v12 = vpack.c.bf16 %v769_v44, %v765_v35  ;;  %v1050_v35 = vld [vmem:[#allocation9 + $0x1780] sm:$0xff]  ;;  %v796_v44 = vld [vmem:[#allocation9 + $0xf90] sm:$0xff] }
 0x1bc   :  { %4428 = vmatpush1.bf16.msra.mxu0 %v4427_v7  ;;  %v6357_v2 = vpop.f32.mrb[0].mxu1  ;;  %v1019_v7 = vld [vmem:[#allocation9 + $0x1688] sm:$0xff]  ;;  %v829_v59 = vld [vmem:[#allocation9 + $0x1098] sm:$0xff] }
 0x1bd   :  { %4430 = vmatprep.subr.bf16.mxu0 %v4429_v13  ;;  %v6359_v38 = vpop.f32.mrb[1].mxu1  ;;  %v1018_v13 = vld [vmem:[#allocation9 + $0x1680] sm:$0xff]  ;;  %v4449_v18 = vpack.c.bf16 %v1023_v8, %v1019_v7  ;;  %v800_v7 = vld [vmem:[#allocation9 + $0xfb0] sm:$0xff]  ;;  %v4465_v8 = vpack.c.bf16 %v1055_v19, %v1051_v1  ;;  %v1071_v36 = vld [vmem:[#allocation9 + $0x1828] sm:$0xff] }
 0x1be   :  { %5008 = vmatpush1.bf16.msra.mxu1 %v5007_v26  ;;  %v777_v26 = vld [vmem:[#allocation9 + $0xef8] sm:$0xff]  ;;  %v4451_v32 = vpack.c.bf16 %v1022_v21, %v1018_v13  ;;  %v1059_v13 = vld [vmem:[#allocation9 + $0x17c8] sm:$0xff]  ;;  %v5043_v15 = vpack.c.bf16 %v800_v7, %v796_v44  ;;  %v1086_v7 = vld [vmem:[#allocation9 + $0x18a0] sm:$0xff] }
 0x1bf   :  { %5010 = vmatprep.subr.bf16.mxu1 %v5009_v29  ;;  %v1031_v29 = vld [vmem:[#allocation9 + $0x16e8] sm:$0xff]  ;;  %v5029_v33 = vpack.c.bf16 %v777_v26, %v773_v22  ;;  %v1058_v22 = vld [vmem:[#allocation9 + $0x17c0] sm:$0xff]  ;;  %v804_v26 = vld [vmem:[#allocation9 + $0xfd0] sm:$0xff] }
 0x1c0   :  { %4432 = vmatpush1.bf16.msra.mxu0 %v4431_v28  ;;  %v1027_v28 = vld [vmem:[#allocation9 + $0x16c8] sm:$0xff]  ;;  %v833_v60 = vld [vmem:[#allocation9 + $0x10b8] sm:$0xff] }
 0x1c1   :  { %4434 = vmatprep.subr.bf16.mxu0 %v4433_v23  ;;  %v1026_v23 = vld [vmem:[#allocation9 + $0x16c0] sm:$0xff]  ;;  %v4453_v20 = vpack.c.bf16 %v1031_v29, %v1027_v28  ;;  %v808_v28 = vld [vmem:[#allocation9 + $0xff0] sm:$0xff]  ;;  %v4469_v29 = vpack.c.bf16 %v1063_v14, %v1059_v13  ;;  %v1075_v34 = vld [vmem:[#allocation9 + $0x1848] sm:$0xff] }
 0x1c2   :  { %5012 = vmatpush1.bf16.msra.mxu1 %v5011_v17  ;;  %v785_v17 = vld [vmem:[#allocation9 + $0xf38] sm:$0xff]  ;;  %v5047_v37 = vpack.c.bf16 %v808_v28, %v804_v26  ;;  %v5810_v13 = vld [vmem:[#allocation2 + $0xe8] sm:$0xff]  ;;  %v1094_v28 = vld [vmem:[#allocation9 + $0x18e0] sm:$0xff] }
 0x1c3   :  { %5014 = vmatprep.subr.bf16.mxu1 %v5013_v43  ;;  %v1035_v43 = vld [vmem:[#allocation9 + $0x1708] sm:$0xff]  ;;  %v5033_v48 = vpack.c.bf16 %v785_v17, %v781_v41 }
 0x1c4   :  { %4436 = vmatpush1.bf16.msra.mxu0 %v4435_v6  ;;  %v6361_v6 = vpop.f32.mrb[2].mxu1  ;;  %v4457_v51 = vpack.c.bf16 %v1039_v45, %v1035_v43  ;;  %v812_v43 = vld [vmem:[#allocation9 + $0x1010] sm:$0xff] }
 0x1c5   :  { %4438 = vmatprep.subr.bf16.mxu0 %v4437_v47  ;;  %v6363_v46 = vpop.f32.mrb[3].mxu1  ;;  %v4455_v47 = vpack.c.bf16 %v1030_v40, %v1026_v23  ;;  %v1067_v23 = vld [vmem:[#allocation9 + $0x1808] sm:$0xff]  ;;  %v1070_v40 = vld [vmem:[#allocation9 + $0x1820] sm:$0xff]  ;;  %v816_v45 = vld [vmem:[#allocation9 + $0x1030] sm:$0xff] }
 0x1c6   :  { %5016 = vmatpush1.bf16.msra.mxu1 %v5015_v52  ;;  %v1038_v52 = vld [vmem:[#allocation9 + $0x1720] sm:$0xff] }
 0x1c7   :  { %5018 = vmatprep.subr.bf16.mxu1 %v5017_v39  ;;  %v793_v39 = vld [vmem:[#allocation9 + $0xf78] sm:$0xff] }
 0x1c8   :  { %4440 = vmatpush1.bf16.msra.mxu0 %v4439_v11  ;;  %v789_v11 = vld [vmem:[#allocation9 + $0xf58] sm:$0xff] }
 0x1c9   :  { %4442 = vmatprep.subr.bf16.mxu0 %v4441_v30  ;;  %v4459_v30 = vpack.c.bf16 %v1038_v52, %v1034_v49  ;;  %v5037_v57 = vpack.c.bf16 %v793_v39, %v789_v11  ;;  %v825_v49 = vld [vmem:[#allocation9 + $0x1078] sm:$0xff]  ;;  %v5051_v52 = vpack.c.bf16 %v816_v45, %v812_v43  ;;  %v1074_v11 = vld [vmem:[#allocation9 + $0x1840] sm:$0xff] }
 0x1ca   :  { %5020 = vmatpush1.bf16.msra.mxu1 %v5019_v62  ;;  %v1046_v62 = vld [vmem:[#allocation9 + $0x1760] sm:$0xff]  ;;  %v853_v45 = vld [vmem:[#allocation9 + $0x1158] sm:$0xff] }
 0x1cb   :  { %5022 = vmatprep.subr.bf16.mxu1 %v5021_v0  ;;  %v801_v0 = vld [vmem:[#allocation9 + $0xfb8] sm:$0xff]  ;;  %v1078_v39 = vld [vmem:[#allocation9 + $0x1860] sm:$0xff] }
 0x1cc   :  { %4444 = vmatpush1.bf16.msra.mxu0 %v4443_v63  ;;  %v797_v63 = vld [vmem:[#allocation9 + $0xf98] sm:$0xff]  ;;  %v4479_v19 = vpack.c.bf16 %v1078_v39, %v1074_v11  ;;  %v1102_v43 = vld [vmem:[#allocation9 + $0x1920] sm:$0xff]  ;;  %v852_v11 = vld [vmem:[#allocation9 + $0x1150] sm:$0xff] }
 0x1cd   :  { %4446 = vmatprep.subr.bf16.mxu0 %v4445_v4  ;;  %v4463_v4 = vpack.c.bf16 %v1046_v62, %v1042_v58  ;;  %v5041_v5 = vpack.c.bf16 %v801_v0, %v797_v63  ;;  %v5809_v62 = vld [vmem:[#allocation2 + $0x30] sm:$0xff]  ;;  %v1083_v63 = vld [vmem:[#allocation9 + $0x1888] sm:$0xff] }
 0x1ce   :  { %5024 = vmatpush1.bf16.msra.mxu1 %v5023_v9  ;;  %v1054_v9 = vld [vmem:[#allocation9 + $0x17a0] sm:$0xff]  ;;  %v1087_v0 = vld [vmem:[#allocation9 + $0x18a8] sm:$0xff]  ;;  %v856_v39 = vld [vmem:[#allocation9 + $0x1170] sm:$0xff] }
 0x1cf   :  { %5026 = vmatprep.subr.bf16.mxu1 %v5025_v12  ;;  %v809_v12 = vld [vmem:[#allocation9 + $0xff8] sm:$0xff]  ;;  %v4481_v44 = vpack.c.bf16 %v1087_v0, %v1083_v63  ;;  %v1114_v63 = vld [vmem:[#allocation9 + $0x1980] sm:$0xff]  ;;  %v860_v0 = vld [vmem:[#allocation9 + $0x1190] sm:$0xff] }
 0x1d0   :  { %4448 = vmatpush1.bf16.msra.mxu0 %v4447_v10  ;;  %v805_v10 = vld [vmem:[#allocation9 + $0xfd8] sm:$0xff] }
 0x1d1   :  { %4450 = vmatprep.subr.bf16.mxu0 %v4449_v18  ;;  %v4467_v18 = vpack.c.bf16 %v1054_v9, %v1050_v35  ;;  %v5045_v21 = vpack.c.bf16 %v809_v12, %v805_v10  ;;  %v832_v35 = vld [vmem:[#allocation9 + $0x10b0] sm:$0xff]  ;;  %v841_v9 = vld [vmem:[#allocation9 + $0x10f8] sm:$0xff]  ;;  %v1091_v10 = vld [vmem:[#allocation9 + $0x18c8] sm:$0xff] }
 0x1d2   :  { %5028 = vmatpush1.bf16.msra.mxu1 %v5027_v31  ;;  %v1062_v31 = vld [vmem:[#allocation9 + $0x17e0] sm:$0xff]  ;;  %v1095_v12 = vld [vmem:[#allocation9 + $0x18e8] sm:$0xff] }
 0x1d3   :  { %5030 = vmatprep.subr.bf16.mxu1 %v5029_v33  ;;  %v817_v33 = vld [vmem:[#allocation9 + $0x1038] sm:$0xff]  ;;  %v4471_v41 = vpack.c.bf16 %v1062_v31, %v1058_v22  ;;  %v840_v22 = vld [vmem:[#allocation9 + $0x10f0] sm:$0xff]  ;;  %v4485_v26 = vpack.c.bf16 %v1095_v12, %v1091_v10  ;;  %v5811_v31 = vld [vmem:[#allocation2 + $0xe0] sm:$0xff] }
 0x1d4   :  { %4452 = vmatpush1.bf16.msra.mxu0 %v4451_v32  ;;  %v813_v32 = vld [vmem:[#allocation9 + $0x1018] sm:$0xff]  ;;  %v1122_v10 = vld [vmem:[#allocation9 + $0x19c0] sm:$0xff]  ;;  %v868_v12 = vld [vmem:[#allocation9 + $0x11d0] sm:$0xff] }
 0x1d5   :  { %4454 = vmatprep.subr.bf16.mxu0 %v4453_v20  ;;  %v1066_v20 = vld [vmem:[#allocation9 + $0x1800] sm:$0xff]  ;;  %v5049_v17 = vpack.c.bf16 %v817_v33, %v813_v32  ;;  %v1099_v32 = vld [vmem:[#allocation9 + $0x1908] sm:$0xff] }
 0x1d6   :  { %5032 = vmatpush1.bf16.msra.mxu1 %v5031_v27  ;;  %v6365_v27 = vld [vmem:[#allocation6 + $0x118] sm:$0xff]  ;;  %v4475_v53 = vpack.c.bf16 %v1070_v40, %v1066_v20  ;;  %v1103_v33 = vld [vmem:[#allocation9 + $0x1928] sm:$0xff]  ;;  %v1098_v20 = vld [vmem:[#allocation9 + $0x1900] sm:$0xff] }
 0x1d7   :  { %5034 = vmatprep.subr.bf16.mxu1 %v5033_v48  ;;  %v821_v48 = vld [vmem:[#allocation9 + $0x1058] sm:$0xff]  ;;  %245 = vst [vmem:[#allocation2 + $0x118] sm:$0xff] %v6365_v27  ;;  %v844_v40 = vld [vmem:[#allocation9 + $0x1110] sm:$0xff] }
 0x1d8   :  { %4456 = vmatpush1.bf16.msra.mxu0 %v4455_v47  ;;  %v4473_v47 = vpack.c.bf16 %v1071_v36, %v1067_v23  ;;  %v5053_v54 = vpack.c.bf16 %v825_v49, %v821_v48  ;;  %v5812_v23 = vld [vmem:[#allocation2 + $0x48] sm:$0xff] }
 0x1d9   :  { %4458 = vmatprep.subr.bf16.mxu0 %v4457_v51  ;;  %v1079_v51 = vld [vmem:[#allocation9 + $0x1868] sm:$0xff] }
 0x1da   :  { %5036 = vmatpush1.bf16.msra.mxu1 %v5035_v55  ;;  %v820_v55 = vld [vmem:[#allocation9 + $0x1050] sm:$0xff]  ;;  %v4477_v58 = vpack.c.bf16 %v1079_v51, %v1075_v34  ;;  %v1107_v48 = vld [vmem:[#allocation9 + $0x1948] sm:$0xff]  ;;  %v4491_v34 = vpack.c.bf16 %v1102_v43, %v1098_v20  ;;  %v1138_v43 = vld [vmem:[#allocation9 + $0x1a40] sm:$0xff] }
 0x1db   :  { %5038 = vmatprep.subr.bf16.mxu1 %v5037_v57  ;;  %v6371_v57 = vld [vmem:[#allocation6 + $0x78] sm:$0xff]  ;;  %v1111_v49 = vld [vmem:[#allocation9 + $0x1968] sm:$0xff] }
 0x1dc   :  { %4460 = vmatpush1.bf16.msra.mxu0 %v4459_v30  ;;  %v824_v30 = vld [vmem:[#allocation9 + $0x1070] sm:$0xff]  ;;  %224 = vst [vmem:[#allocation2 + $0x78] sm:$0xff] %v6371_v57  ;;  %v1143_v20 = vld [vmem:[#allocation9 + $0x1a68] sm:$0xff] }
 0x1dd   :  { %4462 = vmatprep.subr.bf16.mxu0 %v4461_v61  ;;  %v179_v61 = vld [vmem:[#allocation6 + $0x70] sm:$0xff]  ;;  %v5055_v1 = vpack.c.bf16 %v824_v30, %v820_v55  ;;  %v861_v55 = vld [vmem:[#allocation9 + $0x1198] sm:$0xff] }
 0x1de   :  { %5040 = vmatpush1.bf16.msra.mxu1 %v5039_v3  ;;  %223 = vst [vmem:[#allocation2 + $0x70] sm:$0xff] %v179_v61  ;;  %v5057_v3 = vpack.c.bf16 %v833_v60, %v829_v59  ;;  %v865_v30 = vld [vmem:[#allocation9 + $0x11b8] sm:$0xff]  ;;  %v1119_v59 = vld [vmem:[#allocation9 + $0x19a8] sm:$0xff]  ;;  %v5071_v60 = vpack.c.bf16 %v856_v39, %v852_v11 }
 0x1df   :  { %5042 = vmatprep.subr.bf16.mxu1 %v5041_v5  ;;  %v828_v5 = vld [vmem:[#allocation9 + $0x1090] sm:$0xff] }
 0x1e0   :  { %4464 = vmatpush1.bf16.msra.mxu0 %v4463_v4  ;;  %v1082_v4 = vld [vmem:[#allocation9 + $0x1880] sm:$0xff] }
 0x1e1   :  { %4466 = vmatprep.subr.bf16.mxu0 %v4465_v8  ;;  %v837_v8 = vld [vmem:[#allocation9 + $0x10d8] sm:$0xff]  ;;  %v4483_v14 = vpack.c.bf16 %v1086_v7, %v1082_v4 }
 0x1e2   :  { %5044 = vmatpush1.bf16.msra.mxu1 %v5043_v15  ;;  %v5061_v15 = vpack.c.bf16 %v841_v9, %v837_v8  ;;  %v869_v4 = vld [vmem:[#allocation9 + $0x11d8] sm:$0xff] }
 0x1e3   :  { %5046 = vmatprep.subr.bf16.mxu1 %v5045_v21  ;;  %v836_v21 = vld [vmem:[#allocation9 + $0x10d0] sm:$0xff] }
 0x1e4   :  { %4468 = vmatpush1.bf16.msra.mxu0 %v4467_v18  ;;  %v1090_v18 = vld [vmem:[#allocation9 + $0x18c0] sm:$0xff] }
 0x1e5   :  { %4470 = vmatprep.subr.bf16.mxu0 %v4469_v29  ;;  %v845_v29 = vld [vmem:[#allocation9 + $0x1118] sm:$0xff]  ;;  %v4487_v36 = vpack.c.bf16 %v1094_v28, %v1090_v18 }
 0x1e6   :  { %5048 = vmatpush1.bf16.msra.mxu1 %v5047_v37  ;;  %v881_v18 = vld [vmem:[#allocation9 + $0x1238] sm:$0xff] }
 0x1e7   :  { %5050 = vmatprep.subr.bf16.mxu1 %v5049_v17  ;;  %v4489_v17 = vpack.c.bf16 %v1103_v33, %v1099_v32  ;;  %v880_v32 = vld [vmem:[#allocation9 + $0x1230] sm:$0xff] }
 0x1e8   :  { %4472 = vmatpush1.bf16.msra.mxu0 %v4471_v41  ;;  %v848_v41 = vld [vmem:[#allocation9 + $0x1130] sm:$0xff] }
 0x1e9   :  { %4474 = vmatprep.subr.bf16.mxu0 %v4473_v47  ;;  %2871 = vmatmul.mubr.f32.vlgmr.msra.gmra.mrb[4].mxu1 %v5809_v62  ;;  %v857_v47 = vld [vmem:[#allocation9 + $0x1178] sm:$0xff]  ;;  %v5073_v62 = vpack.c.bf16 %v865_v30, %v861_v55  ;;  %v892_v55 = vld [vmem:[#allocation9 + $0x1290] sm:$0xff] }
 0x1ea   :  { %5052 = vmatpush1.bf16.msra.mxu1 %v5051_v52  ;;  %2876 = vmatprep.mubr.f32.mxu1 %v5810_v13  ;;  %v5069_v51 = vpack.c.bf16 %v857_v47, %v853_v45  ;;  %v1106_v52 = vld [vmem:[#allocation9 + $0x1940] sm:$0xff]  ;;  %v872_v13 = vld [vmem:[#allocation9 + $0x11f0] sm:$0xff] }
 0x1eb   :  { %2178 = vmatmul.mubr.f32.vlgmr.msra.gmra.mrb[0].mxu0 %v6338_v42  ;;  %5054 = vmatprep.subr.bf16.mxu1 %v5053_v54  ;;  %v5059_v42 = vpack.c.bf16 %v832_v35, %v828_v5  ;;  %v1110_v54 = vld [vmem:[#allocation9 + $0x1960] sm:$0xff]  ;;  %v873_v5 = vld [vmem:[#allocation9 + $0x11f8] sm:$0xff]  ;;  %v1123_v35 = vld [vmem:[#allocation9 + $0x19c8] sm:$0xff] }
 0x1ec   :  { %4476 = vmatpush1.bf16.msra.mxu0 %v4475_v53  ;;  %2183 = vmatprep.mubr.f32.mxu0 %v6342_v24  ;;  %v849_v24 = vld [vmem:[#allocation9 + $0x1138] sm:$0xff]  ;;  %v4493_v53 = vpack.c.bf16 %v1111_v49, %v1107_v48  ;;  %v4495_v61 = vpack.c.bf16 %v1110_v54, %v1106_v52  ;;  %v5077_v9 = vpack.c.bf16 %v873_v5, %v869_v4  ;;  %v884_v45 = vld [vmem:[#allocation9 + $0x1250] sm:$0xff]  ;;  %v1142_v49 = vld [vmem:[#allocation9 + $0x1a60] sm:$0xff] }
 0x1ed   :  { %4478 = vmatprep.subr.bf16.mxu0 %v4477_v58  ;;  %2877 = vmatmul.mubr.f32.gmra.mrb[6].mxu1 %v5811_v31  ;;  %v5065_v37 = vpack.c.bf16 %v849_v24, %v845_v29  ;;  %v1115_v58 = vld [vmem:[#allocation9 + $0x1988] sm:$0xff]  ;;  %v1130_v24 = vld [vmem:[#allocation9 + $0x1a00] sm:$0xff]  ;;  %v876_v31 = vld [vmem:[#allocation9 + $0x1210] sm:$0xff]  ;;  %v4511_v39 = vpack.c.bf16 %v1142_v49, %v1138_v43 }
 0x1ee   :  { %5056 = vmatpush1.bf16.msra.mxu1 %v5055_v1  ;;  %2947 = vmatprep.mubr.f32.mxu1 %v5812_v23  ;;  %v864_v1 = vld [vmem:[#allocation9 + $0x11b0] sm:$0xff]  ;;  %v1134_v23 = vld [vmem:[#allocation9 + $0x1a20] sm:$0xff]  ;;  %v1151_v52 = vld [vmem:[#allocation9 + $0x1aa8] sm:$0xff] }
 0x1ef   :  { %2184 = vmatmul.mubr.f32.gmra.mrb[2].mxu0 %v6346_v16  ;;  %5058 = vmatprep.subr.bf16.mxu1 %v5057_v3  ;;  %v5063_v16 = vpack.c.bf16 %v840_v22, %v836_v21  ;;  %v1118_v3 = vld [vmem:[#allocation9 + $0x19a0] sm:$0xff]  ;;  %v5075_v7 = vpack.c.bf16 %v864_v1, %v860_v0  ;;  %v1131_v21 = vld [vmem:[#allocation9 + $0x1a08] sm:$0xff]  ;;  %v888_v47 = vld [vmem:[#allocation9 + $0x1270] sm:$0xff] }
 0x1f0   :  { %4480 = vmatpush1.bf16.msra.mxu0 %v4479_v19  ;;  %2254 = vmatprep.mubr.f32.mxu0 %v6350_v50  ;;  %v5067_v50 = vpack.c.bf16 %v848_v41, %v844_v40  ;;  %v4497_v19 = vpack.c.bf16 %v1119_v59, %v1115_v58  ;;  %v4499_v8 = vpack.c.bf16 %v1118_v3, %v1114_v63  ;;  %v1135_v22 = vld [vmem:[#allocation9 + $0x1a28] sm:$0xff]  ;;  %v1146_v54 = vld [vmem:[#allocation9 + $0x1a80] sm:$0xff]  ;;  %v896_v30 = vld [vmem:[#allocation9 + $0x12b0] sm:$0xff] }
 0x1f1   :  { %4482 = vmatprep.subr.bf16.mxu0 %v4481_v44  ;;  %v1127_v44 = vld [vmem:[#allocation9 + $0x19e8] sm:$0xff]  ;;  %v4505_v33 = vpack.c.bf16 %v1135_v22, %v1131_v21  ;;  %v5083_v40 = vpack.c.bf16 %v880_v32, %v876_v31  ;;  %v4507_v41 = vpack.c.bf16 %v1134_v23, %v1130_v24  ;;  %v5087_v11 = vpack.c.bf16 %v888_v47, %v884_v45  ;;  %v1150_v59 = vld [vmem:[#allocation9 + $0x1aa0] sm:$0xff]  ;;  %v900_v4 = vld [vmem:[#allocation9 + $0x12d0] sm:$0xff] }
 0x1f2   :  { %5060 = vmatpush1.bf16.msra.mxu1 %v5059_v42  ;;  %v4501_v42 = vpack.c.bf16 %v1127_v44, %v1123_v35  ;;  %v1159_v63 = vld [vmem:[#allocation9 + $0x1ae8] sm:$0xff]  ;;  %v5091_v0 = vpack.c.bf16 %v896_v30, %v892_v55  ;;  %v4515_v1 = vpack.c.bf16 %v1150_v59, %v1146_v54  ;;  %v1154_v3 = vld [vmem:[#allocation9 + $0x1ac0] sm:$0xff]  ;;  %v904_v5 = vld [vmem:[#allocation9 + $0x12f0] sm:$0xff] }
 0x1f3   :  { %5062 = vmatprep.subr.bf16.mxu1 %v5061_v15  ;;  %v877_v15 = vld [vmem:[#allocation9 + $0x1218] sm:$0xff]  ;;  %v1158_v44 = vld [vmem:[#allocation9 + $0x1ae0] sm:$0xff]  ;;  %v1175_v24 = vld [vmem:[#allocation9 + $0x1b68] sm:$0xff] }
 0x1f4   :  { %4484 = vmatpush1.bf16.msra.mxu0 %v4483_v14  ;;  %v1126_v14 = vld [vmem:[#allocation9 + $0x19e0] sm:$0xff]  ;;  %v5081_v29 = vpack.c.bf16 %v881_v18, %v877_v15  ;;  %v908_v15 = vld [vmem:[#allocation9 + $0x1310] sm:$0xff]  ;;  %v1183_v43 = vld [vmem:[#allocation9 + $0x1ba8] sm:$0xff] }
 0x1f5   :  { %4486 = vmatprep.subr.bf16.mxu0 %v4485_v26  ;;  %v5079_v26 = vpack.c.bf16 %v872_v13, %v868_v12  ;;  %v4503_v28 = vpack.c.bf16 %v1126_v14, %v1122_v10  ;;  %v1167_v10 = vld [vmem:[#allocation9 + $0x1b28] sm:$0xff]  ;;  %v5095_v12 = vpack.c.bf16 %v904_v5, %v900_v4  ;;  %v4519_v13 = vpack.c.bf16 %v1158_v44, %v1154_v3  ;;  %v1162_v14 = vld [vmem:[#allocation9 + $0x1b00] sm:$0xff]  ;;  %v912_v18 = vld [vmem:[#allocation9 + $0x1330] sm:$0xff] }
 0x1f6   :  { %5064 = vmatpush1.bf16.msra.mxu1 %v5063_v16  ;;  %v885_v16 = vld [vmem:[#allocation9 + $0x1258] sm:$0xff]  ;;  %v1166_v22 = vld [vmem:[#allocation9 + $0x1b20] sm:$0xff]  ;;  %v5099_v31 = vpack.c.bf16 %v912_v18, %v908_v15  ;;  %v1191_v54 = vld [vmem:[#allocation9 + $0x1be8] sm:$0xff] }
 0x1f7   :  { %5066 = vmatprep.subr.bf16.mxu1 %v5065_v37  ;;  %v1139_v37 = vld [vmem:[#allocation9 + $0x1a48] sm:$0xff]  ;;  %v4523_v32 = vpack.c.bf16 %v1166_v22, %v1162_v14  ;;  %v1170_v23 = vld [vmem:[#allocation9 + $0x1b40] sm:$0xff] }
 0x1f8   :  { %4488 = vmatpush1.bf16.msra.mxu0 %v4487_v36  ;;  %v889_v36 = vld [vmem:[#allocation9 + $0x1278] sm:$0xff]  ;;  %v4509_v48 = vpack.c.bf16 %v1143_v20, %v1139_v37  ;;  %v1174_v20 = vld [vmem:[#allocation9 + $0x1b60] sm:$0xff]  ;;  %v1199_v3 = vld [vmem:[#allocation9 + $0x1c28] sm:$0xff] }
 0x1f9   :  { %4490 = vmatprep.subr.bf16.mxu0 %v4489_v17  ;;  %v5085_v17 = vpack.c.bf16 %v889_v36, %v885_v16  ;;  %v916_v16 = vld [vmem:[#allocation9 + $0x1350] sm:$0xff]  ;;  %v4527_v47 = vpack.c.bf16 %v1174_v20, %v1170_v23  ;;  %v1178_v49 = vld [vmem:[#allocation9 + $0x1b80] sm:$0xff]  ;;  %v1203_v15 = vld [vmem:[#allocation9 + $0x1c48] sm:$0xff] }
 0x1fa   :  { %5068 = vmatpush1.bf16.msra.mxu1 %v5067_v50  ;;  %v893_v50 = vld [vmem:[#allocation9 + $0x1298] sm:$0xff]  ;;  %v920_v36 = vld [vmem:[#allocation9 + $0x1370] sm:$0xff]  ;;  %v1186_v59 = vld [vmem:[#allocation9 + $0x1bc0] sm:$0xff] }
 0x1fb   :  { %5070 = vmatprep.subr.bf16.mxu1 %v5069_v51  ;;  %v1147_v51 = vld [vmem:[#allocation9 + $0x1a88] sm:$0xff]  ;;  %v5103_v45 = vpack.c.bf16 %v920_v36, %v916_v16  ;;  %v1194_v5 = vld [vmem:[#allocation9 + $0x1c00] sm:$0xff]  ;;  %v957_v23 = vld [vmem:[#allocation9 + $0x1498] sm:$0xff] }
 0x1fc   :  { %4492 = vmatpush1.bf16.msra.mxu0 %v4491_v34  ;;  %v897_v34 = vld [vmem:[#allocation9 + $0x12b8] sm:$0xff]  ;;  %v4513_v58 = vpack.c.bf16 %v1151_v52, %v1147_v51  ;;  %v1182_v52 = vld [vmem:[#allocation9 + $0x1ba0] sm:$0xff]  ;;  %v1207_v18 = vld [vmem:[#allocation9 + $0x1c68] sm:$0xff] }
 0x1fd   :  { %4494 = vmatprep.subr.bf16.mxu0 %v4493_v53  ;;  %v5089_v53 = vpack.c.bf16 %v897_v34, %v893_v50  ;;  %v924_v50 = vld [vmem:[#allocation9 + $0x1390] sm:$0xff]  ;;  %v4531_v30 = vpack.c.bf16 %v1182_v52, %v1178_v49  ;;  %v6381_v14 = vld [vmem:[#allocation6 + $0x120] sm:$0xff]  ;;  %v961_v16 = vld [vmem:[#allocation9 + $0x14b8] sm:$0xff] }
 0x1fe   :  { %5072 = vmatpush1.bf16.msra.mxu1 %v5071_v60  ;;  %v901_v60 = vld [vmem:[#allocation9 + $0x12d8] sm:$0xff]  ;;  %v928_v34 = vld [vmem:[#allocation9 + $0x13b0] sm:$0xff]  ;;  %246 = vst [vmem:[#allocation2 + $0x120] sm:$0xff] %v6381_v14  ;;  %v1202_v22 = vld [vmem:[#allocation9 + $0x1c40] sm:$0xff] }
 0x1ff   :  { %5074 = vmatprep.subr.bf16.mxu1 %v5073_v62  ;;  %v1155_v62 = vld [vmem:[#allocation9 + $0x1ac8] sm:$0xff]  ;;  %v5107_v55 = vpack.c.bf16 %v928_v34, %v924_v50  ;;  %v181_v36 = vld [vmem:[#allocation6 + $0x80] sm:$0xff]  ;;  %v965_v34 = vld [vmem:[#allocation9 + $0x14d8] sm:$0xff] }
 0x200   :  { %4496 = vmatpush1.bf16.msra.mxu0 %v4495_v61  ;;  %v905_v61 = vld [vmem:[#allocation9 + $0x12f8] sm:$0xff]  ;;  %v4517_v35 = vpack.c.bf16 %v1159_v63, %v1155_v62  ;;  %v1190_v63 = vld [vmem:[#allocation9 + $0x1be0] sm:$0xff]  ;;  %v1211_v20 = vld [vmem:[#allocation9 + $0x1c88] sm:$0xff]  ;;  %225 = vst [vmem:[#allocation2 + $0x80] sm:$0xff] %v181_v36 }
 0x201   :  { %4498 = vmatprep.subr.bf16.mxu0 %v4497_v19  ;;  %v5093_v19 = vpack.c.bf16 %v905_v61, %v901_v60  ;;  %v932_v60 = vld [vmem:[#allocation9 + $0x13d0] sm:$0xff]  ;;  %v4535_v44 = vpack.c.bf16 %v1190_v63, %v1186_v59  ;;  %v1214_v50 = vld [vmem:[#allocation9 + $0x1ca0] sm:$0xff]  ;;  %v1219_v52 = vld [vmem:[#allocation9 + $0x1cc8] sm:$0xff] }
 0x202   :  { %5076 = vmatpush1.bf16.msra.mxu1 %v5075_v7  ;;  %v909_v7 = vld [vmem:[#allocation9 + $0x1318] sm:$0xff]  ;;  %v936_v61 = vld [vmem:[#allocation9 + $0x13f0] sm:$0xff]  ;;  %v1227_v63 = vld [vmem:[#allocation9 + $0x1d08] sm:$0xff] }
 0x203   :  { %5078 = vmatprep.subr.bf16.mxu1 %v5077_v9  ;;  %v1163_v9 = vld [vmem:[#allocation9 + $0x1b08] sm:$0xff]  ;;  %v5111_v4 = vpack.c.bf16 %v936_v61, %v932_v60  ;;  %v1222_v60 = vld [vmem:[#allocation9 + $0x1ce0] sm:$0xff]  ;;  %v973_v61 = vld [vmem:[#allocation9 + $0x1518] sm:$0xff] }
 0x204   :  { %4500 = vmatpush1.bf16.msra.mxu0 %v4499_v8  ;;  %v913_v8 = vld [vmem:[#allocation9 + $0x1338] sm:$0xff]  ;;  %v4521_v21 = vpack.c.bf16 %v1167_v10, %v1163_v9  ;;  %v944_v9 = vld [vmem:[#allocation9 + $0x1430] sm:$0xff]  ;;  %v6378_v10 = vld [vmem:[#allocation6 + $0x128] sm:$0xff] }
 0x205   :  { %4502 = vmatprep.subr.bf16.mxu0 %v4501_v42  ;;  %v5097_v42 = vpack.c.bf16 %v913_v8, %v909_v7  ;;  %v940_v8 = vld [vmem:[#allocation9 + $0x1410] sm:$0xff]  ;;  %247 = vst [vmem:[#allocation2 + $0x128] sm:$0xff] %v6378_v10 }
 0x206   :  { %5080 = vmatpush1.bf16.msra.mxu1 %v5079_v26  ;;  %v917_v26 = vld [vmem:[#allocation9 + $0x1358] sm:$0xff] }
 0x207   :  { %5082 = vmatprep.subr.bf16.mxu1 %v5081_v29  ;;  %v1171_v29 = vld [vmem:[#allocation9 + $0x1b48] sm:$0xff] }
 0x208   :  { %4504 = vmatpush1.bf16.msra.mxu0 %v4503_v28  ;;  %v921_v28 = vld [vmem:[#allocation9 + $0x1378] sm:$0xff]  ;;  %v4525_v37 = vpack.c.bf16 %v1175_v24, %v1171_v29  ;;  %v948_v24 = vld [vmem:[#allocation9 + $0x1450] sm:$0xff] }
 0x209   :  { %4506 = vmatprep.subr.bf16.mxu0 %v4505_v33  ;;  %v5101_v33 = vpack.c.bf16 %v921_v28, %v917_v26  ;;  %v1206_v26 = vld [vmem:[#allocation9 + $0x1c60] sm:$0xff] }
 0x20a   :  { %5084 = vmatpush1.bf16.msra.mxu1 %v5083_v40  ;;  %v925_v40 = vld [vmem:[#allocation9 + $0x1398] sm:$0xff] }
 0x20b   :  { %5086 = vmatprep.subr.bf16.mxu1 %v5085_v17  ;;  %v1179_v17 = vld [vmem:[#allocation9 + $0x1b88] sm:$0xff] }
 0x20c   :  { %4508 = vmatpush1.bf16.msra.mxu0 %v4507_v41  ;;  %v929_v41 = vld [vmem:[#allocation9 + $0x13b8] sm:$0xff]  ;;  %v4529_v51 = vpack.c.bf16 %v1183_v43, %v1179_v17  ;;  %v4543_v17 = vpack.c.bf16 %v1206_v26, %v1202_v22  ;;  %v5121_v43 = vpack.c.bf16 %v961_v16, %v957_v23  ;;  %v984_v22 = vld [vmem:[#allocation9 + $0x1570] sm:$0xff] }
 0x20d   :  { %4510 = vmatprep.subr.bf16.mxu0 %v4509_v48  ;;  %v5105_v48 = vpack.c.bf16 %v929_v41, %v925_v40  ;;  %v1215_v40 = vld [vmem:[#allocation9 + $0x1ca8] sm:$0xff] }
 0x20e   :  { %5088 = vmatpush1.bf16.msra.mxu1 %v5087_v11  ;;  %v933_v11 = vld [vmem:[#allocation9 + $0x13d8] sm:$0xff]  ;;  %v4545_v49 = vpack.c.bf16 %v1215_v40, %v1211_v20  ;;  %v988_v20 = vld [vmem:[#allocation9 + $0x1590] sm:$0xff] }
 0x20f   :  { %5090 = vmatprep.subr.bf16.mxu1 %v5089_v53  ;;  %v1187_v53 = vld [vmem:[#allocation9 + $0x1bc8] sm:$0xff]  ;;  %v992_v40 = vld [vmem:[#allocation9 + $0x15b0] sm:$0xff] }
 0x210   :  { %4512 = vmatpush1.bf16.msra.mxu0 %v4511_v39  ;;  %v937_v39 = vld [vmem:[#allocation9 + $0x13f8] sm:$0xff]  ;;  %v4533_v62 = vpack.c.bf16 %v1191_v54, %v1187_v53 }
 0x211   :  { %4514 = vmatprep.subr.bf16.mxu0 %v4513_v58  ;;  %v5109_v58 = vpack.c.bf16 %v937_v39, %v933_v11  ;;  %v1223_v11 = vld [vmem:[#allocation9 + $0x1ce8] sm:$0xff]  ;;  %v5814_v39 = vld [vmem:[#allocation2 + $0xf8] sm:$0xff] }
 0x212   :  { %5092 = vmatpush1.bf16.msra.mxu1 %v5091_v0  ;;  %v941_v0 = vld [vmem:[#allocation9 + $0x1418] sm:$0xff]  ;;  %v4549_v59 = vpack.c.bf16 %v1223_v11, %v1219_v52  ;;  %v996_v52 = vld [vmem:[#allocation9 + $0x15d0] sm:$0xff] }
 0x213   :  { %5094 = vmatprep.subr.bf16.mxu1 %v5093_v19  ;;  %v1195_v19 = vld [vmem:[#allocation9 + $0x1c08] sm:$0xff]  ;;  %v1000_v11 = vld [vmem:[#allocation9 + $0x15f0] sm:$0xff] }
 0x214   :  { %4516 = vmatpush1.bf16.msra.mxu0 %v4515_v1  ;;  %v945_v1 = vld [vmem:[#allocation9 + $0x1438] sm:$0xff] }
 0x215   :  { %4518 = vmatprep.subr.bf16.mxu0 %v4517_v35  ;;  %v1198_v35 = vld [vmem:[#allocation9 + $0x1c20] sm:$0xff]  ;;  %v5113_v7 = vpack.c.bf16 %v945_v1, %v941_v0  ;;  %v1231_v0 = vld [vmem:[#allocation9 + $0x1d28] sm:$0xff]  ;;  %v5816_v1 = vld [vmem:[#allocation2 + $0x58] sm:$0xff] }
 0x216   :  { %5096 = vmatpush1.bf16.msra.mxu1 %v5095_v12  ;;  %v4537_v12 = vpack.c.bf16 %v1199_v3, %v1195_v19  ;;  %v4539_v28 = vpack.c.bf16 %v1198_v35, %v1194_v5  ;;  %v972_v5 = vld [vmem:[#allocation9 + $0x1510] sm:$0xff] }
 0x217   :  { %5098 = vmatprep.subr.bf16.mxu1 %v5097_v42  ;;  %v953_v42 = vld [vmem:[#allocation9 + $0x1478] sm:$0xff]  ;;  %v976_v35 = vld [vmem:[#allocation9 + $0x1530] sm:$0xff] }
 0x218   :  { %4520 = vmatpush1.bf16.msra.mxu0 %v4519_v13  ;;  %v949_v13 = vld [vmem:[#allocation9 + $0x1458] sm:$0xff] }
 0x219   :  { %4522 = vmatprep.subr.bf16.mxu0 %v4521_v21  ;;  %v5115_v21 = vpack.c.bf16 %v944_v9, %v940_v8  ;;  %v5117_v29 = vpack.c.bf16 %v953_v42, %v949_v13  ;;  %v981_v8 = vld [vmem:[#allocation9 + $0x1558] sm:$0xff]  ;;  %v1239_v13 = vld [vmem:[#allocation9 + $0x1d68] sm:$0xff] }
 0x21a   :  { %5100 = vmatpush1.bf16.msra.mxu1 %v5099_v31  ;;  %v952_v31 = vld [vmem:[#allocation9 + $0x1470] sm:$0xff]  ;;  %v985_v9 = vld [vmem:[#allocation9 + $0x1578] sm:$0xff] }
 0x21b   :  { %5102 = vmatprep.subr.bf16.mxu1 %v5101_v33  ;;  %v4541_v33 = vpack.c.bf16 %v1207_v18, %v1203_v15  ;;  %v5119_v41 = vpack.c.bf16 %v952_v31, %v948_v24  ;;  %v5133_v15 = vpack.c.bf16 %v985_v9, %v981_v8  ;;  %v1234_v18 = vld [vmem:[#allocation9 + $0x1d40] sm:$0xff]  ;;  %v993_v24 = vld [vmem:[#allocation9 + $0x15b8] sm:$0xff]  ;;  %v1243_v31 = vld [vmem:[#allocation9 + $0x1d88] sm:$0xff] }
 0x21c   :  { %4524 = vmatpush1.bf16.msra.mxu0 %v4523_v32  ;;  %v6384_v32 = vld [vmem:[#allocation6 + $0x88] sm:$0xff]  ;;  %v1016_v8 = vld [vmem:[#allocation9 + $0x1670] sm:$0xff] }
 0x21d   :  { %4526 = vmatprep.subr.bf16.mxu0 %v4525_v37  ;;  %226 = vst [vmem:[#allocation2 + $0x88] sm:$0xff] %v6384_v32  ;;  %v5813_v37 = vld [vmem:[#allocation2 + $0x40] sm:$0xff] }
 0x21e   :  { %5104 = vmatpush1.bf16.msra.mxu1 %v5103_v45  ;;  %v1210_v45 = vld [vmem:[#allocation9 + $0x1c80] sm:$0xff] }
 0x21f   :  { %5106 = vmatprep.subr.bf16.mxu1 %v5105_v48  ;;  %v960_v48 = vld [vmem:[#allocation9 + $0x14b0] sm:$0xff]  ;;  %v4547_v53 = vpack.c.bf16 %v1214_v50, %v1210_v45  ;;  %v1001_v45 = vld [vmem:[#allocation9 + $0x15f8] sm:$0xff] }
 0x220   :  { %4528 = vmatpush1.bf16.msra.mxu0 %v4527_v47  ;;  %v956_v47 = vld [vmem:[#allocation9 + $0x1490] sm:$0xff] }
 0x221   :  { %4530 = vmatprep.subr.bf16.mxu0 %v4529_v51  ;;  %v969_v51 = vld [vmem:[#allocation9 + $0x14f8] sm:$0xff] }
 0x222   :  { %5108 = vmatpush1.bf16.msra.mxu1 %v5107_v55  ;;  %v5125_v54 = vpack.c.bf16 %v969_v51, %v965_v34  ;;  %v1218_v55 = vld [vmem:[#allocation9 + $0x1cc0] sm:$0xff] }
 0x223   :  { %5110 = vmatprep.subr.bf16.mxu1 %v5109_v58  ;;  %v968_v58 = vld [vmem:[#allocation9 + $0x14f0] sm:$0xff]  ;;  %v4551_v19 = vpack.c.bf16 %v1222_v60, %v1218_v55  ;;  %v1250_v51 = vld [vmem:[#allocation9 + $0x1dc0] sm:$0xff]  ;;  %v1259_v55 = vld [vmem:[#allocation9 + $0x1e08] sm:$0xff] }
 0x224   :  { %4532 = vmatpush1.bf16.msra.mxu0 %v4531_v30  ;;  %v964_v30 = vld [vmem:[#allocation9 + $0x14d0] sm:$0xff] }
 0x225   :  { %4534 = vmatprep.subr.bf16.mxu0 %v4533_v62  ;;  %v5815_v62 = vld [vmem:[#allocation2 + $0xf0] sm:$0xff] }
 0x226   :  { %5112 = vmatpush1.bf16.msra.mxu1 %v5111_v4  ;;  %v1226_v4 = vld [vmem:[#allocation9 + $0x1d00] sm:$0xff] }
 0x227   :  { %5114 = vmatprep.subr.bf16.mxu1 %v5113_v7  ;;  %v1230_v7 = vld [vmem:[#allocation9 + $0x1d20] sm:$0xff] }
 0x228   :  { %4536 = vmatpush1.bf16.msra.mxu0 %v4535_v44  ;;  %v4553_v44 = vpack.c.bf16 %v1231_v0, %v1227_v63  ;;  %v4555_v42 = vpack.c.bf16 %v1230_v7, %v1226_v4  ;;  %v1262_v0 = vld [vmem:[#allocation9 + $0x1e20] sm:$0xff]  ;;  %v1012_v7 = vld [vmem:[#allocation9 + $0x1650] sm:$0xff] }
 0x229   :  { %4538 = vmatprep.subr.bf16.mxu0 %v4537_v12  ;;  %2948 = vmatmul.mubr.f32.vlgmr.msra.gmra.mrb[4].mxu1 %v5813_v37  ;;  %v1235_v12 = vld [vmem:[#allocation9 + $0x1d48] sm:$0xff]  ;;  %v1242_v37 = vld [vmem:[#allocation9 + $0x1d80] sm:$0xff] }
 0x22a   :  { %5116 = vmatpush1.bf16.msra.mxu1 %v5115_v21  ;;  %2953 = vmatprep.mubr.f32.mxu1 %v5814_v39  ;;  %v980_v21 = vld [vmem:[#allocation9 + $0x1550] sm:$0xff]  ;;  %v4557_v26 = vpack.c.bf16 %v1239_v13, %v1235_v12  ;;  %v1270_v12 = vld [vmem:[#allocation9 + $0x1e60] sm:$0xff]  ;;  %v1021_v13 = vld [vmem:[#allocation9 + $0x1698] sm:$0xff] }
 0x22b   :  { %2255 = vmatmul.mubr.f32.vlgmr.msra.gmra.mrb[0].mxu0 %v6353_v56  ;;  %5118 = vmatprep.subr.bf16.mxu1 %v5117_v29  ;;  %v5123_v56 = vpack.c.bf16 %v960_v48, %v956_v47  ;;  %v989_v29 = vld [vmem:[#allocation9 + $0x1598] sm:$0xff]  ;;  %v5135_v23 = vpack.c.bf16 %v984_v22, %v980_v21  ;;  %v1251_v47 = vld [vmem:[#allocation9 + $0x1dc8] sm:$0xff] }
 0x22c   :  { %4540 = vmatpush1.bf16.msra.mxu0 %v4539_v28  ;;  %2260 = vmatprep.mubr.f32.mxu0 %v6365_v27  ;;  %v977_v27 = vld [vmem:[#allocation9 + $0x1538] sm:$0xff]  ;;  %v1238_v28 = vld [vmem:[#allocation9 + $0x1d60] sm:$0xff]  ;;  %v5137_v36 = vpack.c.bf16 %v993_v24, %v989_v29  ;;  %v1255_v48 = vld [vmem:[#allocation9 + $0x1de8] sm:$0xff] }
 0x22d   :  { %4542 = vmatprep.subr.bf16.mxu0 %v4541_v33  ;;  %2954 = vmatmul.mubr.f32.gmra.mrb[6].mxu1 %v5815_v62  ;;  %v5129_v3 = vpack.c.bf16 %v977_v27, %v973_v61  ;;  %v1247_v33 = vld [vmem:[#allocation9 + $0x1da8] sm:$0xff]  ;;  %v4559_v16 = vpack.c.bf16 %v1238_v28, %v1234_v18  ;;  %v4565_v39 = vpack.c.bf16 %v1255_v48, %v1251_v47  ;;  %v1258_v61 = vld [vmem:[#allocation9 + $0x1e00] sm:$0xff]  ;;  %v1004_v27 = vld [vmem:[#allocation9 + $0x1610] sm:$0xff] }
 0x22e   :  { %5120 = vmatpush1.bf16.msra.mxu1 %v5119_v41  ;;  %3024 = vmatprep.mubr.f32.mxu1 %v5816_v1  ;;  %v4561_v41 = vpack.c.bf16 %v1247_v33, %v1243_v31  ;;  %v1008_v62 = vld [vmem:[#allocation9 + $0x1630] sm:$0xff]  ;;  %v1013_v1 = vld [vmem:[#allocation9 + $0x1658] sm:$0xff]  ;;  %v5151_v18 = vpack.c.bf16 %v1016_v8, %v1012_v7  ;;  %v1278_v31 = vld [vmem:[#allocation9 + $0x1ea0] sm:$0xff] }
 0x22f   :  { %2261 = vmatmul.mubr.f32.gmra.mrb[2].mxu0 %v6368_v25  ;;  %5122 = vmatprep.subr.bf16.mxu1 %v5121_v43  ;;  %v5127_v25 = vpack.c.bf16 %v968_v58, %v964_v30  ;;  %v997_v43 = vld [vmem:[#allocation9 + $0x15d8] sm:$0xff]  ;;  %v1263_v30 = vld [vmem:[#allocation9 + $0x1e28] sm:$0xff]  ;;  %v5143_v58 = vpack.c.bf16 %v1000_v11, %v996_v52  ;;  %v5147_v4 = vpack.c.bf16 %v1008_v62, %v1004_v27  ;;  %v1020_v28 = vld [vmem:[#allocation9 + $0x1690] sm:$0xff] }
 0x230   :  { %4544 = vmatpush1.bf16.msra.mxu0 %v4543_v17  ;;  %2331 = vmatprep.mubr.f32.mxu0 %v6371_v57  ;;  %v5131_v57 = vpack.c.bf16 %v976_v35, %v972_v5  ;;  %v1246_v17 = vld [vmem:[#allocation9 + $0x1da0] sm:$0xff]  ;;  %v5141_v34 = vpack.c.bf16 %v1001_v45, %v997_v43  ;;  %v4569_v63 = vpack.c.bf16 %v1263_v30, %v1259_v55  ;;  %v1024_v29 = vld [vmem:[#allocation9 + $0x16b0] sm:$0xff]  ;;  %v1029_v33 = vld [vmem:[#allocation9 + $0x16d8] sm:$0xff] }
 0x231   :  { %4546 = vmatprep.subr.bf16.mxu0 %v4545_v49  ;;  %v5139_v49 = vpack.c.bf16 %v992_v40, %v988_v20  ;;  %v4563_v50 = vpack.c.bf16 %v1246_v17, %v1242_v37  ;;  %v4571_v5 = vpack.c.bf16 %v1262_v0, %v1258_v61  ;;  %v5155_v37 = vpack.c.bf16 %v1024_v29, %v1020_v28  ;;  %v1028_v17 = vld [vmem:[#allocation9 + $0x16d0] sm:$0xff]  ;;  %v1286_v47 = vld [vmem:[#allocation9 + $0x1ee0] sm:$0xff]  ;;  %v1037_v48 = vld [vmem:[#allocation9 + $0x1718] sm:$0xff] }
 0x232   :  { %5124 = vmatpush1.bf16.msra.mxu1 %v5123_v56  ;;  %v1254_v56 = vld [vmem:[#allocation9 + $0x1de0] sm:$0xff]  ;;  %v1032_v43 = vld [vmem:[#allocation9 + $0x16f0] sm:$0xff]  ;;  %v1045_v30 = vld [vmem:[#allocation9 + $0x1758] sm:$0xff] }
 0x233   :  { %5126 = vmatprep.subr.bf16.mxu1 %v5125_v54  ;;  %v1009_v54 = vld [vmem:[#allocation9 + $0x1638] sm:$0xff]  ;;  %v1294_v55 = vld [vmem:[#allocation9 + $0x1f20] sm:$0xff]  ;;  %v1044_v0 = vld [vmem:[#allocation9 + $0x1750] sm:$0xff] }
 0x234   :  { %4548 = vmatpush1.bf16.msra.mxu0 %v4547_v53  ;;  %v1005_v53 = vld [vmem:[#allocation9 + $0x1618] sm:$0xff] }
 0x235   :  { %4550 = vmatprep.subr.bf16.mxu0 %v4549_v59  ;;  %v4567_v59 = vpack.c.bf16 %v1254_v56, %v1250_v51  ;;  %v5145_v60 = vpack.c.bf16 %v1009_v54, %v1005_v53  ;;  %v5159_v51 = vpack.c.bf16 %v1032_v43, %v1028_v17  ;;  %v1036_v56 = vld [vmem:[#allocation9 + $0x1710] sm:$0xff]  ;;  %v1322_v17 = vld [vmem:[#allocation9 + $0x2000] sm:$0xff] }
 0x236   :  { %5128 = vmatpush1.bf16.msra.mxu1 %v5127_v25  ;;  %v1017_v25 = vld [vmem:[#allocation9 + $0x1678] sm:$0xff]  ;;  %v1040_v53 = vld [vmem:[#allocation9 + $0x1730] sm:$0xff]  ;;  %v1326_v43 = vld [vmem:[#allocation9 + $0x2020] sm:$0xff] }
 0x237   :  { %5130 = vmatprep.subr.bf16.mxu1 %v5129_v3  ;;  %v1271_v3 = vld [vmem:[#allocation9 + $0x1e68] sm:$0xff]  ;;  %v5149_v35 = vpack.c.bf16 %v1017_v25, %v1013_v1  ;;  %v5163_v61 = vpack.c.bf16 %v1040_v53, %v1036_v56  ;;  %v1048_v1 = vld [vmem:[#allocation9 + $0x1770] sm:$0xff] }
 0x238   :  { %4552 = vmatpush1.bf16.msra.mxu0 %v4551_v19  ;;  %v1267_v19 = vld [vmem:[#allocation9 + $0x1e48] sm:$0xff] }
 0x239   :  { %4554 = vmatprep.subr.bf16.mxu0 %v4553_v44  ;;  %v1266_v44 = vld [vmem:[#allocation9 + $0x1e40] sm:$0xff]  ;;  %v4573_v9 = vpack.c.bf16 %v1271_v3, %v1267_v19  ;;  %v1053_v3 = vld [vmem:[#allocation9 + $0x1798] sm:$0xff]  ;;  %v1335_v56 = vld [vmem:[#allocation9 + $0x2068] sm:$0xff] }
 0x23a   :  { %5132 = vmatpush1.bf16.msra.mxu1 %v5131_v57  ;;  %v1025_v57 = vld [vmem:[#allocation9 + $0x16b8] sm:$0xff]  ;;  %v4575_v21 = vpack.c.bf16 %v1270_v12, %v1266_v44  ;;  %v1302_v19 = vld [vmem:[#allocation9 + $0x1f60] sm:$0xff]  ;;  %v5167_v44 = vpack.c.bf16 %v1048_v1, %v1044_v0  ;;  %v1052_v12 = vld [vmem:[#allocation9 + $0x1790] sm:$0xff] }
 0x23b   :  { %5134 = vmatprep.subr.bf16.mxu1 %v5133_v15  ;;  %v1279_v15 = vld [vmem:[#allocation9 + $0x1ea8] sm:$0xff]  ;;  %v5153_v22 = vpack.c.bf16 %v1025_v57, %v1021_v13  ;;  %v1056_v13 = vld [vmem:[#allocation9 + $0x17b0] sm:$0xff] }
 0x23c   :  { %4556 = vmatpush1.bf16.msra.mxu0 %v4555_v42  ;;  %v1275_v42 = vld [vmem:[#allocation9 + $0x1e88] sm:$0xff]  ;;  %v183_v0 = vld [vmem:[#allocation6 + $0x90] sm:$0xff] }
 0x23d   :  { %4558 = vmatprep.subr.bf16.mxu0 %v4557_v26  ;;  %v1274_v26 = vld [vmem:[#allocation9 + $0x1e80] sm:$0xff]  ;;  %v4577_v24 = vpack.c.bf16 %v1279_v15, %v1275_v42  ;;  %v1061_v15 = vld [vmem:[#allocation9 + $0x17d8] sm:$0xff]  ;;  %v5817_v1 = vld [vmem:[#allocation2 + $0x50] sm:$0xff]  ;;  %227 = vst [vmem:[#allocation2 + $0x90] sm:$0xff] %v183_v0 }
 0x23e   :  { %5136 = vmatpush1.bf16.msra.mxu1 %v5135_v23  ;;  %v1033_v23 = vld [vmem:[#allocation9 + $0x16f8] sm:$0xff]  ;;  %v4579_v20 = vpack.c.bf16 %v1278_v31, %v1274_v26  ;;  %v1310_v42 = vld [vmem:[#allocation9 + $0x1fa0] sm:$0xff]  ;;  %v5171_v26 = vpack.c.bf16 %v1056_v13, %v1052_v12  ;;  %v1060_v31 = vld [vmem:[#allocation9 + $0x17d0] sm:$0xff] }
 0x23f   :  { %5138 = vmatprep.subr.bf16.mxu1 %v5137_v36  ;;  %v1287_v36 = vld [vmem:[#allocation9 + $0x1ee8] sm:$0xff]  ;;  %v5157_v40 = vpack.c.bf16 %v1033_v23, %v1029_v33  ;;  %v1064_v33 = vld [vmem:[#allocation9 + $0x17f0] sm:$0xff]  ;;  %v1342_v12 = vld [vmem:[#allocation9 + $0x20a0] sm:$0xff] }
 0x240   :  { %4560 = vmatpush1.bf16.msra.mxu0 %v4559_v16  ;;  %v1283_v16 = vld [vmem:[#allocation9 + $0x1ec8] sm:$0xff]  ;;  %v1093_v13 = vld [vmem:[#allocation9 + $0x18d8] sm:$0xff] }
 0x241   :  { %4562 = vmatprep.subr.bf16.mxu0 %v4561_v41  ;;  %v1282_v41 = vld [vmem:[#allocation9 + $0x1ec0] sm:$0xff]  ;;  %v4581_v45 = vpack.c.bf16 %v1287_v36, %v1283_v16  ;;  %v1069_v36 = vld [vmem:[#allocation9 + $0x1818] sm:$0xff] }
 0x242   :  { %5140 = vmatpush1.bf16.msra.mxu1 %v5139_v49  ;;  %v1041_v49 = vld [vmem:[#allocation9 + $0x1738] sm:$0xff]  ;;  %v4583_v52 = vpack.c.bf16 %v1286_v47, %v1282_v41  ;;  %v1318_v16 = vld [vmem:[#allocation9 + $0x1fe0] sm:$0xff]  ;;  %v5175_v41 = vpack.c.bf16 %v1064_v33, %v1060_v31 }
 0x243   :  { %5142 = vmatprep.subr.bf16.mxu1 %v5141_v34  ;;  %v1295_v34 = vld [vmem:[#allocation9 + $0x1f28] sm:$0xff]  ;;  %v5161_v11 = vpack.c.bf16 %v1041_v49, %v1037_v48  ;;  %v1068_v48 = vld [vmem:[#allocation9 + $0x1810] sm:$0xff]  ;;  %v1350_v33 = vld [vmem:[#allocation9 + $0x20e0] sm:$0xff] }
 0x244   :  { %4564 = vmatpush1.bf16.msra.mxu0 %v4563_v50  ;;  %v1291_v50 = vld [vmem:[#allocation9 + $0x1f08] sm:$0xff]  ;;  %v1072_v49 = vld [vmem:[#allocation9 + $0x1830] sm:$0xff] }
 0x245   :  { %4566 = vmatprep.subr.bf16.mxu0 %v4565_v39  ;;  %v1290_v39 = vld [vmem:[#allocation9 + $0x1f00] sm:$0xff]  ;;  %v4585_v54 = vpack.c.bf16 %v1295_v34, %v1291_v50  ;;  %v6391_v50 = vld [vmem:[#allocation6 + $0x138] sm:$0xff]  ;;  %v5179_v53 = vpack.c.bf16 %v1072_v49, %v1068_v48 }
 0x246   :  { %5144 = vmatpush1.bf16.msra.mxu1 %v5143_v58  ;;  %v1049_v58 = vld [vmem:[#allocation9 + $0x1778] sm:$0xff]  ;;  %v4587_v27 = vpack.c.bf16 %v1294_v55, %v1290_v39  ;;  %249 = vst [vmem:[#allocation2 + $0x138] sm:$0xff] %v6391_v50  ;;  %v1331_v39 = vld [vmem:[#allocation9 + $0x2048] sm:$0xff]  ;;  %v1334_v55 = vld [vmem:[#allocation9 + $0x2060] sm:$0xff] }
 0x247   :  { %5146 = vmatprep.subr.bf16.mxu1 %v5145_v60  ;;  %v1303_v60 = vld [vmem:[#allocation9 + $0x1f68] sm:$0xff]  ;;  %v5165_v62 = vpack.c.bf16 %v1049_v58, %v1045_v30  ;;  %v4603_v30 = vpack.c.bf16 %v1326_v43, %v1322_v17  ;;  %v1354_v17 = vld [vmem:[#allocation9 + $0x2100] sm:$0xff]  ;;  %v1100_v43 = vld [vmem:[#allocation9 + $0x1910] sm:$0xff] }
 0x248   :  { %4568 = vmatpush1.bf16.msra.mxu0 %v4567_v59  ;;  %v1299_v59 = vld [vmem:[#allocation9 + $0x1f48] sm:$0xff]  ;;  %v1358_v48 = vld [vmem:[#allocation9 + $0x2120] sm:$0xff]  ;;  %v1109_v49 = vld [vmem:[#allocation9 + $0x1958] sm:$0xff] }
 0x249   :  { %4570 = vmatprep.subr.bf16.mxu0 %v4569_v63  ;;  %v1298_v63 = vld [vmem:[#allocation9 + $0x1f40] sm:$0xff]  ;;  %v4589_v25 = vpack.c.bf16 %v1303_v60, %v1299_v59  ;;  %v1076_v59 = vld [vmem:[#allocation9 + $0x1850] sm:$0xff] }
 0x24a   :  { %5148 = vmatpush1.bf16.msra.mxu1 %v5147_v4  ;;  %v1057_v4 = vld [vmem:[#allocation9 + $0x17b8] sm:$0xff]  ;;  %v4591_v7 = vpack.c.bf16 %v1302_v19, %v1298_v63  ;;  %v1080_v60 = vld [vmem:[#allocation9 + $0x1870] sm:$0xff]  ;;  %v1343_v19 = vld [vmem:[#allocation9 + $0x20a8] sm:$0xff] }
 0x24b   :  { %5150 = vmatprep.subr.bf16.mxu1 %v5149_v35  ;;  %v1311_v35 = vld [vmem:[#allocation9 + $0x1fa8] sm:$0xff]  ;;  %v5169_v8 = vpack.c.bf16 %v1057_v4, %v1053_v3  ;;  %v1089_v63 = vld [vmem:[#allocation9 + $0x18b8] sm:$0xff]  ;;  %v5818_v3 = vld [vmem:[#allocation2 + $0x70] sm:$0xff]  ;;  %v5183_v4 = vpack.c.bf16 %v1080_v60, %v1076_v59 }
 0x24c   :  { %4572 = vmatpush1.bf16.msra.mxu0 %v4571_v5  ;;  %v1307_v5 = vld [vmem:[#allocation9 + $0x1f88] sm:$0xff]  ;;  %v1117_v59 = vld [vmem:[#allocation9 + $0x1998] sm:$0xff] }
 0x24d   :  { %4574 = vmatprep.subr.bf16.mxu0 %v4573_v9  ;;  %v1306_v9 = vld [vmem:[#allocation9 + $0x1f80] sm:$0xff]  ;;  %v4593_v57 = vpack.c.bf16 %v1311_v35, %v1307_v5  ;;  %v1121_v60 = vld [vmem:[#allocation9 + $0x19b8] sm:$0xff] }
 0x24e   :  { %5152 = vmatpush1.bf16.msra.mxu1 %v5151_v18  ;;  %v1065_v18 = vld [vmem:[#allocation9 + $0x17f8] sm:$0xff]  ;;  %v4595_v28 = vpack.c.bf16 %v1310_v42, %v1306_v9  ;;  %v1347_v42 = vld [vmem:[#allocation9 + $0x20c8] sm:$0xff] }
 0x24f   :  { %5154 = vmatprep.subr.bf16.mxu1 %v5153_v22  ;;  %v1319_v22 = vld [vmem:[#allocation9 + $0x1fe8] sm:$0xff]  ;;  %v5173_v29 = vpack.c.bf16 %v1065_v18, %v1061_v15 }
 0x250   :  { %4576 = vmatpush1.bf16.msra.mxu0 %v4575_v21  ;;  %v1315_v21 = vld [vmem:[#allocation9 + $0x1fc8] sm:$0xff] }
 0x251   :  { %4578 = vmatprep.subr.bf16.mxu0 %v4577_v24  ;;  %v1314_v24 = vld [vmem:[#allocation9 + $0x1fc0] sm:$0xff]  ;;  %v4597_v23 = vpack.c.bf16 %v1319_v22, %v1315_v21  ;;  %v1351_v15 = vld [vmem:[#allocation9 + $0x20e8] sm:$0xff] }
 0x252   :  { %5156 = vmatpush1.bf16.msra.mxu1 %v5155_v37  ;;  %v1073_v37 = vld [vmem:[#allocation9 + $0x1838] sm:$0xff]  ;;  %v5819_v18 = vld [vmem:[#allocation2 + $0x108] sm:$0xff]  ;;  %v4613_v31 = vpack.c.bf16 %v1351_v15, %v1347_v42  ;;  %v1124_v42 = vld [vmem:[#allocation9 + $0x19d0] sm:$0xff] }
 0x253   :  { %5158 = vmatprep.subr.bf16.mxu1 %v5157_v40  ;;  %v1327_v40 = vld [vmem:[#allocation9 + $0x2028] sm:$0xff]  ;;  %v5177_v47 = vpack.c.bf16 %v1073_v37, %v1069_v36  ;;  %v1128_v15 = vld [vmem:[#allocation9 + $0x19f0] sm:$0xff] }
 0x254   :  { %4580 = vmatpush1.bf16.msra.mxu0 %v4579_v20  ;;  %v1323_v20 = vld [vmem:[#allocation9 + $0x2008] sm:$0xff] }
 0x255   :  { %4582 = vmatprep.subr.bf16.mxu0 %v4581_v45  ;;  %v4599_v45 = vpack.c.bf16 %v1318_v16, %v1314_v24  ;;  %v4601_v34 = vpack.c.bf16 %v1327_v40, %v1323_v20  ;;  %v1096_v24 = vld [vmem:[#allocation9 + $0x18f0] sm:$0xff]  ;;  %v5820_v16 = vld [vmem:[#allocation2 + $0x100] sm:$0xff]  ;;  %v1355_v36 = vld [vmem:[#allocation9 + $0x2108] sm:$0xff] }
 0x256   :  { %5160 = vmatpush1.bf16.msra.mxu1 %v5159_v51  ;;  %v1077_v51 = vld [vmem:[#allocation9 + $0x1858] sm:$0xff]  ;;  %v1359_v37 = vld [vmem:[#allocation9 + $0x2128] sm:$0xff] }
 0x257   :  { %5162 = vmatprep.subr.bf16.mxu1 %v5161_v11  ;;  %v6394_v11 = vld [vmem:[#allocation6 + $0x130] sm:$0xff]  ;;  %v5821_v20 = vld [vmem:[#allocation2 + $0x68] sm:$0xff] }
 0x258   :  { %4584 = vmatpush1.bf16.msra.mxu0 %v4583_v52  ;;  %v1081_v52 = vld [vmem:[#allocation9 + $0x1878] sm:$0xff]  ;;  %248 = vst [vmem:[#allocation2 + $0x130] sm:$0xff] %v6394_v11 }
 0x259   :  { %4586 = vmatprep.subr.bf16.mxu0 %v4585_v54  ;;  %v1330_v54 = vld [vmem:[#allocation9 + $0x2040] sm:$0xff]  ;;  %v5181_v58 = vpack.c.bf16 %v1081_v52, %v1077_v51  ;;  %v1363_v51 = vld [vmem:[#allocation9 + $0x2148] sm:$0xff] }
 0x25a   :  { %5164 = vmatpush1.bf16.msra.mxu1 %v5163_v61  ;;  %v6397_v61 = vld [vmem:[#allocation6 + $0x98] sm:$0xff]  ;;  %v4607_v5 = vpack.c.bf16 %v1334_v55, %v1330_v54  ;;  %v1367_v52 = vld [vmem:[#allocation9 + $0x2168] sm:$0xff]  ;;  %v1108_v54 = vld [vmem:[#allocation9 + $0x1950] sm:$0xff] }
 0x25b   :  { %5166 = vmatprep.subr.bf16.mxu1 %v5165_v62  ;;  %v1085_v62 = vld [vmem:[#allocation9 + $0x1898] sm:$0xff]  ;;  %228 = vst [vmem:[#allocation2 + $0x98] sm:$0xff] %v6397_v61  ;;  %v1112_v55 = vld [vmem:[#allocation9 + $0x1970] sm:$0xff] }
 0x25c   :  { %4588 = vmatpush1.bf16.msra.mxu0 %v4587_v27  ;;  %v4605_v27 = vpack.c.bf16 %v1335_v56, %v1331_v39  ;;  %v5185_v35 = vpack.c.bf16 %v1089_v63, %v1085_v62  ;;  %v4619_v39 = vpack.c.bf16 %v1358_v48, %v1354_v17  ;;  %v1375_v62 = vld [vmem:[#allocation9 + $0x21a8] sm:$0xff]  ;;  %v5199_v63 = vpack.c.bf16 %v1112_v55, %v1108_v54  ;;  %v1140_v48 = vld [vmem:[#allocation9 + $0x1a50] sm:$0xff] }
 0x25d   :  { %4590 = vmatprep.subr.bf16.mxu0 %v4589_v25  ;;  %v1339_v25 = vld [vmem:[#allocation9 + $0x2088] sm:$0xff] }
 0x25e   :  { %5168 = vmatpush1.bf16.msra.mxu1 %v5167_v44  ;;  %v1338_v44 = vld [vmem:[#allocation9 + $0x2080] sm:$0xff]  ;;  %v4609_v9 = vpack.c.bf16 %v1343_v19, %v1339_v25  ;;  %v1116_v19 = vld [vmem:[#allocation9 + $0x1990] sm:$0xff] }
 0x25f   :  { %5170 = vmatprep.subr.bf16.mxu1 %v5169_v8  ;;  %v1088_v8 = vld [vmem:[#allocation9 + $0x18b0] sm:$0xff]  ;;  %v4611_v22 = vpack.c.bf16 %v1342_v12, %v1338_v44  ;;  %v1370_v25 = vld [vmem:[#allocation9 + $0x2180] sm:$0xff]  ;;  %v1129_v44 = vld [vmem:[#allocation9 + $0x19f8] sm:$0xff] }
 0x260   :  { %4592 = vmatpush1.bf16.msra.mxu0 %v4591_v7  ;;  %v1084_v7 = vld [vmem:[#allocation9 + $0x1890] sm:$0xff] }
 0x261   :  { %4594 = vmatprep.subr.bf16.mxu0 %v4593_v57  ;;  %v1097_v57 = vld [vmem:[#allocation9 + $0x18f8] sm:$0xff]  ;;  %v5187_v21 = vpack.c.bf16 %v1088_v8, %v1084_v7  ;;  %v1379_v7 = vld [vmem:[#allocation9 + $0x21c8] sm:$0xff] }
 0x262   :  { %5172 = vmatpush1.bf16.msra.mxu1 %v5171_v26  ;;  %v5189_v26 = vpack.c.bf16 %v1097_v57, %v1093_v13  ;;  %v1383_v8 = vld [vmem:[#allocation9 + $0x21e8] sm:$0xff]  ;;  %v1378_v57 = vld [vmem:[#allocation9 + $0x21c0] sm:$0xff] }
 0x263   :  { %5174 = vmatprep.subr.bf16.mxu1 %v5173_v29  ;;  %v1092_v29 = vld [vmem:[#allocation9 + $0x18d0] sm:$0xff] }
 0x264   :  { %4596 = vmatpush1.bf16.msra.mxu0 %v4595_v28  ;;  %v1346_v28 = vld [vmem:[#allocation9 + $0x20c0] sm:$0xff] }
 0x265   :  { %4598 = vmatprep.subr.bf16.mxu0 %v4597_v23  ;;  %v1101_v23 = vld [vmem:[#allocation9 + $0x1918] sm:$0xff]  ;;  %v4615_v40 = vpack.c.bf16 %v1350_v33, %v1346_v28  ;;  %v1387_v28 = vld [vmem:[#allocation9 + $0x2208] sm:$0xff] }
 0x266   :  { %5176 = vmatpush1.bf16.msra.mxu1 %v5175_v41 }
 0x267   :  { %5178 = vmatprep.subr.bf16.mxu1 %v5177_v47  ;;  %v4617_v47 = vpack.c.bf16 %v1359_v37, %v1355_v36  ;;  %v1390_v37 = vld [vmem:[#allocation9 + $0x2220] sm:$0xff] }
 0x268   :  { %4600 = vmatpush1.bf16.msra.mxu0 %v4599_v45  ;;  %v1104_v45 = vld [vmem:[#allocation9 + $0x1930] sm:$0xff] }
 0x269   :  { %4602 = vmatprep.subr.bf16.mxu0 %v4601_v34  ;;  %3025 = vmatmul.mubr.f32.vlgmr.msra.gmra.mrb[4].mxu1 %v5817_v1  ;;  %v1113_v34 = vld [vmem:[#allocation9 + $0x1978] sm:$0xff]  ;;  %v5201_v1 = vpack.c.bf16 %v1121_v60, %v1117_v59  ;;  %v1152_v59 = vld [vmem:[#allocation9 + $0x1ab0] sm:$0xff] }
 0x26a   :  { %5180 = vmatpush1.bf16.msra.mxu1 %v5179_v53  ;;  %3030 = vmatprep.mubr.f32.mxu1 %v5819_v18  ;;  %v5197_v56 = vpack.c.bf16 %v1113_v34, %v1109_v49  ;;  %v1362_v53 = vld [vmem:[#allocation9 + $0x2140] sm:$0xff]  ;;  %v4629_v18 = vpack.c.bf16 %v1383_v8, %v1379_v7  ;;  %v1144_v49 = vld [vmem:[#allocation9 + $0x1a70] sm:$0xff]  ;;  %v1165_v8 = vld [vmem:[#allocation9 + $0x1b18] sm:$0xff] }
 0x26b   :  { %2332 = vmatmul.mubr.f32.vlgmr.msra.gmra.mrb[0].mxu0 %v5818_v3  ;;  %5182 = vmatprep.subr.bf16.mxu1 %v5181_v58  ;;  %v1366_v58 = vld [vmem:[#allocation9 + $0x2160] sm:$0xff]  ;;  %v1120_v3 = vld [vmem:[#allocation9 + $0x19b0] sm:$0xff] }
 0x26c   :  { %4604 = vmatpush1.bf16.msra.mxu0 %v4603_v30  ;;  %2337 = vmatprep.mubr.f32.mxu0 %v6378_v10  ;;  %v1105_v10 = vld [vmem:[#allocation9 + $0x1938] sm:$0xff]  ;;  %v4621_v30 = vpack.c.bf16 %v1367_v52, %v1363_v51  ;;  %v4623_v0 = vpack.c.bf16 %v1366_v58, %v1362_v53  ;;  %v1398_v51 = vld [vmem:[#allocation9 + $0x2260] sm:$0xff]  ;;  %v5215_v53 = vpack.c.bf16 %v1144_v49, %v1140_v48  ;;  %v1148_v58 = vld [vmem:[#allocation9 + $0x1a90] sm:$0xff] }
 0x26d   :  { %4606 = vmatprep.subr.bf16.mxu0 %v4605_v27  ;;  %3031 = vmatmul.mubr.f32.gmra.mrb[6].mxu1 %v5820_v16  ;;  %v5193_v41 = vpack.c.bf16 %v1105_v10, %v1101_v23  ;;  %v1371_v27 = vld [vmem:[#allocation9 + $0x2188] sm:$0xff]  ;;  %v1386_v23 = vld [vmem:[#allocation9 + $0x2200] sm:$0xff]  ;;  %v1132_v10 = vld [vmem:[#allocation9 + $0x1a10] sm:$0xff] }
 0x26e   :  { %5184 = vmatpush1.bf16.msra.mxu1 %v5183_v4  ;;  %3101 = vmatprep.mubr.f32.mxu1 %v5821_v20  ;;  %v4625_v4 = vpack.c.bf16 %v1375_v62, %v1371_v27  ;;  %v1136_v16 = vld [vmem:[#allocation9 + $0x1a30] sm:$0xff]  ;;  %v1141_v20 = vld [vmem:[#allocation9 + $0x1a58] sm:$0xff]  ;;  %v1406_v27 = vld [vmem:[#allocation9 + $0x22a0] sm:$0xff] }
 0x26f   :  { %2338 = vmatmul.mubr.f32.gmra.mrb[2].mxu0 %v6381_v14  ;;  %5186 = vmatprep.subr.bf16.mxu1 %v5185_v35  ;;  %v5191_v14 = vpack.c.bf16 %v1096_v24, %v1092_v29  ;;  %v1125_v35 = vld [vmem:[#allocation9 + $0x19d8] sm:$0xff]  ;;  %v1391_v29 = vld [vmem:[#allocation9 + $0x2228] sm:$0xff]  ;;  %v5207_v24 = vpack.c.bf16 %v1128_v15, %v1124_v42  ;;  %v5211_v17 = vpack.c.bf16 %v1136_v16, %v1132_v10  ;;  %v1414_v7 = vld [vmem:[#allocation9 + $0x22e0] sm:$0xff] }
 0x270   :  { %4608 = vmatpush1.bf16.msra.mxu0 %v4607_v5  ;;  %2408 = vmatprep.mubr.f32.mxu0 %v6384_v32  ;;  %v5195_v32 = vpack.c.bf16 %v1104_v45, %v1100_v43  ;;  %v1374_v5 = vld [vmem:[#allocation9 + $0x21a0] sm:$0xff]  ;;  %v5205_v13 = vpack.c.bf16 %v1129_v44, %v1125_v35  ;;  %v4633_v36 = vpack.c.bf16 %v1391_v29, %v1387_v28  ;;  %v1149_v52 = vld [vmem:[#allocation9 + $0x1a98] sm:$0xff]  ;;  %v1160_v35 = vld [vmem:[#allocation9 + $0x1af0] sm:$0xff] }
 0x271   :  { %4610 = vmatprep.subr.bf16.mxu0 %v4609_v9  ;;  %v5203_v9 = vpack.c.bf16 %v1120_v3, %v1116_v19  ;;  %v4627_v12 = vpack.c.bf16 %v1374_v5, %v1370_v25  ;;  %v4635_v43 = vpack.c.bf16 %v1390_v37, %v1386_v23  ;;  %v1157_v62 = vld [vmem:[#allocation9 + $0x1ad8] sm:$0xff]  ;;  %v5219_v25 = vpack.c.bf16 %v1152_v59, %v1148_v58  ;;  %v1156_v5 = vld [vmem:[#allocation9 + $0x1ad0] sm:$0xff]  ;;  %v1422_v28 = vld [vmem:[#allocation9 + $0x2320] sm:$0xff] }
 0x272   :  { %5188 = vmatpush1.bf16.msra.mxu1 %v5187_v21  ;;  %v1382_v21 = vld [vmem:[#allocation9 + $0x21e0] sm:$0xff]  ;;  %v1173_v29 = vld [vmem:[#allocation9 + $0x1b58] sm:$0xff]  ;;  %v1172_v37 = vld [vmem:[#allocation9 + $0x1b50] sm:$0xff] }
 0x273   :  { %5190 = vmatprep.subr.bf16.mxu1 %v5189_v26  ;;  %v1137_v26 = vld [vmem:[#allocation9 + $0x1a38] sm:$0xff] }
 0x274   :  { %4612 = vmatpush1.bf16.msra.mxu0 %v4611_v22  ;;  %v1133_v22 = vld [vmem:[#allocation9 + $0x1a18] sm:$0xff] }
 0x275   :  { %4614 = vmatprep.subr.bf16.mxu0 %v4613_v31  ;;  %v4631_v31 = vpack.c.bf16 %v1382_v21, %v1378_v57  ;;  %v5209_v33 = vpack.c.bf16 %v1137_v26, %v1133_v22  ;;  %v5223_v57 = vpack.c.bf16 %v1160_v35, %v1156_v5  ;;  %v1164_v21 = vld [vmem:[#allocation9 + $0x1b10] sm:$0xff]  ;;  %v186_v5 = vld [vmem:[#allocation6 + $0xa8] sm:$0xff] }
 0x276   :  { %5192 = vmatpush1.bf16.msra.mxu1 %v5191_v14  ;;  %v1145_v14 = vld [vmem:[#allocation9 + $0x1a78] sm:$0xff]  ;;  %v1168_v22 = vld [vmem:[#allocation9 + $0x1b30] sm:$0xff] }
 0x277   :  { %5194 = vmatprep.subr.bf16.mxu1 %v5193_v41  ;;  %v1399_v41 = vld [vmem:[#allocation9 + $0x2268] sm:$0xff]  ;;  %v5213_v45 = vpack.c.bf16 %v1145_v14, %v1141_v20  ;;  %v5227_v23 = vpack.c.bf16 %v1168_v22, %v1164_v21  ;;  %v1176_v20 = vld [vmem:[#allocation9 + $0x1b70] sm:$0xff]  ;;  %v1209_v21 = vld [vmem:[#allocation9 + $0x1c78] sm:$0xff] }
 0x278   :  { %4616 = vmatpush1.bf16.msra.mxu0 %v4615_v40  ;;  %v1395_v40 = vld [vmem:[#allocation9 + $0x2248] sm:$0xff] }
 0x279   :  { %4618 = vmatprep.subr.bf16.mxu0 %v4617_v47  ;;  %v1394_v47 = vld [vmem:[#allocation9 + $0x2240] sm:$0xff]  ;;  %v4637_v34 = vpack.c.bf16 %v1399_v41, %v1395_v40  ;;  %v1181_v41 = vld [vmem:[#allocation9 + $0x1b98] sm:$0xff]  ;;  %v1459_v22 = vld [vmem:[#allocation9 + $0x2448] sm:$0xff] }
 0x27a   :  { %5196 = vmatpush1.bf16.msra.mxu1 %v5195_v32  ;;  %v1153_v32 = vld [vmem:[#allocation9 + $0x1ab8] sm:$0xff]  ;;  %v4639_v54 = vpack.c.bf16 %v1398_v51, %v1394_v47  ;;  %v1430_v40 = vld [vmem:[#allocation9 + $0x2360] sm:$0xff]  ;;  %v5231_v47 = vpack.c.bf16 %v1176_v20, %v1172_v37  ;;  %v1180_v51 = vld [vmem:[#allocation9 + $0x1b90] sm:$0xff] }
 0x27b   :  { %5198 = vmatprep.subr.bf16.mxu1 %v5197_v56  ;;  %v1407_v56 = vld [vmem:[#allocation9 + $0x22a8] sm:$0xff]  ;;  %v5217_v55 = vpack.c.bf16 %v1153_v32, %v1149_v52  ;;  %v1184_v52 = vld [vmem:[#allocation9 + $0x1bb0] sm:$0xff]  ;;  %v1462_v37 = vld [vmem:[#allocation9 + $0x2460] sm:$0xff] }
 0x27c   :  { %4620 = vmatpush1.bf16.msra.mxu0 %v4619_v39  ;;  %v1403_v39 = vld [vmem:[#allocation9 + $0x2288] sm:$0xff]  ;;  %v1213_v20 = vld [vmem:[#allocation9 + $0x1c98] sm:$0xff] }
 0x27d   :  { %4622 = vmatprep.subr.bf16.mxu0 %v4621_v30  ;;  %v1402_v30 = vld [vmem:[#allocation9 + $0x2280] sm:$0xff]  ;;  %v4641_v60 = vpack.c.bf16 %v1407_v56, %v1403_v39  ;;  %v1189_v56 = vld [vmem:[#allocation9 + $0x1bd8] sm:$0xff] }
 0x27e   :  { %5200 = vmatpush1.bf16.msra.mxu1 %v5199_v63  ;;  %v1161_v63 = vld [vmem:[#allocation9 + $0x1af8] sm:$0xff]  ;;  %v4643_v19 = vpack.c.bf16 %v1406_v27, %v1402_v30  ;;  %v1438_v39 = vld [vmem:[#allocation9 + $0x23a0] sm:$0xff]  ;;  %v5235_v30 = vpack.c.bf16 %v1184_v52, %v1180_v51  ;;  %v1188_v27 = vld [vmem:[#allocation9 + $0x1bd0] sm:$0xff] }
 0x27f   :  { %5202 = vmatprep.subr.bf16.mxu1 %v5201_v1  ;;  %v1415_v1 = vld [vmem:[#allocation9 + $0x22e8] sm:$0xff]  ;;  %v5221_v3 = vpack.c.bf16 %v1161_v63, %v1157_v62  ;;  %v1192_v62 = vld [vmem:[#allocation9 + $0x1bf0] sm:$0xff] }
 0x280   :  { %4624 = vmatpush1.bf16.msra.mxu0 %v4623_v0  ;;  %v1411_v0 = vld [vmem:[#allocation9 + $0x22c8] sm:$0xff]  ;;  %v5239_v35 = vpack.c.bf16 %v1192_v62, %v1188_v27  ;;  %v1216_v51 = vld [vmem:[#allocation9 + $0x1cb0] sm:$0xff]  ;;  %v1474_v27 = vld [vmem:[#allocation9 + $0x24c0] sm:$0xff] }
 0x281   :  { %4626 = vmatprep.subr.bf16.mxu0 %v4625_v4  ;;  %v1410_v4 = vld [vmem:[#allocation9 + $0x22c0] sm:$0xff]  ;;  %v4645_v44 = vpack.c.bf16 %v1415_v1, %v1411_v0  ;;  %v1197_v1 = vld [vmem:[#allocation9 + $0x1c18] sm:$0xff]  ;;  %v207_v52 = vld [vmem:[#allocation6 + $0x150] sm:$0xff] }
 0x282   :  { %5204 = vmatpush1.bf16.msra.mxu1 %v5203_v9  ;;  %v1169_v9 = vld [vmem:[#allocation9 + $0x1b38] sm:$0xff]  ;;  %v4647_v42 = vpack.c.bf16 %v1414_v7, %v1410_v4  ;;  %v1446_v0 = vld [vmem:[#allocation9 + $0x23e0] sm:$0xff]  ;;  %v1455_v4 = vld [vmem:[#allocation9 + $0x2428] sm:$0xff]  ;;  %252 = vst [vmem:[#allocation2 + $0x150] sm:$0xff] %v207_v52 }
 0x283   :  { %5206 = vmatprep.subr.bf16.mxu1 %v5205_v13  ;;  %v1423_v13 = vld [vmem:[#allocation9 + $0x2328] sm:$0xff]  ;;  %v5225_v15 = vpack.c.bf16 %v1169_v9, %v1165_v8  ;;  %v1196_v7 = vld [vmem:[#allocation9 + $0x1c10] sm:$0xff] }
 0x284   :  { %4628 = vmatpush1.bf16.msra.mxu0 %v4627_v12  ;;  %v1419_v12 = vld [vmem:[#allocation9 + $0x2308] sm:$0xff]  ;;  %v1220_v62 = vld [vmem:[#allocation9 + $0x1cd0] sm:$0xff] }
 0x285   :  { %4630 = vmatprep.subr.bf16.mxu0 %v4629_v18  ;;  %v1418_v18 = vld [vmem:[#allocation9 + $0x2300] sm:$0xff]  ;;  %v4649_v26 = vpack.c.bf16 %v1423_v13, %v1419_v12  ;;  %v1200_v12 = vld [vmem:[#allocation9 + $0x1c30] sm:$0xff]  ;;  %v6404_v13 = vld [vmem:[#allocation6 + $0x148] sm:$0xff] }
 0x286   :  { %5208 = vmatpush1.bf16.msra.mxu1 %v5207_v24  ;;  %v1177_v24 = vld [vmem:[#allocation9 + $0x1b78] sm:$0xff]  ;;  %v4651_v10 = vpack.c.bf16 %v1422_v28, %v1418_v18  ;;  %251 = vst [vmem:[#allocation2 + $0x148] sm:$0xff] %v6404_v13  ;;  %v5243_v28 = vpack.c.bf16 %v1200_v12, %v1196_v7  ;;  %v1482_v7 = vld [vmem:[#allocation9 + $0x2500] sm:$0xff] }
 0x287   :  { %5210 = vmatprep.subr.bf16.mxu1 %v5209_v33  ;;  %v1431_v33 = vld [vmem:[#allocation9 + $0x2368] sm:$0xff]  ;;  %v5229_v16 = vpack.c.bf16 %v1177_v24, %v1173_v29  ;;  %v1205_v18 = vld [vmem:[#allocation9 + $0x1c58] sm:$0xff]  ;;  %v1458_v29 = vld [vmem:[#allocation9 + $0x2440] sm:$0xff] }
 0x288   :  { %4632 = vmatpush1.bf16.msra.mxu0 %v4631_v31  ;;  %v1427_v31 = vld [vmem:[#allocation9 + $0x2348] sm:$0xff]  ;;  %v208_v24 = vld [vmem:[#allocation6 + $0x158] sm:$0xff] }
 0x289   :  { %4634 = vmatprep.subr.bf16.mxu0 %v4633_v36  ;;  %v1426_v36 = vld [vmem:[#allocation9 + $0x2340] sm:$0xff]  ;;  %v4653_v14 = vpack.c.bf16 %v1431_v33, %v1427_v31  ;;  %v5245_v33 = vpack.c.bf16 %v1209_v21, %v1205_v18  ;;  %v1241_v18 = vld [vmem:[#allocation9 + $0x1d78] sm:$0xff]  ;;  %v1491_v21 = vld [vmem:[#allocation9 + $0x2548] sm:$0xff] }
 0x28a   :  { %5212 = vmatpush1.bf16.msra.mxu1 %v5211_v17  ;;  %v1185_v17 = vld [vmem:[#allocation9 + $0x1bb8] sm:$0xff]  ;;  %v4655_v48 = vpack.c.bf16 %v1430_v40, %v1426_v36  ;;  %v5822_v40 = vld [vmem:[#allocation2 + $0x60] sm:$0xff] }
 0x28b   :  { %5214 = vmatprep.subr.bf16.mxu1 %v5213_v45  ;;  %v1439_v45 = vld [vmem:[#allocation9 + $0x23a8] sm:$0xff]  ;;  %v5233_v49 = vpack.c.bf16 %v1185_v17, %v1181_v41 }
 0x28c   :  { %4636 = vmatpush1.bf16.msra.mxu0 %v4635_v43  ;;  %v1435_v43 = vld [vmem:[#allocation9 + $0x2388] sm:$0xff] }
 0x28d   :  { %4638 = vmatprep.subr.bf16.mxu0 %v4637_v34  ;;  %v1434_v34 = vld [vmem:[#allocation9 + $0x2380] sm:$0xff]  ;;  %v4657_v32 = vpack.c.bf16 %v1439_v45, %v1435_v43  ;;  %v1467_v41 = vld [vmem:[#allocation9 + $0x2488] sm:$0xff] }
 0x28e   :  { %5216 = vmatpush1.bf16.msra.mxu1 %v5215_v53  ;;  %v1193_v53 = vld [vmem:[#allocation9 + $0x1bf8] sm:$0xff]  ;;  %v4659_v58 = vpack.c.bf16 %v1438_v39, %v1434_v34  ;;  %v1471_v17 = vld [vmem:[#allocation9 + $0x24a8] sm:$0xff]  ;;  %v5823_v43 = vld [vmem:[#allocation2 + $0x80] sm:$0xff] }
 0x28f   :  { %5218 = vmatprep.subr.bf16.mxu1 %v5217_v55  ;;  %v1447_v55 = vld [vmem:[#allocation9 + $0x23e8] sm:$0xff]  ;;  %v5237_v59 = vpack.c.bf16 %v1193_v53, %v1189_v56  ;;  %v1212_v34 = vld [vmem:[#allocation9 + $0x1c90] sm:$0xff]  ;;  %v1470_v39 = vld [vmem:[#allocation9 + $0x24a0] sm:$0xff] }
 0x290   :  { %4640 = vmatpush1.bf16.msra.mxu0 %v4639_v54  ;;  %v1443_v54 = vld [vmem:[#allocation9 + $0x23c8] sm:$0xff]  ;;  %v1221_v56 = vld [vmem:[#allocation9 + $0x1cd8] sm:$0xff] }
 0x291   :  { %4642 = vmatprep.subr.bf16.mxu0 %v4641_v60  ;;  %v1442_v60 = vld [vmem:[#allocation9 + $0x23c0] sm:$0xff]  ;;  %v4661_v63 = vpack.c.bf16 %v1447_v55, %v1443_v54  ;;  %v1225_v53 = vld [vmem:[#allocation9 + $0x1cf8] sm:$0xff]  ;;  %v1475_v54 = vld [vmem:[#allocation9 + $0x24c8] sm:$0xff] }
 0x292   :  { %5220 = vmatpush1.bf16.msra.mxu1 %v5219_v25  ;;  %v1201_v25 = vld [vmem:[#allocation9 + $0x1c38] sm:$0xff]  ;;  %v4663_v8 = vpack.c.bf16 %v1446_v0, %v1442_v60  ;;  %v1479_v55 = vld [vmem:[#allocation9 + $0x24e8] sm:$0xff]  ;;  %v5253_v60 = vpack.c.bf16 %v1225_v53, %v1221_v56  ;;  %v1506_v56 = vld [vmem:[#allocation9 + $0x25c0] sm:$0xff] }
 0x293   :  { %5222 = vmatprep.subr.bf16.mxu1 %v5221_v3  ;;  %v1451_v3 = vld [vmem:[#allocation9 + $0x2408] sm:$0xff]  ;;  %v5241_v9 = vpack.c.bf16 %v1201_v25, %v1197_v1  ;;  %v4677_v0 = vpack.c.bf16 %v1479_v55, %v1475_v54  ;;  %v1478_v1 = vld [vmem:[#allocation9 + $0x24e0] sm:$0xff]  ;;  %v1233_v25 = vld [vmem:[#allocation9 + $0x1d38] sm:$0xff] }
 0x294   :  { %4644 = vmatpush1.bf16.msra.mxu0 %v4643_v19  ;;  %v6089_v19 = vmov 0.0   ;;  %v1252_v53 = vld [vmem:[#allocation9 + $0x1dd0] sm:$0xff] }
 0x295   :  { %4646 = vmatprep.subr.bf16.mxu0 %v4645_v44  ;;  %163 = vst.msk [vmem:[#allocation2 + $0xa8] sm:$0xff] %vm162_vm0, %v6089_v19  ;;  %164 = vst.msk [vmem:[#allocation2 + $0x158] sm:$0xff] %vm162_vm0, %v6089_v19  ;;  %v1450_v44 = vld [vmem:[#allocation9 + $0x2400] sm:$0xff]  ;;  %v5825_v19 = vld [vmem:[#allocation2 + $0x110] sm:$0xff] }
 0x296   :  { %5224 = vmatpush1.bf16.msra.mxu1 %v5223_v57  ;;  %231 = vst.msk [vmem:[#allocation2 + $0xa8] sm:$0xff] %vm230_vm1, %v186_v5  ;;  %v6406_v57 = vld [vmem:[#allocation6 + $0x140] sm:$0xff]  ;;  %253 = vst.msk [vmem:[#allocation2 + $0x158] sm:$0xff] %vm230_vm1, %v208_v24  ;;  %v5826_v5 = vld [vmem:[#allocation2 + $0x78] sm:$0xff] }
 0x297   :  { %5226 = vmatprep.subr.bf16.mxu1 %v5225_v15  ;;  %v1454_v15 = vld [vmem:[#allocation9 + $0x2420] sm:$0xff]  ;;  %250 = vst [vmem:[#allocation2 + $0x140] sm:$0xff] %v6406_v57  ;;  %v1236_v24 = vld [vmem:[#allocation9 + $0x1d50] sm:$0xff] }
 0x298   :  { %4648 = vmatpush1.bf16.msra.mxu0 %v4647_v42  ;;  %v4665_v42 = vpack.c.bf16 %v1455_v4, %v1451_v3  ;;  %v4667_v31 = vpack.c.bf16 %v1454_v15, %v1450_v44  ;;  %v1483_v3 = vld [vmem:[#allocation9 + $0x2508] sm:$0xff]  ;;  %v1237_v15 = vld [vmem:[#allocation9 + $0x1d58] sm:$0xff]  ;;  %v1256_v54 = vld [vmem:[#allocation9 + $0x1df0] sm:$0xff] }
 0x299   :  { %4650 = vmatprep.subr.bf16.mxu0 %v4649_v26  ;;  %v1463_v26 = vld [vmem:[#allocation9 + $0x2468] sm:$0xff] }
 0x29a   :  { %5228 = vmatpush1.bf16.msra.mxu1 %v5227_v23  ;;  %v1204_v23 = vld [vmem:[#allocation9 + $0x1c50] sm:$0xff]  ;;  %v4669_v36 = vpack.c.bf16 %v1463_v26, %v1459_v22  ;;  %v1487_v4 = vld [vmem:[#allocation9 + $0x2528] sm:$0xff] }
 0x29b   :  { %5230 = vmatprep.subr.bf16.mxu1 %v5229_v16  ;;  %v185_v16 = vld [vmem:[#allocation6 + $0xa0] sm:$0xff]  ;;  %v4681_v12 = vpack.c.bf16 %v1487_v4, %v1483_v3  ;;  %v1495_v22 = vld [vmem:[#allocation9 + $0x2568] sm:$0xff]  ;;  %v1269_v4 = vld [vmem:[#allocation9 + $0x1e58] sm:$0xff] }
 0x29c   :  { %4652 = vmatpush1.bf16.msra.mxu0 %v4651_v10  ;;  %v1208_v10 = vld [vmem:[#allocation9 + $0x1c70] sm:$0xff]  ;;  %229 = vst [vmem:[#allocation2 + $0xa0] sm:$0xff] %v185_v16  ;;  %v1249_v16 = vld [vmem:[#allocation9 + $0x1db8] sm:$0xff]  ;;  %v1518_v3 = vld [vmem:[#allocation9 + $0x2620] sm:$0xff] }
 0x29d   :  { %4654 = vmatprep.subr.bf16.mxu0 %v4653_v14  ;;  %v1217_v14 = vld [vmem:[#allocation9 + $0x1cb8] sm:$0xff]  ;;  %v5247_v45 = vpack.c.bf16 %v1208_v10, %v1204_v23  ;;  %v1494_v23 = vld [vmem:[#allocation9 + $0x2560] sm:$0xff] }
 0x29e   :  { %5232 = vmatpush1.bf16.msra.mxu1 %v5231_v47  ;;  %v1466_v47 = vld [vmem:[#allocation9 + $0x2480] sm:$0xff]  ;;  %v1245_v10 = vld [vmem:[#allocation9 + $0x1d98] sm:$0xff] }
 0x29f   :  { %5234 = vmatprep.subr.bf16.mxu1 %v5233_v49  ;;  %v5249_v49 = vpack.c.bf16 %v1217_v14, %v1213_v20 }
 0x2a0   :  { %4656 = vmatpush1.bf16.msra.mxu0 %v4655_v48  ;;  %v4671_v48 = vpack.c.bf16 %v1462_v37, %v1458_v29  ;;  %v1490_v29 = vld [vmem:[#allocation9 + $0x2540] sm:$0xff]  ;;  %v1503_v37 = vld [vmem:[#allocation9 + $0x25a8] sm:$0xff] }
 0x2a1   :  { %4658 = vmatprep.subr.bf16.mxu0 %v4657_v32  ;;  %v4673_v32 = vpack.c.bf16 %v1471_v17, %v1467_v41  ;;  %v4687_v14 = vpack.c.bf16 %v1494_v23, %v1490_v29  ;;  %v1498_v41 = vld [vmem:[#allocation9 + $0x2580] sm:$0xff]  ;;  %v1244_v17 = vld [vmem:[#allocation9 + $0x1d90] sm:$0xff] }
 0x2a2   :  { %5236 = vmatpush1.bf16.msra.mxu1 %v5235_v30  ;;  %v5824_v30 = vld [vmem:[#allocation2 + $0x118] sm:$0xff]  ;;  %v1280_v23 = vld [vmem:[#allocation9 + $0x1eb0] sm:$0xff] }
 0x2a3   :  { %5238 = vmatprep.subr.bf16.mxu1 %v5237_v59  ;;  %v4675_v59 = vpack.c.bf16 %v1470_v39, %v1466_v47  ;;  %v1502_v47 = vld [vmem:[#allocation9 + $0x25a0] sm:$0xff] }
 0x2a4   :  { %4660 = vmatpush1.bf16.msra.mxu0 %v4659_v58  ;;  %v5251_v58 = vpack.c.bf16 %v1216_v51, %v1212_v34  ;;  %v1507_v34 = vld [vmem:[#allocation9 + $0x25c8] sm:$0xff] }
 0x2a5   :  { %4662 = vmatprep.subr.bf16.mxu0 %v4661_v63  ;;  %v1224_v63 = vld [vmem:[#allocation9 + $0x1cf0] sm:$0xff]  ;;  %v1511_v51 = vld [vmem:[#allocation9 + $0x25e8] sm:$0xff] }
 0x2a6   :  { %5240 = vmatpush1.bf16.msra.mxu1 %v5239_v35  ;;  %v4679_v35 = vpack.c.bf16 %v1478_v1, %v1474_v27  ;;  %v4693_v55 = vpack.c.bf16 %v1511_v51, %v1507_v34  ;;  %v1519_v27 = vld [vmem:[#allocation9 + $0x2628] sm:$0xff]  ;;  %v1514_v1 = vld [vmem:[#allocation9 + $0x2600] sm:$0xff]  ;;  %v1293_v34 = vld [vmem:[#allocation9 + $0x1f18] sm:$0xff] }
 0x2a7   :  { %5242 = vmatprep.subr.bf16.mxu1 %v5241_v9  ;;  %v1232_v9 = vld [vmem:[#allocation9 + $0x1d30] sm:$0xff]  ;;  %v1297_v51 = vld [vmem:[#allocation9 + $0x1f38] sm:$0xff] }
 0x2a8   :  { %4664 = vmatpush1.bf16.msra.mxu0 %v4663_v8  ;;  %v1228_v8 = vld [vmem:[#allocation9 + $0x1d10] sm:$0xff] }
 0x2a9   :  { %4666 = vmatprep.subr.bf16.mxu0 %v4665_v42  ;;  %3102 = vmatmul.mubr.f32.vlgmr.msra.gmra.mrb[4].mxu1 %v5822_v40  ;;  %v1486_v42 = vld [vmem:[#allocation9 + $0x2520] sm:$0xff]  ;;  %v5265_v40 = vpack.c.bf16 %v1249_v16, %v1245_v10 }
 0x2aa   :  { %5244 = vmatpush1.bf16.msra.mxu1 %v5243_v28  ;;  %3107 = vmatprep.mubr.f32.mxu1 %v5824_v30  ;;  %v4683_v26 = vpack.c.bf16 %v1486_v42, %v1482_v7  ;;  %v5261_v28 = vpack.c.bf16 %v1241_v18, %v1237_v15  ;;  %v1510_v30 = vld [vmem:[#allocation9 + $0x25e0] sm:$0xff]  ;;  %v4699_v7 = vpack.c.bf16 %v1518_v3, %v1514_v1  ;;  %v1272_v42 = vld [vmem:[#allocation9 + $0x1e70] sm:$0xff] }
 0x2ab   :  { %2409 = vmatmul.mubr.f32.vlgmr.msra.gmra.mrb[0].mxu0 %v5823_v43  ;;  %5246 = vmatprep.subr.bf16.mxu1 %v5245_v33  ;;  %v4685_v33 = vpack.c.bf16 %v1495_v22, %v1491_v21  ;;  %v1248_v43 = vld [vmem:[#allocation9 + $0x1db0] sm:$0xff]  ;;  %v1526_v18 = vld [vmem:[#allocation9 + $0x2660] sm:$0xff]  ;;  %v1277_v21 = vld [vmem:[#allocation9 + $0x1e98] sm:$0xff] }
 0x2ac   :  { %4668 = vmatpush1.bf16.msra.mxu0 %v4667_v31  ;;  %2414 = vmatprep.mubr.f32.mxu0 %v6391_v50  ;;  %v1229_v50 = vld [vmem:[#allocation9 + $0x1d18] sm:$0xff]  ;;  %v1240_v31 = vld [vmem:[#allocation9 + $0x1d70] sm:$0xff]  ;;  %v5267_v52 = vpack.c.bf16 %v1248_v43, %v1244_v17  ;;  %v1534_v16 = vld [vmem:[#allocation9 + $0x26a0] sm:$0xff] }
 0x2ad   :  { %4670 = vmatprep.subr.bf16.mxu0 %v4669_v36  ;;  %3108 = vmatmul.mubr.f32.gmra.mrb[6].mxu1 %v5825_v19  ;;  %v5257_v44 = vpack.c.bf16 %v1233_v25, %v1229_v50  ;;  %v1499_v36 = vld [vmem:[#allocation9 + $0x2588] sm:$0xff]  ;;  %v5263_v20 = vpack.c.bf16 %v1240_v31, %v1236_v24  ;;  %v1260_v50 = vld [vmem:[#allocation9 + $0x1e10] sm:$0xff]  ;;  %v1281_v22 = vld [vmem:[#allocation9 + $0x1eb8] sm:$0xff] }
 0x2ae   :  { %5248 = vmatpush1.bf16.msra.mxu1 %v5247_v45  ;;  %3178 = vmatprep.mubr.f32.mxu1 %v5826_v5  ;;  %v4689_v45 = vpack.c.bf16 %v1503_v37, %v1499_v36  ;;  %v1264_v25 = vld [vmem:[#allocation9 + $0x1e30] sm:$0xff]  ;;  %v1273_v5 = vld [vmem:[#allocation9 + $0x1e78] sm:$0xff]  ;;  %v5281_v24 = vpack.c.bf16 %v1281_v22, %v1277_v21  ;;  %v1530_v31 = vld [vmem:[#allocation9 + $0x2680] sm:$0xff] }
 0x2af   :  { %2415 = vmatmul.mubr.f32.gmra.mrb[2].mxu0 %v6394_v11  ;;  %5250 = vmatprep.subr.bf16.mxu1 %v5249_v49  ;;  %v5255_v11 = vpack.c.bf16 %v1224_v63, %v1220_v62  ;;  %v1257_v49 = vld [vmem:[#allocation9 + $0x1df8] sm:$0xff]  ;;  %v5271_v62 = vpack.c.bf16 %v1256_v54, %v1252_v53  ;;  %v4695_v63 = vpack.c.bf16 %v1510_v30, %v1506_v56  ;;  %v1538_v43 = vld [vmem:[#allocation9 + $0x26c0] sm:$0xff]  ;;  %v1296_v30 = vld [vmem:[#allocation9 + $0x1f30] sm:$0xff] }
 0x2b0   :  { %4672 = vmatpush1.bf16.msra.mxu0 %v4671_v48  ;;  %2485 = vmatprep.mubr.f32.mxu0 %v6397_v61  ;;  %v5259_v61 = vpack.c.bf16 %v1232_v9, %v1228_v8  ;;  %v1253_v48 = vld [vmem:[#allocation9 + $0x1dd8] sm:$0xff]  ;;  %v5277_v8 = vpack.c.bf16 %v1273_v5, %v1269_v4  ;;  %v1522_v9 = vld [vmem:[#allocation9 + $0x2640] sm:$0xff]  ;;  %v5289_v53 = vpack.c.bf16 %v1297_v51, %v1293_v34  ;;  %v1304_v3 = vld [vmem:[#allocation9 + $0x1f70] sm:$0xff] }
 0x2b1   :  { %4674 = vmatprep.subr.bf16.mxu0 %v4673_v32  ;;  %v4691_v32 = vpack.c.bf16 %v1502_v47, %v1498_v41  ;;  %v5269_v39 = vpack.c.bf16 %v1257_v49, %v1253_v48  ;;  %v4703_v29 = vpack.c.bf16 %v1526_v18, %v1522_v9  ;;  %v1285_v36 = vld [vmem:[#allocation9 + $0x1ed8] sm:$0xff]  ;;  %v4707_v41 = vpack.c.bf16 %v1534_v16, %v1530_v31  ;;  %v1288_v47 = vld [vmem:[#allocation9 + $0x1ef0] sm:$0xff]  ;;  %v1542_v49 = vld [vmem:[#allocation9 + $0x26e0] sm:$0xff] }
 0x2b2   :  { %5252 = vmatpush1.bf16.msra.mxu1 %v5251_v58  ;;  %v1261_v58 = vld [vmem:[#allocation9 + $0x1e18] sm:$0xff]  ;;  %v4711_v56 = vpack.c.bf16 %v1542_v49, %v1538_v43  ;;  %v1546_v54 = vld [vmem:[#allocation9 + $0x2700] sm:$0xff]  ;;  %v1312_v18 = vld [vmem:[#allocation9 + $0x1fb0] sm:$0xff] }
 0x2b3   :  { %5254 = vmatprep.subr.bf16.mxu1 %v5253_v60  ;;  %v1515_v60 = vld [vmem:[#allocation9 + $0x2608] sm:$0xff]  ;;  %v1289_v37 = vld [vmem:[#allocation9 + $0x1ef8] sm:$0xff]  ;;  %v1558_v5 = vld [vmem:[#allocation9 + $0x2760] sm:$0xff] }
 0x2b4   :  { %4676 = vmatpush1.bf16.msra.mxu0 %v4675_v59  ;;  %v1265_v59 = vld [vmem:[#allocation9 + $0x1e38] sm:$0xff]  ;;  %v4697_v19 = vpack.c.bf16 %v1519_v27, %v1515_v60  ;;  %v5285_v17 = vpack.c.bf16 %v1289_v37, %v1285_v36  ;;  %v1566_v22 = vld [vmem:[#allocation9 + $0x27a0] sm:$0xff]  ;;  %v1320_v16 = vld [vmem:[#allocation9 + $0x1ff0] sm:$0xff] }
 0x2b5   :  { %4678 = vmatprep.subr.bf16.mxu0 %v4677_v0  ;;  %v5273_v0 = vpack.c.bf16 %v1265_v59, %v1261_v58  ;;  %v1550_v59 = vld [vmem:[#allocation9 + $0x2720] sm:$0xff]  ;;  %v1301_v60 = vld [vmem:[#allocation9 + $0x1f58] sm:$0xff]  ;;  %v1328_v49 = vld [vmem:[#allocation9 + $0x2030] sm:$0xff] }
 0x2b6   :  { %5256 = vmatpush1.bf16.msra.mxu1 %v5255_v11  ;;  %v1523_v11 = vld [vmem:[#allocation9 + $0x2648] sm:$0xff]  ;;  %v1305_v27 = vld [vmem:[#allocation9 + $0x1f78] sm:$0xff]  ;;  %v4715_v1 = vpack.c.bf16 %v1550_v59, %v1546_v54  ;;  %v1574_v37 = vld [vmem:[#allocation9 + $0x27e0] sm:$0xff] }
 0x2b7   :  { %5258 = vmatprep.subr.bf16.mxu1 %v5257_v44  ;;  %v5275_v44 = vpack.c.bf16 %v1264_v25, %v1260_v50  ;;  %v5293_v50 = vpack.c.bf16 %v1305_v27, %v1301_v60  ;;  %v1554_v25 = vld [vmem:[#allocation9 + $0x2740] sm:$0xff]  ;;  %v1336_v59 = vld [vmem:[#allocation9 + $0x2070] sm:$0xff] }
 0x2b8   :  { %4680 = vmatpush1.bf16.msra.mxu0 %v4679_v35  ;;  %v1527_v35 = vld [vmem:[#allocation9 + $0x2668] sm:$0xff]  ;;  %v4719_v9 = vpack.c.bf16 %v1558_v5, %v1554_v25  ;;  %v1582_v51 = vld [vmem:[#allocation9 + $0x2820] sm:$0xff]  ;;  %v6414_v25 = vld [vmem:[#allocation2 + $0x90] sm:$0xff] }
 0x2b9   :  { %4682 = vmatprep.subr.bf16.mxu0 %v4681_v12  ;;  %v1268_v12 = vld [vmem:[#allocation9 + $0x1e50] sm:$0xff]  ;;  %v4701_v15 = vpack.c.bf16 %v1527_v35, %v1523_v11  ;;  %v1309_v11 = vld [vmem:[#allocation9 + $0x1f98] sm:$0xff]  ;;  %v1590_v27 = vld [vmem:[#allocation9 + $0x2860] sm:$0xff] }
 0x2ba   :  { %5260 = vmatpush1.bf16.msra.mxu1 %v5259_v61  ;;  %v1531_v61 = vld [vmem:[#allocation9 + $0x2688] sm:$0xff]  ;;  %v1313_v35 = vld [vmem:[#allocation9 + $0x1fb8] sm:$0xff]  ;;  %v1594_v5 = vld [vmem:[#allocation9 + $0x2880] sm:$0xff] }
 0x2bb   :  { %5262 = vmatprep.subr.bf16.mxu1 %v5261_v28  ;;  %v5279_v28 = vpack.c.bf16 %v1272_v42, %v1268_v12  ;;  %v5297_v12 = vpack.c.bf16 %v1313_v35, %v1309_v11  ;;  %v1562_v42 = vld [vmem:[#allocation9 + $0x2780] sm:$0xff]  ;;  %v1340_v11 = vld [vmem:[#allocation9 + $0x2090] sm:$0xff] }
 0x2bc   :  { %4684 = vmatpush1.bf16.msra.mxu0 %v4683_v26  ;;  %v1535_v26 = vld [vmem:[#allocation9 + $0x26a8] sm:$0xff]  ;;  %v4723_v31 = vpack.c.bf16 %v1566_v22, %v1562_v42  ;;  %v1344_v35 = vld [vmem:[#allocation9 + $0x20b0] sm:$0xff] }
 0x2bd   :  { %4686 = vmatprep.subr.bf16.mxu0 %v4685_v33  ;;  %v1276_v33 = vld [vmem:[#allocation9 + $0x1e90] sm:$0xff]  ;;  %v4705_v10 = vpack.c.bf16 %v1535_v26, %v1531_v61  ;;  %v1317_v61 = vld [vmem:[#allocation9 + $0x1fd8] sm:$0xff]  ;;  %v1607_v42 = vld [vmem:[#allocation9 + $0x28e8] sm:$0xff] }
 0x2be   :  { %5264 = vmatpush1.bf16.msra.mxu1 %v5263_v20  ;;  %v1539_v20 = vld [vmem:[#allocation9 + $0x26c8] sm:$0xff]  ;;  %v1321_v26 = vld [vmem:[#allocation9 + $0x1ff8] sm:$0xff] }
 0x2bf   :  { %5266 = vmatprep.subr.bf16.mxu1 %v5265_v40  ;;  %v5283_v40 = vpack.c.bf16 %v1280_v23, %v1276_v33  ;;  %v5301_v33 = vpack.c.bf16 %v1321_v26, %v1317_v61  ;;  %v1570_v23 = vld [vmem:[#allocation9 + $0x27c0] sm:$0xff] }
 0x2c0   :  { %4688 = vmatpush1.bf16.msra.mxu0 %v4687_v14  ;;  %v1543_v14 = vld [vmem:[#allocation9 + $0x26e8] sm:$0xff]  ;;  %v4727_v43 = vpack.c.bf16 %v1574_v37, %v1570_v23  ;;  %v1602_v26 = vld [vmem:[#allocation9 + $0x28c0] sm:$0xff] }
 0x2c1   :  { %4690 = vmatprep.subr.bf16.mxu0 %v4689_v45  ;;  %v1284_v45 = vld [vmem:[#allocation9 + $0x1ed0] sm:$0xff]  ;;  %v4709_v48 = vpack.c.bf16 %v1543_v14, %v1539_v20  ;;  %v1325_v20 = vld [vmem:[#allocation9 + $0x2018] sm:$0xff]  ;;  %v5830_v23 = vld [vmem:[#allocation2 + $0x120] sm:$0xff] }
 0x2c2   :  { %5268 = vmatpush1.bf16.msra.mxu1 %v5267_v52  ;;  %v1547_v52 = vld [vmem:[#allocation9 + $0x2708] sm:$0xff]  ;;  %v1329_v14 = vld [vmem:[#allocation9 + $0x2038] sm:$0xff] }
 0x2c3   :  { %5270 = vmatprep.subr.bf16.mxu1 %v5269_v39  ;;  %v5287_v39 = vpack.c.bf16 %v1288_v47, %v1284_v45  ;;  %v5305_v45 = vpack.c.bf16 %v1329_v14, %v1325_v20  ;;  %v1578_v47 = vld [vmem:[#allocation9 + $0x2800] sm:$0xff] }
 0x2c4   :  { %4692 = vmatpush1.bf16.msra.mxu0 %v4691_v32  ;;  %v1551_v32 = vld [vmem:[#allocation9 + $0x2728] sm:$0xff]  ;;  %v4731_v54 = vpack.c.bf16 %v1582_v51, %v1578_v47  ;;  %v1610_v14 = vld [vmem:[#allocation9 + $0x2900] sm:$0xff]  ;;  %v1369_v47 = vld [vmem:[#allocation9 + $0x2178] sm:$0xff] }
 0x2c5   :  { %4694 = vmatprep.subr.bf16.mxu0 %v4693_v55  ;;  %v1292_v55 = vld [vmem:[#allocation9 + $0x1f10] sm:$0xff]  ;;  %v4713_v58 = vpack.c.bf16 %v1551_v32, %v1547_v52  ;;  %v1333_v52 = vld [vmem:[#allocation9 + $0x2058] sm:$0xff] }
 0x2c6   :  { %5272 = vmatpush1.bf16.msra.mxu1 %v5271_v62  ;;  %v1555_v62 = vld [vmem:[#allocation9 + $0x2748] sm:$0xff]  ;;  %v1337_v32 = vld [vmem:[#allocation9 + $0x2078] sm:$0xff] }
 0x2c7   :  { %5274 = vmatprep.subr.bf16.mxu1 %v5273_v0  ;;  %v5291_v0 = vpack.c.bf16 %v1296_v30, %v1292_v55  ;;  %v5309_v55 = vpack.c.bf16 %v1337_v32, %v1333_v52  ;;  %v1586_v30 = vld [vmem:[#allocation9 + $0x2840] sm:$0xff] }
 0x2c8   :  { %4696 = vmatpush1.bf16.msra.mxu0 %v4695_v63  ;;  %v1559_v63 = vld [vmem:[#allocation9 + $0x2768] sm:$0xff]  ;;  %v1618_v32 = vld [vmem:[#allocation9 + $0x2940] sm:$0xff] }
 0x2c9   :  { %4698 = vmatprep.subr.bf16.mxu0 %v4697_v19  ;;  %v1300_v19 = vld [vmem:[#allocation9 + $0x1f50] sm:$0xff]  ;;  %v4717_v4 = vpack.c.bf16 %v1559_v63, %v1555_v62  ;;  %v1341_v62 = vld [vmem:[#allocation9 + $0x2098] sm:$0xff] }
 0x2ca   :  { %5276 = vmatpush1.bf16.msra.mxu1 %v5275_v44  ;;  %v1563_v44 = vld [vmem:[#allocation9 + $0x2788] sm:$0xff]  ;;  %v1345_v63 = vld [vmem:[#allocation9 + $0x20b8] sm:$0xff] }
 0x2cb   :  { %5278 = vmatprep.subr.bf16.mxu1 %v5277_v8  ;;  %v5295_v8 = vpack.c.bf16 %v1304_v3, %v1300_v19  ;;  %v4735_v3 = vpack.c.bf16 %v1590_v27, %v1586_v30  ;;  %v1377_v30 = vld [vmem:[#allocation9 + $0x21b8] sm:$0xff] }
 0x2cc   :  { %4700 = vmatpush1.bf16.msra.mxu0 %v4699_v7  ;;  %v1567_v7 = vld [vmem:[#allocation9 + $0x27a8] sm:$0xff] }
 0x2cd   :  { %4702 = vmatprep.subr.bf16.mxu0 %v4701_v15  ;;  %v1308_v15 = vld [vmem:[#allocation9 + $0x1f90] sm:$0xff]  ;;  %v4721_v21 = vpack.c.bf16 %v1567_v7, %v1563_v44  ;;  %v1598_v7 = vld [vmem:[#allocation9 + $0x28a0] sm:$0xff] }
 0x2ce   :  { %5280 = vmatpush1.bf16.msra.mxu1 %v5279_v28  ;;  %v1571_v28 = vld [vmem:[#allocation9 + $0x27c8] sm:$0xff]  ;;  %v4739_v22 = vpack.c.bf16 %v1598_v7, %v1594_v5 }
 0x2cf   :  { %5282 = vmatprep.subr.bf16.mxu1 %v5281_v24  ;;  %v5299_v24 = vpack.c.bf16 %v1312_v18, %v1308_v15  ;;  %v5829_v15 = vld [vmem:[#allocation2 + $0x128] sm:$0xff]  ;;  %v5315_v18 = vpack.c.bf16 %v1344_v35, %v1340_v11 }
 0x2d0   :  { %4704 = vmatpush1.bf16.msra.mxu0 %v4703_v29  ;;  %v1575_v29 = vld [vmem:[#allocation9 + $0x27e8] sm:$0xff] }
 0x2d1   :  { %4706 = vmatprep.subr.bf16.mxu0 %v4705_v10  ;;  %v1316_v10 = vld [vmem:[#allocation9 + $0x1fd0] sm:$0xff]  ;;  %v4725_v36 = vpack.c.bf16 %v1575_v29, %v1571_v28  ;;  %v1635_v5 = vld [vmem:[#allocation9 + $0x29c8] sm:$0xff] }
 0x2d2   :  { %5284 = vmatpush1.bf16.msra.mxu1 %v5283_v40  ;;  %v1579_v40 = vld [vmem:[#allocation9 + $0x2808] sm:$0xff]  ;;  %v1348_v28 = vld [vmem:[#allocation9 + $0x20d0] sm:$0xff] }
 0x2d3   :  { %5286 = vmatprep.subr.bf16.mxu1 %v5285_v17  ;;  %v5303_v17 = vpack.c.bf16 %v1320_v16, %v1316_v10  ;;  %v1352_v29 = vld [vmem:[#allocation9 + $0x20f0] sm:$0xff]  ;;  %v1611_v10 = vld [vmem:[#allocation9 + $0x2908] sm:$0xff] }
 0x2d4   :  { %4708 = vmatpush1.bf16.msra.mxu0 %v4707_v41  ;;  %v1583_v41 = vld [vmem:[#allocation9 + $0x2828] sm:$0xff] }
 0x2d5   :  { %4710 = vmatprep.subr.bf16.mxu0 %v4709_v48  ;;  %v1324_v48 = vld [vmem:[#allocation9 + $0x2010] sm:$0xff]  ;;  %v4729_v34 = vpack.c.bf16 %v1583_v41, %v1579_v40  ;;  %v1615_v16 = vld [vmem:[#allocation9 + $0x2928] sm:$0xff] }
 0x2d6   :  { %5288 = vmatpush1.bf16.msra.mxu1 %v5287_v39  ;;  %v1587_v39 = vld [vmem:[#allocation9 + $0x2848] sm:$0xff]  ;;  %v1356_v40 = vld [vmem:[#allocation9 + $0x2110] sm:$0xff] }
 0x2d7   :  { %5290 = vmatprep.subr.bf16.mxu1 %v5289_v53  ;;  %v5307_v53 = vpack.c.bf16 %v1328_v49, %v1324_v48  ;;  %v1360_v41 = vld [vmem:[#allocation9 + $0x2130] sm:$0xff]  ;;  %v1619_v48 = vld [vmem:[#allocation9 + $0x2948] sm:$0xff] }
 0x2d8   :  { %4712 = vmatpush1.bf16.msra.mxu0 %v4711_v56  ;;  %v1591_v56 = vld [vmem:[#allocation9 + $0x2868] sm:$0xff] }
 0x2d9   :  { %4714 = vmatprep.subr.bf16.mxu0 %v4713_v58  ;;  %v1332_v58 = vld [vmem:[#allocation9 + $0x2050] sm:$0xff]  ;;  %v4733_v60 = vpack.c.bf16 %v1591_v56, %v1587_v39  ;;  %v1623_v49 = vld [vmem:[#allocation9 + $0x2968] sm:$0xff] }
 0x2da   :  { %5292 = vmatpush1.bf16.msra.mxu1 %v5291_v0  ;;  %v5827_v0 = vld [vmem:[#allocation2 + $0x70] sm:$0xff]  ;;  %v5311_v19 = vpack.c.bf16 %v1336_v59, %v1332_v58  ;;  %v1627_v58 = vld [vmem:[#allocation9 + $0x2988] sm:$0xff] }
 0x2db   :  { %5294 = vmatprep.subr.bf16.mxu1 %v5293_v50  ;;  %v1599_v50 = vld [vmem:[#allocation9 + $0x28a8] sm:$0xff]  ;;  %v1364_v39 = vld [vmem:[#allocation9 + $0x2150] sm:$0xff] }
 0x2dc   :  { %4716 = vmatpush1.bf16.msra.mxu0 %v4715_v1  ;;  %v1595_v1 = vld [vmem:[#allocation9 + $0x2888] sm:$0xff]  ;;  %v1368_v56 = vld [vmem:[#allocation9 + $0x2170] sm:$0xff] }
 0x2dd   :  { %4718 = vmatprep.subr.bf16.mxu0 %v4717_v4  ;;  %v5313_v4 = vpack.c.bf16 %v1345_v63, %v1341_v62  ;;  %v4737_v44 = vpack.c.bf16 %v1599_v50, %v1595_v1  ;;  %v1631_v59 = vld [vmem:[#allocation9 + $0x29a8] sm:$0xff]  ;;  %v1626_v63 = vld [vmem:[#allocation9 + $0x2980] sm:$0xff]  ;;  %v1376_v1 = vld [vmem:[#allocation9 + $0x21b0] sm:$0xff] }
 0x2de   :  { %5296 = vmatpush1.bf16.msra.mxu1 %v5295_v8  ;;  %v1349_v8 = vld [vmem:[#allocation9 + $0x20d8] sm:$0xff]  ;;  %v4753_v50 = vpack.c.bf16 %v1631_v59, %v1627_v58  ;;  %v1639_v11 = vld [vmem:[#allocation9 + $0x29e8] sm:$0xff] }
 0x2df   :  { %5298 = vmatprep.subr.bf16.mxu1 %v5297_v12  ;;  %v1603_v12 = vld [vmem:[#allocation9 + $0x28c8] sm:$0xff]  ;;  %v1413_v58 = vld [vmem:[#allocation9 + $0x22d8] sm:$0xff] }
 0x2e0   :  { %4720 = vmatpush1.bf16.msra.mxu0 %v4719_v9  ;;  %v1353_v9 = vld [vmem:[#allocation9 + $0x20f8] sm:$0xff] }
 0x2e1   :  { %4722 = vmatprep.subr.bf16.mxu0 %v4721_v21  ;;  %v6419_v21 = vld [vmem:[#allocation2 + $0xa8] sm:$0xff]  ;;  %v5317_v61 = vpack.c.bf16 %v1353_v9, %v1349_v8  ;;  %v1634_v8 = vld [vmem:[#allocation9 + $0x29c0] sm:$0xff]  ;;  %v1380_v9 = vld [vmem:[#allocation9 + $0x21d0] sm:$0xff] }
 0x2e2   :  { %5300 = vmatpush1.bf16.msra.mxu1 %v5299_v24  ;;  %v4741_v24 = vpack.c.bf16 %v1607_v42, %v1603_v12  ;;  %v1384_v12 = vld [vmem:[#allocation9 + $0x21f0] sm:$0xff]  ;;  %v4757_v42 = vpack.c.bf16 %v1639_v11, %v1635_v5  ;;  %v1417_v59 = vld [vmem:[#allocation9 + $0x22f8] sm:$0xff] }
 0x2e3   :  { %5302 = vmatprep.subr.bf16.mxu1 %v5301_v33  ;;  %v1361_v33 = vld [vmem:[#allocation9 + $0x2138] sm:$0xff] }
 0x2e4   :  { %4724 = vmatpush1.bf16.msra.mxu0 %v4723_v31  ;;  %v1357_v31 = vld [vmem:[#allocation9 + $0x2118] sm:$0xff] }
 0x2e5   :  { %4726 = vmatprep.subr.bf16.mxu0 %v4725_v36  ;;  %v5319_v36 = vpack.c.bf16 %v1352_v29, %v1348_v28  ;;  %v5321_v20 = vpack.c.bf16 %v1361_v33, %v1357_v31  ;;  %v5335_v28 = vpack.c.bf16 %v1384_v12, %v1380_v9  ;;  %v1388_v31 = vld [vmem:[#allocation9 + $0x2210] sm:$0xff]  ;;  %v1421_v5 = vld [vmem:[#allocation9 + $0x2318] sm:$0xff]  ;;  %v1674_v12 = vld [vmem:[#allocation9 + $0x2b00] sm:$0xff] }
 0x2e6   :  { %5304 = vmatpush1.bf16.msra.mxu1 %v5303_v17  ;;  %v4745_v17 = vpack.c.bf16 %v1615_v16, %v1611_v10  ;;  %v1392_v33 = vld [vmem:[#allocation9 + $0x2230] sm:$0xff]  ;;  %v1646_v10 = vld [vmem:[#allocation9 + $0x2a20] sm:$0xff]  ;;  %v1397_v16 = vld [vmem:[#allocation9 + $0x2258] sm:$0xff] }
 0x2e7   :  { %5306 = vmatprep.subr.bf16.mxu1 %v5305_v45  ;;  %v1365_v45 = vld [vmem:[#allocation9 + $0x2158] sm:$0xff] }
 0x2e8   :  { %4728 = vmatpush1.bf16.msra.mxu0 %v4727_v43  ;;  %v1614_v43 = vld [vmem:[#allocation9 + $0x2920] sm:$0xff]  ;;  %v5325_v52 = vpack.c.bf16 %v1369_v47, %v1365_v45  ;;  %v1425_v11 = vld [vmem:[#allocation9 + $0x2338] sm:$0xff] }
 0x2e9   :  { %4730 = vmatprep.subr.bf16.mxu0 %v4729_v34  ;;  %3179 = vmatmul.mubr.f32.vlgmr.msra.gmra.mrb[4].mxu1 %v5827_v0  ;;  %v5323_v34 = vpack.c.bf16 %v1360_v41, %v1356_v40  ;;  %v4747_v51 = vpack.c.bf16 %v1614_v43, %v1610_v14  ;;  %v1372_v0 = vld [vmem:[#allocation9 + $0x2190] sm:$0xff]  ;;  %v1650_v41 = vld [vmem:[#allocation9 + $0x2a40] sm:$0xff]  ;;  %v5353_v9 = vpack.c.bf16 %v1425_v11, %v1421_v5 }
 0x2ea   :  { %5308 = vmatpush1.bf16.msra.mxu1 %v5307_v53  ;;  %3184 = vmatprep.mubr.f32.mxu1 %v5829_v15  ;;  %v4749_v53 = vpack.c.bf16 %v1623_v49, %v1619_v48  ;;  %v5331_v35 = vpack.c.bf16 %v1376_v1, %v1372_v0  ;;  %v1638_v15 = vld [vmem:[#allocation9 + $0x29e0] sm:$0xff]  ;;  %v1400_v43 = vld [vmem:[#allocation9 + $0x2270] sm:$0xff]  ;;  %v1405_v48 = vld [vmem:[#allocation9 + $0x2298] sm:$0xff]  ;;  %v5349_v0 = vpack.c.bf16 %v1417_v59, %v1413_v58 }
 0x2eb   :  { %2486 = vmatmul.mubr.f32.vlgmr.msra.gmra.mrb[0].mxu0 %v6414_v25  ;;  %5310 = vmatprep.subr.bf16.mxu1 %v5309_v55  ;;  %v1373_v55 = vld [vmem:[#allocation9 + $0x2198] sm:$0xff]  ;;  %v4759_v29 = vpack.c.bf16 %v1638_v15, %v1634_v8  ;;  %v1654_v47 = vld [vmem:[#allocation9 + $0x2a60] sm:$0xff]  ;;  %v1424_v15 = vld [vmem:[#allocation9 + $0x2330] sm:$0xff] }
 0x2ec   :  { %4732 = vmatpush1.bf16.msra.mxu0 %v4731_v54  ;;  %2491 = vmatprep.mubr.f32.mxu0 %v6404_v13  ;;  %v1606_v13 = vld [vmem:[#allocation9 + $0x28e0] sm:$0xff]  ;;  %v5329_v62 = vpack.c.bf16 %v1377_v30, %v1373_v55  ;;  %v1409_v49 = vld [vmem:[#allocation9 + $0x22b8] sm:$0xff]  ;;  %v1460_v11 = vld [vmem:[#allocation9 + $0x2450] sm:$0xff] }
 0x2ed   :  { %4734 = vmatprep.subr.bf16.mxu0 %v4733_v60  ;;  %3185 = vmatmul.mubr.f32.gmra.mrb[6].mxu1 %v5830_v23  ;;  %v4743_v37 = vpack.c.bf16 %v1606_v13, %v1602_v26  ;;  %v1622_v54 = vld [vmem:[#allocation9 + $0x2960] sm:$0xff]  ;;  %v5327_v60 = vpack.c.bf16 %v1368_v56, %v1364_v39  ;;  %v1647_v26 = vld [vmem:[#allocation9 + $0x2a28] sm:$0xff]  ;;  %v5345_v39 = vpack.c.bf16 %v1409_v49, %v1405_v48 }
 0x2ee   :  { %5312 = vmatpush1.bf16.msra.mxu1 %v5311_v19  ;;  %v4751_v27 = vpack.c.bf16 %v1622_v54, %v1618_v32  ;;  %v1630_v19 = vld [vmem:[#allocation9 + $0x29a0] sm:$0xff]  ;;  %v4767_v32 = vpack.c.bf16 %v1654_v47, %v1650_v41  ;;  %v1408_v54 = vld [vmem:[#allocation9 + $0x22b0] sm:$0xff] }
 0x2ef   :  { %2492 = vmatmul.mubr.f32.gmra.mrb[2].mxu0 %v6406_v57  ;;  %5314 = vmatprep.subr.bf16.mxu1 %v5313_v4  ;;  %v5831_v57 = vld [vmem:[#allocation2 + $0x88] sm:$0xff]  ;;  %v1385_v4 = vld [vmem:[#allocation9 + $0x21f8] sm:$0xff]  ;;  %v1642_v13 = vld [vmem:[#allocation9 + $0x2a00] sm:$0xff] }
 0x2f0   :  { %4736 = vmatpush1.bf16.msra.mxu0 %v4735_v3  ;;  %2562 = vmatprep.mubr.f32.mxu0 %v6419_v21  ;;  %v1381_v3 = vld [vmem:[#allocation9 + $0x21d8] sm:$0xff]  ;;  %v4763_v14 = vpack.c.bf16 %v1646_v10, %v1642_v13  ;;  %v1658_v56 = vld [vmem:[#allocation9 + $0x2a80] sm:$0xff]  ;;  %v1432_v10 = vld [vmem:[#allocation9 + $0x2370] sm:$0xff] }
 0x2f1   :  { %4738 = vmatprep.subr.bf16.mxu0 %v4737_v44  ;;  %3255 = vmatprep.mubr.f32.mxu1 %v5831_v57  ;;  %v4755_v44 = vpack.c.bf16 %v1630_v19, %v1626_v63  ;;  %v5333_v7 = vpack.c.bf16 %v1385_v4, %v1381_v3  ;;  %v1401_v57 = vld [vmem:[#allocation9 + $0x2278] sm:$0xff]  ;;  %v1662_v30 = vld [vmem:[#allocation9 + $0x2aa0] sm:$0xff]  ;;  %v1416_v19 = vld [vmem:[#allocation9 + $0x22f0] sm:$0xff] }
 0x2f2   :  { %5316 = vmatpush1.bf16.msra.mxu1 %v5315_v18  ;;  %v1389_v18 = vld [vmem:[#allocation9 + $0x2218] sm:$0xff]  ;;  %v5341_v40 = vpack.c.bf16 %v1401_v57, %v1397_v16  ;;  %v4771_v63 = vpack.c.bf16 %v1662_v30, %v1658_v56  ;;  %v1666_v1 = vld [vmem:[#allocation9 + $0x2ac0] sm:$0xff]  ;;  %v1440_v47 = vld [vmem:[#allocation9 + $0x23b0] sm:$0xff] }
 0x2f3   :  { %5318 = vmatprep.subr.bf16.mxu1 %v5317_v61  ;;  %v1643_v61 = vld [vmem:[#allocation9 + $0x2a08] sm:$0xff]  ;;  %v1670_v4 = vld [vmem:[#allocation9 + $0x2ae0] sm:$0xff]  ;;  %v1448_v30 = vld [vmem:[#allocation9 + $0x23f0] sm:$0xff] }
 0x2f4   :  { %4740 = vmatpush1.bf16.msra.mxu0 %v4739_v22  ;;  %v1393_v22 = vld [vmem:[#allocation9 + $0x2238] sm:$0xff]  ;;  %v4761_v23 = vpack.c.bf16 %v1647_v26, %v1643_v61  ;;  %v4775_v8 = vpack.c.bf16 %v1670_v4, %v1666_v1  ;;  %v1686_v57 = vld [vmem:[#allocation9 + $0x2b60] sm:$0xff]  ;;  %v1452_v1 = vld [vmem:[#allocation9 + $0x2410] sm:$0xff] }
 0x2f5   :  { %4742 = vmatprep.subr.bf16.mxu0 %v4741_v24  ;;  %v5337_v24 = vpack.c.bf16 %v1393_v22, %v1389_v18  ;;  %v1678_v22 = vld [vmem:[#allocation9 + $0x2b20] sm:$0xff]  ;;  %v1429_v61 = vld [vmem:[#allocation9 + $0x2358] sm:$0xff] }
 0x2f6   :  { %5320 = vmatpush1.bf16.msra.mxu1 %v5319_v36  ;;  %v1651_v36 = vld [vmem:[#allocation9 + $0x2a48] sm:$0xff]  ;;  %v1433_v26 = vld [vmem:[#allocation9 + $0x2378] sm:$0xff]  ;;  %v4779_v13 = vpack.c.bf16 %v1678_v22, %v1674_v12  ;;  %v1694_v49 = vld [vmem:[#allocation9 + $0x2ba0] sm:$0xff] }
 0x2f7   :  { %5322 = vmatprep.subr.bf16.mxu1 %v5321_v20  ;;  %v5339_v20 = vpack.c.bf16 %v1392_v33, %v1388_v31  ;;  %v5357_v31 = vpack.c.bf16 %v1433_v26, %v1429_v61  ;;  %v1682_v33 = vld [vmem:[#allocation9 + $0x2b40] sm:$0xff]  ;;  %v1472_v22 = vld [vmem:[#allocation9 + $0x24b0] sm:$0xff]  ;;  %v1477_v61 = vld [vmem:[#allocation9 + $0x24d8] sm:$0xff] }
 0x2f8   :  { %4744 = vmatpush1.bf16.msra.mxu0 %v4743_v37  ;;  %v1655_v37 = vld [vmem:[#allocation9 + $0x2a68] sm:$0xff]  ;;  %v4783_v41 = vpack.c.bf16 %v1686_v57, %v1682_v33  ;;  %v1702_v59 = vld [vmem:[#allocation9 + $0x2be0] sm:$0xff]  ;;  %v1481_v26 = vld [vmem:[#allocation9 + $0x24f8] sm:$0xff] }
 0x2f9   :  { %4746 = vmatprep.subr.bf16.mxu0 %v4745_v17  ;;  %v1396_v17 = vld [vmem:[#allocation9 + $0x2250] sm:$0xff]  ;;  %v4765_v45 = vpack.c.bf16 %v1655_v37, %v1651_v36  ;;  %v1437_v36 = vld [vmem:[#allocation9 + $0x2398] sm:$0xff]  ;;  %v6424_v12 = vld [vmem:[#allocation2 + $0xa0] sm:$0xff] }
 0x2fa   :  { %5324 = vmatpush1.bf16.msra.mxu1 %v5323_v34  ;;  %v1659_v34 = vld [vmem:[#allocation9 + $0x2a88] sm:$0xff]  ;;  %v1441_v37 = vld [vmem:[#allocation9 + $0x23b8] sm:$0xff] }
 0x2fb   :  { %5326 = vmatprep.subr.bf16.mxu1 %v5325_v52  ;;  %v5343_v52 = vpack.c.bf16 %v1400_v43, %v1396_v17  ;;  %v5361_v17 = vpack.c.bf16 %v1441_v37, %v1437_v36  ;;  %v1690_v43 = vld [vmem:[#allocation9 + $0x2b80] sm:$0xff]  ;;  %v3449_v36 = vld [vmem:[#allocation12 + $0x10] sm:$0xff]  ;;  %v3452_v37 = vld [vmem:[#allocation12 + $0x28] sm:$0xff] }
 0x2fc   :  { %4748 = vmatpush1.bf16.msra.mxu0 %v4747_v51  ;;  %v1663_v51 = vld [vmem:[#allocation9 + $0x2aa8] sm:$0xff]  ;;  %v4787_v56 = vpack.c.bf16 %v1694_v49, %v1690_v43  ;;  %v3450_v33 = vld [vmem:[#allocation12 + $0x18] sm:$0xff] }
 0x2fd   :  { %4750 = vmatprep.subr.bf16.mxu0 %v4749_v53  ;;  %v1404_v53 = vld [vmem:[#allocation9 + $0x2290] sm:$0xff]  ;;  %v4769_v55 = vpack.c.bf16 %v1663_v51, %v1659_v34  ;;  %v1445_v34 = vld [vmem:[#allocation9 + $0x23d8] sm:$0xff]  ;;  %v3451_v43 = vld [vmem:[#allocation12 + $0x20] sm:$0xff] }
 0x2fe   :  { %5328 = vmatpush1.bf16.msra.mxu1 %v5327_v60  ;;  %v1667_v60 = vld [vmem:[#allocation9 + $0x2ac8] sm:$0xff]  ;;  %v1449_v51 = vld [vmem:[#allocation9 + $0x23f8] sm:$0xff] }
 0x2ff   :  { %5330 = vmatprep.subr.bf16.mxu1 %v5329_v62  ;;  %v5347_v62 = vpack.c.bf16 %v1408_v54, %v1404_v53  ;;  %v5365_v53 = vpack.c.bf16 %v1449_v51, %v1445_v34  ;;  %v1698_v54 = vld [vmem:[#allocation9 + $0x2bc0] sm:$0xff]  ;;  %v1489_v49 = vld [vmem:[#allocation9 + $0x2538] sm:$0xff] }
 0x300   :  { %4752 = vmatpush1.bf16.msra.mxu0 %v4751_v27  ;;  %v1671_v27 = vld [vmem:[#allocation9 + $0x2ae8] sm:$0xff]  ;;  %v3458_v34 = vld [vmem:[#allocation12 + $0x58] sm:$0xff] }
 0x301   :  { %4754 = vmatprep.subr.bf16.mxu0 %v4753_v50  ;;  %v1412_v50 = vld [vmem:[#allocation9 + $0x22d0] sm:$0xff]  ;;  %v4773_v3 = vpack.c.bf16 %v1671_v27, %v1667_v60  ;;  %v1453_v60 = vld [vmem:[#allocation9 + $0x2418] sm:$0xff] }
 0x302   :  { %5332 = vmatpush1.bf16.msra.mxu1 %v5331_v35  ;;  %v1675_v35 = vld [vmem:[#allocation9 + $0x2b08] sm:$0xff]  ;;  %v1457_v27 = vld [vmem:[#allocation9 + $0x2438] sm:$0xff] }
 0x303   :  { %5334 = vmatprep.subr.bf16.mxu1 %v5333_v7  ;;  %v5351_v7 = vpack.c.bf16 %v1416_v19, %v1412_v50  ;;  %v1456_v50 = vld [vmem:[#allocation9 + $0x2430] sm:$0xff]  ;;  %v1461_v19 = vld [vmem:[#allocation9 + $0x2458] sm:$0xff] }
 0x304   :  { %4756 = vmatpush1.bf16.msra.mxu0 %v4755_v44  ;;  %v1679_v44 = vld [vmem:[#allocation9 + $0x2b28] sm:$0xff]  ;;  %v5371_v4 = vpack.c.bf16 %v1456_v50, %v1452_v1  ;;  %v3461_v50 = vld [vmem:[#allocation12 + $0x70] sm:$0xff] }
 0x305   :  { %4758 = vmatprep.subr.bf16.mxu0 %v4757_v42  ;;  %v1420_v42 = vld [vmem:[#allocation9 + $0x2310] sm:$0xff]  ;;  %v4777_v18 = vpack.c.bf16 %v1679_v44, %v1675_v35  ;;  %v6422_v44 = vld [vmem:[#allocation2 + $0x158] sm:$0xff]  ;;  %v3459_v1 = vld [vmem:[#allocation12 + $0x60] sm:$0xff] }
 0x306   :  { %5336 = vmatpush1.bf16.msra.mxu1 %v5335_v28  ;;  %v1683_v28 = vld [vmem:[#allocation9 + $0x2b48] sm:$0xff]  ;;  %v1464_v35 = vld [vmem:[#allocation9 + $0x2470] sm:$0xff] }
 0x307   :  { %5338 = vmatprep.subr.bf16.mxu1 %v5337_v24  ;;  %v5355_v24 = vpack.c.bf16 %v1424_v15, %v1420_v42  ;;  %v5375_v42 = vpack.c.bf16 %v1464_v35, %v1460_v11  ;;  %v1501_v11 = vld [vmem:[#allocation9 + $0x2598] sm:$0xff] }
 0x308   :  { %4760 = vmatpush1.bf16.msra.mxu0 %v4759_v29  ;;  %v1687_v29 = vld [vmem:[#allocation9 + $0x2b68] sm:$0xff]  ;;  %v1505_v35 = vld [vmem:[#allocation9 + $0x25b8] sm:$0xff] }
 0x309   :  { %4762 = vmatprep.subr.bf16.mxu0 %v4761_v23  ;;  %v1428_v23 = vld [vmem:[#allocation9 + $0x2350] sm:$0xff]  ;;  %v4781_v16 = vpack.c.bf16 %v1687_v29, %v1683_v28  ;;  %v5834_v28 = vld [vmem:[#allocation2 + $0x138] sm:$0xff] }
 0x30a   :  { %5340 = vmatpush1.bf16.msra.mxu1 %v5339_v20  ;;  %v1691_v20 = vld [vmem:[#allocation9 + $0x2b88] sm:$0xff]  ;;  %v1476_v29 = vld [vmem:[#allocation9 + $0x24d0] sm:$0xff] }
 0x30b   :  { %5342 = vmatprep.subr.bf16.mxu1 %v5341_v40  ;;  %v5359_v40 = vpack.c.bf16 %v1432_v10, %v1428_v23  ;;  %v3447_v23 = vld [vmem:[#allocation12] sm:$0xff]  ;;  %v6428_v10 = vld [vmem:[#allocation2 + $0x150] sm:$0xff] }
 0x30c   :  { %4764 = vmatpush1.bf16.msra.mxu0 %v4763_v14  ;;  %v1695_v14 = vld [vmem:[#allocation9 + $0x2ba8] sm:$0xff] }
 0x30d   :  { %4766 = vmatprep.subr.bf16.mxu0 %v4765_v45  ;;  %v1436_v45 = vld [vmem:[#allocation9 + $0x2390] sm:$0xff]  ;;  %v4785_v48 = vpack.c.bf16 %v1695_v14, %v1691_v20  ;;  %v3454_v20 = vld [vmem:[#allocation12 + $0x38] sm:$0xff]  ;;  %v5381_v14 = vpack.c.bf16 %v1481_v26, %v1477_v61 }
 0x30e   :  { %5344 = vmatpush1.bf16.msra.mxu1 %v5343_v52  ;;  %v1699_v52 = vld [vmem:[#allocation9 + $0x2bc8] sm:$0xff]  ;;  %v1504_v61 = vld [vmem:[#allocation9 + $0x25b0] sm:$0xff] }
 0x30f   :  { %5346 = vmatprep.subr.bf16.mxu1 %v5345_v39  ;;  %v5363_v39 = vpack.c.bf16 %v1440_v47, %v1436_v45  ;;  %v3453_v45 = vld [vmem:[#allocation12 + $0x30] sm:$0xff]  ;;  %v3456_v47 = vld [vmem:[#allocation12 + $0x48] sm:$0xff] }
 0x310   :  { %4768 = vmatpush1.bf16.msra.mxu0 %v4767_v32  ;;  %v1703_v32 = vld [vmem:[#allocation9 + $0x2be8] sm:$0xff]  ;;  %v5503_v51 = vpack.c.bf16 %v3453_v45, %v3451_v43  ;;  %v1516_v45 = vld [vmem:[#allocation9 + $0x2610] sm:$0xff] }
 0x311   :  { %4770 = vmatprep.subr.bf16.mxu0 %v4769_v55  ;;  %v1444_v55 = vld [vmem:[#allocation9 + $0x23d0] sm:$0xff]  ;;  %v4789_v58 = vpack.c.bf16 %v1703_v32, %v1699_v52 }
 0x312   :  { %5348 = vmatpush1.bf16.msra.mxu1 %v5347_v62  ;;  %v5367_v62 = vpack.c.bf16 %v1448_v30, %v1444_v55  ;;  %v1484_v32 = vld [vmem:[#allocation9 + $0x2510] sm:$0xff] }
 0x313   :  { %5350 = vmatprep.subr.bf16.mxu1 %v5349_v0  ;;  %v5369_v0 = vpack.c.bf16 %v1457_v27, %v1453_v60  ;;  %v1488_v55 = vld [vmem:[#allocation9 + $0x2530] sm:$0xff]  ;;  %v1497_v60 = vld [vmem:[#allocation9 + $0x2578] sm:$0xff] }
 0x314   :  { %4772 = vmatpush1.bf16.msra.mxu0 %v4771_v63  ;;  %v4791_v63 = vpack.c.bf16 %v1702_v59, %v1698_v54  ;;  %v3460_v30 = vld [vmem:[#allocation12 + $0x68] sm:$0xff]  ;;  %v1493_v59 = vld [vmem:[#allocation9 + $0x2558] sm:$0xff] }
 0x315   :  { %4774 = vmatprep.subr.bf16.mxu0 %v4773_v3  ;;  %v1465_v3 = vld [vmem:[#allocation9 + $0x2478] sm:$0xff]  ;;  %v3468_v26 = vld [vmem:[#allocation12 + $0xa8] sm:$0xff] }
 0x316   :  { %5352 = vmatpush1.bf16.msra.mxu1 %v5351_v7  ;;  %v5373_v5 = vpack.c.bf16 %v1465_v3, %v1461_v19  ;;  %v1469_v7 = vld [vmem:[#allocation9 + $0x2498] sm:$0xff]  ;;  %v5389_v19 = vpack.c.bf16 %v1497_v60, %v1493_v59  ;;  %v1496_v3 = vld [vmem:[#allocation9 + $0x2570] sm:$0xff] }
 0x317   :  { %5354 = vmatprep.subr.bf16.mxu1 %v5353_v9  ;;  %v5832_v9 = vld [vmem:[#allocation2 + $0x80] sm:$0xff]  ;;  %v3477_v59 = vld [vmem:[#allocation12 + $0xf0] sm:$0xff] }
 0x318   :  { %4776 = vmatpush1.bf16.msra.mxu0 %v4775_v8  ;;  %v1473_v8 = vld [vmem:[#allocation9 + $0x24b8] sm:$0xff] }
 0x319   :  { %4778 = vmatprep.subr.bf16.mxu0 %v4777_v18  ;;  %v5377_v15 = vpack.c.bf16 %v1473_v8, %v1469_v7  ;;  %v1468_v18 = vld [vmem:[#allocation9 + $0x2490] sm:$0xff]  ;;  %v5511_v7 = vpack.c.bf16 %v3461_v50, %v3459_v1  ;;  %v1537_v1 = vld [vmem:[#allocation9 + $0x26b8] sm:$0xff] }
 0x31a   :  { %5356 = vmatpush1.bf16.msra.mxu1 %v5355_v24  ;;  %v1480_v24 = vld [vmem:[#allocation9 + $0x24f0] sm:$0xff] }
 0x31b   :  { %5358 = vmatprep.subr.bf16.mxu1 %v5357_v31  ;;  %v3448_v31 = vld [vmem:[#allocation12 + $0x8] sm:$0xff]  ;;  %v5383_v52 = vpack.c.bf16 %v1480_v24, %v1476_v29  ;;  %v1509_v29 = vld [vmem:[#allocation9 + $0x25d8] sm:$0xff] }
 0x31c   :  { %4780 = vmatpush1.bf16.msra.mxu0 %v4779_v13  ;;  %v5835_v13 = vld [vmem:[#allocation2 + $0x130] sm:$0xff]  ;;  %v5497_v57 = vpack.c.bf16 %v3450_v33, %v3448_v31  ;;  %v1513_v24 = vld [vmem:[#allocation9 + $0x25f8] sm:$0xff] }
 0x31d   :  { %4782 = vmatprep.subr.bf16.mxu0 %v4781_v16  ;;  %v5379_v16 = vpack.c.bf16 %v1472_v22, %v1468_v18  ;;  %v3465_v18 = vld [vmem:[#allocation12 + $0x90] sm:$0xff]  ;;  %v5393_v22 = vpack.c.bf16 %v1505_v35, %v1501_v11 }
 0x31e   :  { %5360 = vmatpush1.bf16.msra.mxu1 %v5359_v40  ;;  %v5837_v40 = vld [vmem:[#allocation2 + $0x98] sm:$0xff]  ;;  %v1508_v33 = vld [vmem:[#allocation9 + $0x25d0] sm:$0xff] }
 0x31f   :  { %5362 = vmatprep.subr.bf16.mxu1 %v5361_v17  ;;  %v5501_v17 = vpack.c.bf16 %v3454_v20, %v3452_v37  ;;  %v1512_v37 = vld [vmem:[#allocation9 + $0x25f0] sm:$0xff] }
 0x320   :  { %4784 = vmatpush1.bf16.msra.mxu0 %v4783_v41  ;;  %v5499_v41 = vpack.c.bf16 %v3449_v36, %v3447_v23  ;;  %v5397_v36 = vpack.c.bf16 %v1513_v24, %v1509_v29  ;;  %v3472_v20 = vld [vmem:[#allocation12 + $0xc8] sm:$0xff]  ;;  %v5399_v43 = vpack.c.bf16 %v1512_v37, %v1508_v33  ;;  %v3481_v11 = vld [vmem:[#allocation12 + $0x110] sm:$0xff]  ;;  %v3490_v33 = vld [vmem:[#allocation12 + $0x158] sm:$0xff] }
 0x321   :  { %4786 = vmatprep.subr.bf16.mxu0 %v4785_v48  ;;  %v1485_v48 = vld [vmem:[#allocation9 + $0x2518] sm:$0xff]  ;;  %v1548_v37 = vld [vmem:[#allocation9 + $0x2710] sm:$0xff] }
 0x322   :  { %5364 = vmatpush1.bf16.msra.mxu1 %v5363_v39  ;;  %v5505_v39 = vpack.c.bf16 %v3458_v34, %v3456_v47  ;;  %v5385_v54 = vpack.c.bf16 %v1489_v49, %v1485_v48  ;;  %v3471_v48 = vld [vmem:[#allocation12 + $0xc0] sm:$0xff]  ;;  %v3473_v49 = vld [vmem:[#allocation12 + $0xd0] sm:$0xff] }
 0x323   :  { %5366 = vmatprep.subr.bf16.mxu1 %v5365_v53  ;;  %v3457_v53 = vld [vmem:[#allocation12 + $0x50] sm:$0xff] }
 0x324   :  { %4788 = vmatpush1.bf16.msra.mxu0 %v4787_v56  ;;  %v3455_v56 = vld [vmem:[#allocation12 + $0x40] sm:$0xff]  ;;  %v3485_v29 = vld [vmem:[#allocation12 + $0x130] sm:$0xff] }
 0x325   :  { %4790 = vmatprep.subr.bf16.mxu0 %v4789_v58  ;;  %v3462_v58 = vld [vmem:[#allocation12 + $0x78] sm:$0xff]  ;;  %v5507_v27 = vpack.c.bf16 %v3457_v53, %v3455_v56  ;;  %v5523_v53 = vpack.c.bf16 %v3473_v49, %v3471_v48 }
 0x326   :  { %5368 = vmatpush1.bf16.msra.mxu1 %v5367_v62  ;;  %v5387_v62 = vpack.c.bf16 %v1488_v55, %v1484_v32  ;;  %v3478_v32 = vld [vmem:[#allocation12 + $0xf8] sm:$0xff]  ;;  %v1524_v55 = vld [vmem:[#allocation9 + $0x2650] sm:$0xff] }
 0x327   :  { %5370 = vmatprep.subr.bf16.mxu1 %v5369_v0  ;;  %v5509_v0 = vpack.c.bf16 %v3462_v58, %v3460_v30  ;;  %v1529_v56 = vld [vmem:[#allocation9 + $0x2678] sm:$0xff]  ;;  %v3475_v58 = vld [vmem:[#allocation12 + $0xe0] sm:$0xff] }
 0x328   :  { %4792 = vmatpush1.bf16.msra.mxu0 %v4791_v63  ;;  %v1492_v63 = vld [vmem:[#allocation9 + $0x2550] sm:$0xff]  ;;  %v5527_v50 = vpack.c.bf16 %v3477_v59, %v3475_v58  ;;  %v1561_v48 = vld [vmem:[#allocation9 + $0x2778] sm:$0xff] }
 0x329   :  { %3256 = vmatmul.mubr.f32.vlgmr.msra.gmra.mrb[4].mxu1 %v5832_v9  ;;  %5498 = vmatprep.subr.bf16.mxu0 %v5497_v57  ;;  %v5391_v8 = vpack.c.bf16 %v1496_v3, %v1492_v63  ;;  %v1500_v9 = vld [vmem:[#allocation9 + $0x2590] sm:$0xff]  ;;  %v3482_v63 = vld [vmem:[#allocation12 + $0x118] sm:$0xff] }
 0x32a   :  { %5372 = vmatpush1.bf16.msra.mxu1 %v5371_v4  ;;  %3261 = vmatprep.mubr.f32.mxu1 %v5834_v28  ;;  %v3464_v4 = vld [vmem:[#allocation12 + $0x88] sm:$0xff]  ;;  %v3470_v28 = vld [vmem:[#allocation12 + $0xb8] sm:$0xff]  ;;  %v5395_v31 = vpack.c.bf16 %v1504_v61, %v1500_v9  ;;  %v3469_v57 = vld [vmem:[#allocation12 + $0xb0] sm:$0xff] }
 0x32b   :  { %2563 = vmatmul.mubr.f32.vlgmr.msra.gmra.mrb[0].mxu0 %v6424_v12  ;;  %5374 = vmatprep.subr.bf16.mxu1 %v5373_v5  ;;  %v3466_v5 = vld [vmem:[#allocation12 + $0x98] sm:$0xff]  ;;  %v5517_v23 = vpack.c.bf16 %v3470_v28, %v3468_v26  ;;  %v1532_v3 = vld [vmem:[#allocation9 + $0x2690] sm:$0xff]  ;;  %v3483_v28 = vld [vmem:[#allocation12 + $0x120] sm:$0xff] }
 0x32c   :  { %2568 = vmatprep.mubr.f32.mxu0 %v6422_v44  ;;  %5500 = vmatpush1.bf16.msra.mxu0 %v5499_v41  ;;  %v1521_v41 = vld [vmem:[#allocation9 + $0x2638] sm:$0xff]  ;;  %v1540_v61 = vld [vmem:[#allocation9 + $0x26d0] sm:$0xff] }
 0x32d   :  { %3262 = vmatmul.mubr.f32.gmra.mrb[6].mxu1 %v5835_v13  ;;  %5502 = vmatprep.subr.bf16.mxu0 %v5501_v17  ;;  %v3486_v9 = vld [vmem:[#allocation12 + $0x138] sm:$0xff] }
 0x32e   :  { %5376 = vmatpush1.bf16.msra.mxu1 %v5375_v42  ;;  %3332 = vmatprep.mubr.f32.mxu1 %v5837_v40  ;;  %v5513_v42 = vpack.c.bf16 %v3466_v5, %v3464_v4  ;;  %v1517_v40 = vld [vmem:[#allocation9 + $0x2618] sm:$0xff]  ;;  %v3479_v5 = vld [vmem:[#allocation12 + $0x100] sm:$0xff] }
 0x32f   :  { %2569 = vmatmul.mubr.f32.gmra.mrb[2].mxu0 %v6428_v10  ;;  %5378 = vmatprep.subr.bf16.mxu1 %v5377_v15  ;;  %v3463_v15 = vld [vmem:[#allocation12 + $0x80] sm:$0xff]  ;;  %v5401_v34 = vpack.c.bf16 %v1521_v41, %v1517_v40  ;;  %v3489_v40 = vld [vmem:[#allocation12 + $0x150] sm:$0xff] }
 0x330   :  { %5504 = vmatpush1.bf16.msra.mxu0 %v5503_v51  ;;  %v5515_v13 = vpack.c.bf16 %v3465_v18, %v3463_v15  ;;  %v1520_v51 = vld [vmem:[#allocation9 + $0x2630] sm:$0xff]  ;;  %v1545_v15 = vld [vmem:[#allocation9 + $0x26f8] sm:$0xff]  ;;  %v5531_v18 = vpack.c.bf16 %v3481_v11, %v3479_v5 }
 0x331   :  { %5506 = vmatprep.subr.bf16.mxu0 %v5505_v39  ;;  %v1525_v39 = vld [vmem:[#allocation9 + $0x2658] sm:$0xff] }
 0x332   :  { %5380 = vmatpush1.bf16.msra.mxu1 %v5379_v16  ;;  %v3467_v16 = vld [vmem:[#allocation12 + $0xa0] sm:$0xff]  ;;  %v5405_v60 = vpack.c.bf16 %v1529_v56, %v1525_v39  ;;  %v3493_v39 = vld [vmem:[#allocation12 + $0x170] sm:$0xff] }
 0x333   :  { %5382 = vmatprep.subr.bf16.mxu1 %v5381_v14  ;;  %v3474_v14 = vld [vmem:[#allocation12 + $0xd8] sm:$0xff]  ;;  %v5519_v17 = vpack.c.bf16 %v3469_v57, %v3467_v16  ;;  %v5535_v57 = vpack.c.bf16 %v3485_v29, %v3483_v28 }
 0x334   :  { %5508 = vmatpush1.bf16.msra.mxu0 %v5507_v27  ;;  %v5521_v47 = vpack.c.bf16 %v3474_v14, %v3472_v20  ;;  %v1528_v27 = vld [vmem:[#allocation9 + $0x2670] sm:$0xff]  ;;  %v1553_v16 = vld [vmem:[#allocation9 + $0x2738] sm:$0xff]  ;;  %v3487_v14 = vld [vmem:[#allocation12 + $0x140] sm:$0xff] }
 0x335   :  { %5510 = vmatprep.subr.bf16.mxu0 %v5509_v0  ;;  %v1533_v0 = vld [vmem:[#allocation9 + $0x2698] sm:$0xff]  ;;  %v5539_v49 = vpack.c.bf16 %v3489_v40, %v3487_v14  ;;  %v5838_v40 = vld [vmem:[#allocation2 + $0x148] sm:$0xff] }
 0x336   :  { %5384 = vmatpush1.bf16.msra.mxu1 %v5383_v52  ;;  %v3476_v52 = vld [vmem:[#allocation12 + $0xe8] sm:$0xff]  ;;  %v5409_v35 = vpack.c.bf16 %v1537_v1, %v1533_v0  ;;  %v1569_v58 = vld [vmem:[#allocation9 + $0x27b8] sm:$0xff] }
 0x337   :  { %5386 = vmatprep.subr.bf16.mxu1 %v5385_v54  ;;  %v5403_v54 = vpack.c.bf16 %v1520_v51, %v1516_v45  ;;  %v5525_v30 = vpack.c.bf16 %v3478_v32, %v3476_v52  ;;  %v3494_v45 = vld [vmem:[#allocation12 + $0x178] sm:$0xff]  ;;  %v1556_v51 = vld [vmem:[#allocation9 + $0x2750] sm:$0xff]  ;;  %v3491_v32 = vld [vmem:[#allocation12 + $0x160] sm:$0xff] }
 0x338   :  { %5512 = vmatpush1.bf16.msra.mxu0 %v5511_v7  ;;  %v1536_v7 = vld [vmem:[#allocation9 + $0x26b0] sm:$0xff]  ;;  %v5543_v59 = vpack.c.bf16 %v3493_v39, %v3491_v32  ;;  %v1577_v5 = vld [vmem:[#allocation9 + $0x27f8] sm:$0xff] }
 0x339   :  { %5514 = vmatprep.subr.bf16.mxu0 %v5513_v42  ;;  %v1541_v42 = vld [vmem:[#allocation9 + $0x26d8] sm:$0xff] }
 0x33a   :  { %5388 = vmatpush1.bf16.msra.mxu1 %v5387_v62  ;;  %v3480_v62 = vld [vmem:[#allocation12 + $0x108] sm:$0xff]  ;;  %v5413_v24 = vpack.c.bf16 %v1545_v15, %v1541_v42  ;;  %v3497_v0 = vld [vmem:[#allocation12 + $0x190] sm:$0xff] }
 0x33b   :  { %5390 = vmatprep.subr.bf16.mxu1 %v5389_v19  ;;  %v5407_v19 = vpack.c.bf16 %v1528_v27, %v1524_v55  ;;  %v5529_v4 = vpack.c.bf16 %v3482_v63, %v3480_v62  ;;  %v3498_v55 = vld [vmem:[#allocation12 + $0x198] sm:$0xff]  ;;  %v1564_v27 = vld [vmem:[#allocation9 + $0x2790] sm:$0xff]  ;;  %v3495_v63 = vld [vmem:[#allocation12 + $0x180] sm:$0xff] }
 0x33c   :  { %5516 = vmatpush1.bf16.msra.mxu0 %v5515_v13  ;;  %v1544_v13 = vld [vmem:[#allocation9 + $0x26f0] sm:$0xff]  ;;  %v5547_v11 = vpack.c.bf16 %v3497_v0, %v3495_v63  ;;  %v1617_v32 = vld [vmem:[#allocation9 + $0x2938] sm:$0xff] }
 0x33d   :  { %5518 = vmatprep.subr.bf16.mxu0 %v5517_v23  ;;  %v1549_v23 = vld [vmem:[#allocation9 + $0x2718] sm:$0xff]  ;;  %v1572_v15 = vld [vmem:[#allocation9 + $0x27d0] sm:$0xff] }
 0x33e   :  { %5392 = vmatpush1.bf16.msra.mxu1 %v5391_v8  ;;  %v3484_v8 = vld [vmem:[#allocation12 + $0x128] sm:$0xff]  ;;  %v5417_v41 = vpack.c.bf16 %v1553_v16, %v1549_v23 }
 0x33f   :  { %5394 = vmatprep.subr.bf16.mxu1 %v5393_v22  ;;  %v5411_v22 = vpack.c.bf16 %v1536_v7, %v1532_v3  ;;  %v5533_v26 = vpack.c.bf16 %v3486_v9, %v3484_v8  ;;  %v3502_v3 = vld [vmem:[#allocation12 + $0x1b8] sm:$0xff]  ;;  %v3499_v8 = vld [vmem:[#allocation12 + $0x1a0] sm:$0xff]  ;;  %v3501_v9 = vld [vmem:[#allocation12 + $0x1b0] sm:$0xff] }
 0x340   :  { %5520 = vmatpush1.bf16.msra.mxu0 %v5519_v17  ;;  %v1552_v17 = vld [vmem:[#allocation9 + $0x2730] sm:$0xff] }
 0x341   :  { %5522 = vmatprep.subr.bf16.mxu0 %v5521_v47  ;;  %v1557_v47 = vld [vmem:[#allocation9 + $0x2758] sm:$0xff]  ;;  %v1628_v0 = vld [vmem:[#allocation9 + $0x2990] sm:$0xff] }
 0x342   :  { %5396 = vmatpush1.bf16.msra.mxu1 %v5395_v31  ;;  %v3488_v31 = vld [vmem:[#allocation12 + $0x148] sm:$0xff]  ;;  %v5421_v56 = vpack.c.bf16 %v1561_v48, %v1557_v47  ;;  %v1609_v47 = vld [vmem:[#allocation9 + $0x28f8] sm:$0xff]  ;;  %v5839_v48 = vld [vmem:[#allocation2 + $0x140] sm:$0xff] }
 0x343   :  { %5398 = vmatprep.subr.bf16.mxu1 %v5397_v36  ;;  %v5415_v36 = vpack.c.bf16 %v1544_v13, %v1540_v61  ;;  %v5537_v20 = vpack.c.bf16 %v3490_v33, %v3488_v31  ;;  %v1585_v61 = vld [vmem:[#allocation9 + $0x2838] sm:$0xff]  ;;  %v1584_v13 = vld [vmem:[#allocation9 + $0x2830] sm:$0xff] }
 0x344   :  { %5524 = vmatpush1.bf16.msra.mxu0 %v5523_v53  ;;  %v1560_v53 = vld [vmem:[#allocation9 + $0x2770] sm:$0xff]  ;;  %v1589_v31 = vld [vmem:[#allocation9 + $0x2858] sm:$0xff] }
 0x345   :  { %5526 = vmatprep.subr.bf16.mxu0 %v5525_v30  ;;  %v1565_v30 = vld [vmem:[#allocation9 + $0x2798] sm:$0xff] }
 0x346   :  { %5400 = vmatpush1.bf16.msra.mxu1 %v5399_v43  ;;  %v3492_v43 = vld [vmem:[#allocation12 + $0x168] sm:$0xff]  ;;  %v5425_v1 = vpack.c.bf16 %v1569_v58, %v1565_v30  ;;  %v1593_v33 = vld [vmem:[#allocation9 + $0x2878] sm:$0xff] }
 0x347   :  { %5402 = vmatprep.subr.bf16.mxu1 %v5401_v34  ;;  %v5419_v34 = vpack.c.bf16 %v1552_v17, %v1548_v37  ;;  %v5541_v52 = vpack.c.bf16 %v3494_v45, %v3492_v43  ;;  %v5437_v16 = vpack.c.bf16 %v1593_v33, %v1589_v31  ;;  %v1597_v37 = vld [vmem:[#allocation9 + $0x2898] sm:$0xff]  ;;  %v1596_v17 = vld [vmem:[#allocation9 + $0x2890] sm:$0xff] }
 0x348   :  { %5528 = vmatpush1.bf16.msra.mxu0 %v5527_v50  ;;  %v1568_v50 = vld [vmem:[#allocation9 + $0x27b0] sm:$0xff]  ;;  %v1605_v45 = vld [vmem:[#allocation9 + $0x28d8] sm:$0xff] }
 0x349   :  { %5530 = vmatprep.subr.bf16.mxu0 %v5529_v4  ;;  %v1573_v4 = vld [vmem:[#allocation9 + $0x27d8] sm:$0xff]  ;;  %v1600_v43 = vld [vmem:[#allocation9 + $0x28b0] sm:$0xff] }
 0x34a   :  { %5404 = vmatpush1.bf16.msra.mxu1 %v5403_v54  ;;  %v3496_v54 = vld [vmem:[#allocation12 + $0x188] sm:$0xff]  ;;  %v5429_v42 = vpack.c.bf16 %v1577_v5, %v1573_v4  ;;  %v1625_v30 = vld [vmem:[#allocation9 + $0x2978] sm:$0xff]  ;;  %v3503_v5 = vld [vmem:[#allocation12 + $0x1c0] sm:$0xff] }
 0x34b   :  { %5406 = vmatprep.subr.bf16.mxu1 %v5405_v60  ;;  %v5423_v60 = vpack.c.bf16 %v1560_v53, %v1556_v51  ;;  %v5545_v62 = vpack.c.bf16 %v3498_v55, %v3496_v54  ;;  %v1604_v51 = vld [vmem:[#allocation9 + $0x28d0] sm:$0xff]  ;;  %v1621_v55 = vld [vmem:[#allocation9 + $0x2958] sm:$0xff] }
 0x34c   :  { %5532 = vmatpush1.bf16.msra.mxu0 %v5531_v18  ;;  %v1576_v18 = vld [vmem:[#allocation9 + $0x27f0] sm:$0xff] }
 0x34d   :  { %5534 = vmatprep.subr.bf16.mxu0 %v5533_v26  ;;  %v5551_v26 = vpack.c.bf16 %v3501_v9, %v3499_v8  ;;  %v5431_v28 = vpack.c.bf16 %v1576_v18, %v1572_v15  ;;  %v1612_v53 = vld [vmem:[#allocation9 + $0x2910] sm:$0xff]  ;;  %v3510_v18 = vld [vmem:[#allocation12 + $0x1f8] sm:$0xff] }
 0x34e   :  { %5408 = vmatpush1.bf16.msra.mxu1 %v5407_v19  ;;  %v3500_v19 = vld [vmem:[#allocation12 + $0x1a8] sm:$0xff] }
 0x34f   :  { %5410 = vmatprep.subr.bf16.mxu1 %v5409_v35  ;;  %v5427_v35 = vpack.c.bf16 %v1568_v50, %v1564_v27  ;;  %v5549_v7 = vpack.c.bf16 %v3502_v3, %v3500_v19  ;;  %v1616_v54 = vld [vmem:[#allocation9 + $0x2930] sm:$0xff]  ;;  %v1629_v27 = vld [vmem:[#allocation9 + $0x2998] sm:$0xff] }
 0x350   :  { %5536 = vmatpush1.bf16.msra.mxu0 %v5535_v57  ;;  %v1588_v57 = vld [vmem:[#allocation9 + $0x2850] sm:$0xff]  ;;  %v5451_v58 = vpack.c.bf16 %v1616_v54, %v1612_v53  ;;  %v3506_v50 = vld [vmem:[#allocation12 + $0x1d8] sm:$0xff] }
 0x351   :  { %5538 = vmatprep.subr.bf16.mxu0 %v5537_v20  ;;  %v1601_v20 = vld [vmem:[#allocation9 + $0x28b8] sm:$0xff]  ;;  %v1632_v3 = vld [vmem:[#allocation9 + $0x29b0] sm:$0xff] }
 0x352   :  { %5412 = vmatpush1.bf16.msra.mxu1 %v5411_v22  ;;  %v1581_v22 = vld [vmem:[#allocation9 + $0x2818] sm:$0xff]  ;;  %v5459_v9 = vpack.c.bf16 %v1632_v3, %v1628_v0  ;;  %v3508_v15 = vld [vmem:[#allocation12 + $0x1e8] sm:$0xff] }
 0x353   :  { %5414 = vmatprep.subr.bf16.mxu1 %v5413_v24  ;;  %v5433_v29 = vpack.c.bf16 %v1585_v61, %v1581_v22  ;;  %v1580_v24 = vld [vmem:[#allocation9 + $0x2810] sm:$0xff]  ;;  %v1697_v3 = vld [vmem:[#allocation9 + $0x2bb8] sm:$0xff] }
 0x354   :  { %5540 = vmatpush1.bf16.msra.mxu0 %v5539_v49  ;;  %v5435_v23 = vpack.c.bf16 %v1584_v13, %v1580_v24  ;;  %v5443_v49 = vpack.c.bf16 %v1600_v43, %v1596_v17  ;;  %v1640_v61 = vld [vmem:[#allocation9 + $0x29f0] sm:$0xff]  ;;  %v1645_v24 = vld [vmem:[#allocation9 + $0x2a18] sm:$0xff] }
 0x355   :  { %5542 = vmatprep.subr.bf16.mxu0 %v5541_v52  ;;  %v1613_v52 = vld [vmem:[#allocation9 + $0x2918] sm:$0xff]  ;;  %v1668_v53 = vld [vmem:[#allocation9 + $0x2ad0] sm:$0xff] }
 0x356   :  { %5416 = vmatpush1.bf16.msra.mxu1 %v5415_v36  ;;  %v1592_v36 = vld [vmem:[#allocation9 + $0x2870] sm:$0xff]  ;;  %v1649_v13 = vld [vmem:[#allocation9 + $0x2a38] sm:$0xff] }
 0x357   :  { %5418 = vmatprep.subr.bf16.mxu1 %v5417_v41  ;;  %v5439_v14 = vpack.c.bf16 %v1592_v36, %v1588_v57  ;;  %v5441_v41 = vpack.c.bf16 %v1601_v20, %v1597_v37  ;;  %v1648_v57 = vld [vmem:[#allocation9 + $0x2a30] sm:$0xff]  ;;  %v1653_v36 = vld [vmem:[#allocation9 + $0x2a58] sm:$0xff] }
 0x358   :  { %5544 = vmatpush1.bf16.msra.mxu0 %v5543_v59  ;;  %v5453_v59 = vpack.c.bf16 %v1625_v30, %v1621_v55  ;;  %v1657_v37 = vld [vmem:[#allocation9 + $0x2a78] sm:$0xff]  ;;  %v1672_v54 = vld [vmem:[#allocation9 + $0x2af0] sm:$0xff] }
 0x359   :  { %5546 = vmatprep.subr.bf16.mxu0 %v5545_v62  ;;  %v1633_v62 = vld [vmem:[#allocation9 + $0x29b8] sm:$0xff] }
 0x35a   :  { %5420 = vmatpush1.bf16.msra.mxu1 %v5419_v34  ;;  %v5445_v34 = vpack.c.bf16 %v1609_v47, %v1605_v45  ;;  %v5457_v19 = vpack.c.bf16 %v1633_v62, %v1629_v27  ;;  %v1661_v17 = vld [vmem:[#allocation9 + $0x2a98] sm:$0xff]  ;;  %v3512_v45 = vld [vmem:[#allocation12 + $0x208] sm:$0xff] }
 0x35b   :  { %5422 = vmatprep.subr.bf16.mxu1 %v5421_v56  ;;  %v5449_v56 = vpack.c.bf16 %v1617_v32, %v1613_v52  ;;  %v1665_v43 = vld [vmem:[#allocation9 + $0x2ab8] sm:$0xff] }
 0x35c   :  { %5548 = vmatpush1.bf16.msra.mxu0 %v5547_v11  ;;  %v3505_v11 = vld [vmem:[#allocation12 + $0x1d0] sm:$0xff]  ;;  %v3514_v47 = vld [vmem:[#allocation12 + $0x218] sm:$0xff] }
 0x35d   :  { %5550 = vmatprep.subr.bf16.mxu0 %v5549_v7  ;;  %v1641_v7 = vld [vmem:[#allocation9 + $0x29f8] sm:$0xff]  ;;  %v5555_v8 = vpack.c.bf16 %v3505_v11, %v3503_v5  ;;  %v1692_v11 = vld [vmem:[#allocation9 + $0x2b90] sm:$0xff] }
 0x35e   :  { %5424 = vmatpush1.bf16.msra.mxu1 %v5423_v60  ;;  %v1620_v60 = vld [vmem:[#allocation9 + $0x2950] sm:$0xff]  ;;  %v1669_v52 = vld [vmem:[#allocation9 + $0x2ad8] sm:$0xff] }
 0x35f   :  { %5426 = vmatprep.subr.bf16.mxu1 %v5425_v1  ;;  %v3504_v1 = vld [vmem:[#allocation12 + $0x1c8] sm:$0xff]  ;;  %v1673_v32 = vld [vmem:[#allocation9 + $0x2af8] sm:$0xff] }
 0x360   :  { %5552 = vmatpush1.bf16.msra.mxu0 %v5551_v26  ;;  %v5553_v4 = vpack.c.bf16 %v3506_v50, %v3504_v1  ;;  %v5557_v26 = vpack.c.bf16 %v3510_v18, %v3508_v15  ;;  %v1677_v55 = vld [vmem:[#allocation9 + $0x2b18] sm:$0xff]  ;;  %v1684_v1 = vld [vmem:[#allocation9 + $0x2b50] sm:$0xff] }
 0x361   :  { %v1681_v30 = vld [vmem:[#allocation9 + $0x2b38] sm:$0xff]  ;;  %v1688_v50 = vld [vmem:[#allocation9 + $0x2b70] sm:$0xff] }
 0x362   :  { %5428 = vmatpush1.bf16.msra.mxu1 %v5427_v35  ;;  %v1637_v35 = vld [vmem:[#allocation9 + $0x29d8] sm:$0xff]  ;;  %5554 = vmatprep.subr.bf16.mxu0 %v5553_v4  ;;  %v5487_v4 = vpack.c.bf16 %v1688_v50, %v1684_v1  ;;  %v1700_v15 = vld [vmem:[#allocation9 + $0x2bd0] sm:$0xff] }
 0x363   :  { %5430 = vmatprep.subr.bf16.mxu1 %v5429_v42  ;;  %v1636_v42 = vld [vmem:[#allocation9 + $0x29d0] sm:$0xff]  ;;  %v5461_v22 = vpack.c.bf16 %v1641_v7, %v1637_v35  ;;  %v1685_v27 = vld [vmem:[#allocation9 + $0x2b58] sm:$0xff] }
 0x364   :  { %5556 = vmatpush1.bf16.msra.mxu0 %v5555_v8  ;;  %v5463_v33 = vpack.c.bf16 %v1640_v61, %v1636_v42  ;;  %v1689_v62 = vld [vmem:[#allocation9 + $0x2b78] sm:$0xff]  ;;  %v1696_v35 = vld [vmem:[#allocation9 + $0x2bb0] sm:$0xff]  ;;  %v1708_v61 = vlaneseq }
 0x365   :  { %5558 = vmatprep.subr.bf16.mxu0 %v5557_v26  ;;  %v5485_v0 = vpack.c.bf16 %v1689_v62, %v1685_v27  ;;  %v1701_v7 = vld [vmem:[#allocation9 + $0x2bd8] sm:$0xff]  ;;  %v1704_v18 = vld [vmem:[#allocation9 + $0x2bf0] sm:$0xff]  ;;  %v3523_v62 = vld [vmem:[#allocation12 + $0x260] sm:$0xff] }
 0x366   :  { %5432 = vmatpush1.bf16.msra.mxu1 %v5431_v28  ;;  %v3507_v28 = vld [vmem:[#allocation12 + $0x1e0] sm:$0xff]  ;;  %v1705_v8 = vld [vmem:[#allocation9 + $0x2bf8] sm:$0xff]  ;;  %v6436_v26 = vshrl.u32 %v1708_v61, 7 }
 0x367   :  { %5434 = vmatprep.subr.bf16.mxu1 %v5433_v29  ;;  %v3509_v29 = vld [vmem:[#allocation12 + $0x1f0] sm:$0xff]  ;;  %v5493_v42 = vpack.c.bf16 %v1705_v8, %v1701_v7  ;;  %v3530_v1 = vld [vmem:[#allocation12 + $0x298] sm:$0xff]  ;;  %v3531_v8 = vld [vmem:[#allocation12 + $0x2a0] sm:$0xff] }
 0x368   :  { %v5559_v31 = vpack.c.bf16 %v3509_v29, %v3507_v28  ;;  %v1710_v28 = vsub.s32 0, %v6436_v26  ;;  %v6439_v29 = vld [vmem:[#allocation11] sm:$0xf]  ;;  %v3535_v61 = vld [vmem:[#allocation12 + $0x2c0] sm:$0xff] }
 0x369   :  { %3333 = vmatmul.mubr.f32.vlgmr.msra.gmra.mrb[4].mxu1 %v6414_v25  ;;  %v1608_v25 = vld [vmem:[#allocation9 + $0x28f0] sm:$0xff] }
 0x36a   :  { %5436 = vmatpush1.bf16.msra.mxu1 %v5435_v23  ;;  %3338 = vmatprep.mubr.f32.mxu1 %v5838_v40  ;;  %v5447_v39 = vpack.c.bf16 %v1608_v25, %v1604_v51  ;;  %v5465_v23 = vpack.c.bf16 %v1649_v13, %v1645_v24  ;;  %v1652_v40 = vld [vmem:[#allocation9 + $0x2a50] sm:$0xff]  ;;  %v1714_v24 = vsub.s32 1, %v6436_v26  ;;  %v1711_v13 = vrot.slane %v6439_v29, %v1710_v28 }
 0x36b   :  { %5438 = vmatprep.subr.bf16.mxu1 %v5437_v16  ;;  %5560 = vmatpush1.bf16.msra.mxu0 %v5559_v31  ;;  %v1644_v16 = vld [vmem:[#allocation9 + $0x2a10] sm:$0xff] }
 0x36c   :  { %v5467_v20 = vpack.c.bf16 %v1648_v57, %v1644_v16  ;;  %v1660_v51 = vld [vmem:[#allocation9 + $0x2a90] sm:$0xff] }
 0x36d   :  { %3339 = vmatmul.mubr.f32.gmra.mrb[6].mxu1 %v5839_v48  ;;  %v1664_v25 = vld [vmem:[#allocation9 + $0x2ab0] sm:$0xff] }
 0x36e   :  { %5440 = vmatpush1.bf16.msra.mxu1 %v5439_v14  ;;  %3409 = vmatprep.mubr.f32.mxu1 %v6419_v21  ;;  %v1624_v21 = vld [vmem:[#allocation9 + $0x2970] sm:$0xff]  ;;  %v5469_v14 = vpack.c.bf16 %v1657_v37, %v1653_v36  ;;  %v3511_v36 = vld [vmem:[#allocation12 + $0x200] sm:$0xff] }
 0x36f   :  { %5442 = vmatprep.subr.bf16.mxu1 %v5441_v41  ;;  %v5455_v63 = vpack.c.bf16 %v1624_v21, %v1620_v60  ;;  %v1656_v41 = vld [vmem:[#allocation9 + $0x2a70] sm:$0xff] }
 0x370   :  { %v5471_v48 = vpack.c.bf16 %v1656_v41, %v1652_v40  ;;  %v1676_v60 = vld [vmem:[#allocation9 + $0x2b10] sm:$0xff]  ;;  %v3518_v41 = vld [vmem:[#allocation12 + $0x238] sm:$0xff] }
 0x371   :  { %v1680_v21 = vld [vmem:[#allocation9 + $0x2b30] sm:$0xff] }
 0x372   :  { %5444 = vmatpush1.bf16.msra.mxu1 %v5443_v49  ;;  %v5561_v49 = vpack.c.bf16 %v3514_v47, %v3512_v45  ;;  %v3513_v37 = vld [vmem:[#allocation12 + $0x210] sm:$0xff]  ;;  %v3516_v40 = vld [vmem:[#allocation12 + $0x228] sm:$0xff] }
 0x373   :  { %5446 = vmatprep.subr.bf16.mxu1 %v5445_v34  ;;  %v5473_v34 = vpack.c.bf16 %v1665_v43, %v1661_v17  ;;  %v5563_v47 = vpack.c.bf16 %v3513_v37, %v3511_v36  ;;  %v3546_v36 = vld [vmem:[#allocation12 + $0x318] sm:$0xff] }
 0x374   :  { %5562 = vmatprep.subr.bf16.mxu0 %v5561_v49 }
 0x376   :  { %5448 = vmatpush1.bf16.msra.mxu1 %v5447_v39  ;;  %v5475_v39 = vpack.c.bf16 %v1664_v25, %v1660_v51  ;;  %v3515_v51 = vld [vmem:[#allocation12 + $0x220] sm:$0xff]  ;;  %v3517_v25 = vld [vmem:[#allocation12 + $0x230] sm:$0xff] }
 0x377   :  { %5450 = vmatprep.subr.bf16.mxu1 %v5449_v56  ;;  %v5477_v56 = vpack.c.bf16 %v1673_v32, %v1669_v52  ;;  %v3520_v32 = vld [vmem:[#allocation12 + $0x248] sm:$0xff] }
 0x37a   :  { %5452 = vmatpush1.bf16.msra.mxu1 %v5451_v58  ;;  %v5479_v58 = vpack.c.bf16 %v1672_v54, %v1668_v53 }
 0x37b   :  { %5454 = vmatprep.subr.bf16.mxu1 %v5453_v59  ;;  %v5481_v59 = vpack.c.bf16 %v1681_v30, %v1677_v55  ;;  %v3519_v55 = vld [vmem:[#allocation12 + $0x240] sm:$0xff]  ;;  %v3521_v30 = vld [vmem:[#allocation12 + $0x250] sm:$0xff] }
 0x37e   :  { %5456 = vmatpush1.bf16.msra.mxu1 %v5455_v63  ;;  %v5483_v63 = vpack.c.bf16 %v1680_v21, %v1676_v60  ;;  %v3526_v60 = vld [vmem:[#allocation12 + $0x278] sm:$0xff]  ;;  %v5571_v21 = vpack.c.bf16 %v3521_v30, %v3519_v55 }
 0x37f   :  { %5458 = vmatprep.subr.bf16.mxu1 %v5457_v19  ;;  %v1693_v19 = vld [vmem:[#allocation9 + $0x2b98] sm:$0xff] }
 0x380   :  { %v5489_v5 = vpack.c.bf16 %v1697_v3, %v1693_v19  ;;  %v3527_v3 = vld [vmem:[#allocation12 + $0x280] sm:$0xff] }
 0x382   :  { %5460 = vmatpush1.bf16.msra.mxu1 %v5459_v9  ;;  %v5491_v9 = vpack.c.bf16 %v1696_v35, %v1692_v11  ;;  %v3534_v11 = vld [vmem:[#allocation12 + $0x2b8] sm:$0xff] }
 0x383   :  { %5462 = vmatprep.subr.bf16.mxu1 %v5461_v22  ;;  %v5495_v22 = vpack.c.bf16 %v1704_v18, %v1700_v15  ;;  %v3538_v15 = vld [vmem:[#allocation12 + $0x2d8] sm:$0xff] }
 0x386   :  { %5464 = vmatpush1.bf16.msra.mxu1 %v5463_v33  ;;  %v6453_v33 = vstv %s6494_s0 }
 0x387   :  { %5466 = vmatprep.subr.bf16.mxu1 %v5465_v23 }
 0x38a   :  { %5468 = vmatpush1.bf16.msra.mxu1 %v5467_v20  ;;  %v1801_v20 = vadd.f32 %v6361_v6, %v1711_v13 }
 0x38b   :  { %5470 = vmatprep.subr.bf16.mxu1 %v5469_v14 }
 0x38e   :  { %5472 = vmatpush1.bf16.msra.mxu1 %v5471_v48 }
 0x38f   :  { %5474 = vmatprep.subr.bf16.mxu1 %v5473_v34  ;;  %v5565_v34 = vpack.c.bf16 %v3518_v41, %v3516_v40  ;;  %v3545_v40 = vld [vmem:[#allocation12 + $0x310] sm:$0xff]  ;;  %v3548_v41 = vld [vmem:[#allocation12 + $0x328] sm:$0xff] }
 0x392   :  { %5476 = vmatpush1.bf16.msra.mxu1 %v5475_v39  ;;  %v3522_v39 = vld [vmem:[#allocation12 + $0x258] sm:$0xff] }
 0x393   :  { %5478 = vmatprep.subr.bf16.mxu1 %v5477_v56  ;;  %v5567_v56 = vpack.c.bf16 %v3517_v25, %v3515_v51  ;;  %v5569_v54 = vpack.c.bf16 %v3522_v39, %v3520_v32  ;;  %v3551_v51 = vld [vmem:[#allocation12 + $0x340] sm:$0xff]  ;;  %v3553_v25 = vld [vmem:[#allocation12 + $0x350] sm:$0xff] }
 0x394   :  { %v5603_v32 = vpack.c.bf16 %v3553_v25, %v3551_v51  ;;  %v3774_v25 = vld [vmem:[#allocation15 + $0xa0] sm:$0xff] }
 0x396   :  { %5480 = vmatpush1.bf16.msra.mxu1 %v5479_v58 }
 0x397   :  { %5482 = vmatprep.subr.bf16.mxu1 %v5481_v59  ;;  %v3524_v59 = vld [vmem:[#allocation12 + $0x268] sm:$0xff] }
 0x398   :  { %v5573_v27 = vpack.c.bf16 %v3526_v60, %v3524_v59  ;;  %v3561_v59 = vld [vmem:[#allocation12 + $0x390] sm:$0xff]  ;;  %v3564_v60 = vld [vmem:[#allocation12 + $0x3a8] sm:$0xff] }
 0x39a   :  { %5484 = vmatpush1.bf16.msra.mxu1 %v5483_v63  ;;  %v3525_v63 = vld [vmem:[#allocation12 + $0x270] sm:$0xff] }
 0x39b   :  { %5486 = vmatprep.subr.bf16.mxu1 %v5485_v0  ;;  %v3528_v0 = vld [vmem:[#allocation12 + $0x288] sm:$0xff]  ;;  %v5575_v50 = vpack.c.bf16 %v3525_v63, %v3523_v62  ;;  %v3563_v63 = vld [vmem:[#allocation12 + $0x3a0] sm:$0xff] }
 0x39c   :  { %v5577_v19 = vpack.c.bf16 %v3530_v1, %v3528_v0  ;;  %v3565_v0 = vld [vmem:[#allocation12 + $0x3b0] sm:$0xff]  ;;  %v3568_v1 = vld [vmem:[#allocation12 + $0x3c8] sm:$0xff] }
 0x39e   :  { %5488 = vmatpush1.bf16.msra.mxu1 %v5487_v4  ;;  %v3529_v4 = vld [vmem:[#allocation12 + $0x290] sm:$0xff] }
 0x39f   :  { %5490 = vmatprep.subr.bf16.mxu1 %v5489_v5  ;;  %v3532_v5 = vld [vmem:[#allocation12 + $0x2a8] sm:$0xff]  ;;  %v5579_v35 = vpack.c.bf16 %v3529_v4, %v3527_v3  ;;  %v3567_v4 = vld [vmem:[#allocation12 + $0x3c0] sm:$0xff] }
 0x3a0   :  { %v5581_v7 = vpack.c.bf16 %v3534_v11, %v3532_v5  ;;  %v3569_v5 = vld [vmem:[#allocation12 + $0x3d0] sm:$0xff]  ;;  %v3572_v11 = vld [vmem:[#allocation12 + $0x3e8] sm:$0xff] }
 0x3a2   :  { %5492 = vmatpush1.bf16.msra.mxu1 %v5491_v9  ;;  %v3533_v9 = vld [vmem:[#allocation12 + $0x2b0] sm:$0xff] }
 0x3a3   :  { %5494 = vmatprep.subr.bf16.mxu1 %v5493_v42  ;;  %v3536_v42 = vld [vmem:[#allocation12 + $0x2c8] sm:$0xff]  ;;  %v5583_v18 = vpack.c.bf16 %v3533_v9, %v3531_v8  ;;  %v3571_v9 = vld [vmem:[#allocation12 + $0x3e0] sm:$0xff] }
 0x3a6   :  { %5496 = vmatpush1.bf16.msra.mxu1 %v5495_v22  ;;  %v5585_v22 = vpack.c.bf16 %v3538_v15, %v3536_v42  ;;  %v3573_v42 = vld [vmem:[#allocation12 + $0x3f0] sm:$0xff]  ;;  %v3770_v15 = vld [vmem:[#allocation15 + $0x80] sm:$0xff] }
 0x3a9   :  { %3410 = vmatmul.mubr.f32.vlgmr.msra.gmra.mrb[4].mxu1 %v6424_v12  ;;  %v1715_v12 = vrot.slane %v6439_v29, %v1714_v24 }
 0x3aa   :  { %3415 = vmatprep.mubr.f32.mxu1 %v6422_v44  ;;  %v1795_v44 = vadd.f32 %v6357_v2, %v1711_v13  ;;  %v3537_v13 = vld [vmem:[#allocation12 + $0x2d0] sm:$0xff] }
 0x3ab   :  { %v1803_v2 = vadd.f32 %v6363_v46, %v1715_v12 }
 0x3ad   :  { %3416 = vmatmul.mubr.f32.gmra.mrb[6].mxu1 %v6428_v10  ;;  %v1797_v10 = vadd.f32 %v6359_v38, %v1715_v12  ;;  %v3540_v12 = vld [vmem:[#allocation12 + $0x2e8] sm:$0xff] }
 0x3fe   :  { %v2564_v31 = vpop.f32.mrb[0].mxu0 }
 0x3ff   :  { %v5690_v23 = vadd.f32 %v2564_v31, %v1795_v44  ;;  %v2566_v16 = vpop.f32.mrb[1].mxu0  ;;  %v3542_v44 = vld [vmem:[#allocation12 + $0x2f8] sm:$0xff] }
 0x400   :  { %v5692_v57 = vadd.f32 %v2566_v16, %v1797_v10  ;;  %v5587_v10 = vpack.c.bf16 %v3537_v13, %v3535_v61  ;;  %v5589_v31 = vpack.c.bf16 %v3542_v44, %v3540_v12  ;;  %v3541_v16 = vld [vmem:[#allocation12 + $0x2f0] sm:$0xff]  ;;  %v1718_v13 = vsub.s32 2, %v6436_v26 }
 0x401   :  { %v3431_v14 = vmul.f32 %v5690_v23, %v6453_v33  ;;  %vm3422_vm2 = vcmp.ge.f32.partialorder %v5690_v23, 0.0  ;;  %v1722_v12 = vsub.s32 3, %v6436_v26 }
 0x402   :  { %v3432_v38 = vmul.f32 %v5692_v57, %v6453_v33  ;;  %v2570_v17 = vpop.f32.mrb[2].mxu0  ;;  %vm3423_vm3 = vcmp.ge.f32.partialorder %v5692_v57, 0.0  ;;  %v1719_v44 = vrot.slane %v6439_v29, %v1718_v13 }
 0x403   :  { %v5694_v43 = vadd.f32 %v2570_v17, %v1801_v20  ;;  %v2572_v45 = vpop.f32.mrb[3].mxu0  ;;  %v3439_v6 = vsel %vm3422_vm2, %v5690_v23, %v3431_v14  ;;  %v3539_v23 = vld [vmem:[#allocation12 + $0x2e0] sm:$0xff] }
 0x404   :  { %v5696_v48 = vadd.f32 %v2572_v45, %v1803_v2  ;;  %v3440_v49 = vsel %vm3423_vm3, %v5692_v57, %v3432_v38  ;;  %v3544_v57 = vld [vmem:[#allocation12 + $0x308] sm:$0xff]  ;;  %v5591_v37 = vpack.c.bf16 %v3541_v16, %v3539_v23  ;;  %v3543_v14 = vld [vmem:[#allocation12 + $0x300] sm:$0xff]  ;;  %v3550_v2 = vld [vmem:[#allocation12 + $0x338] sm:$0xff] }
 0x405   :  { %v3435_v52 = vmul.f32 %v5694_v43, %v6453_v33  ;;  %3651 = vmatprep.mubr.f32.mxu0 %v3440_v49  ;;  %vm3426_vm5 = vcmp.ge.f32.partialorder %v5694_v43, 0.0  ;;  %v5593_v20 = vpack.c.bf16 %v3546_v36, %v3544_v57  ;;  %v5595_v38 = vpack.c.bf16 %v3545_v40, %v3543_v14  ;;  %v3549_v45 = vld [vmem:[#allocation12 + $0x330] sm:$0xff]  ;;  %v3754_v36 = vld [vmem:[#allocation15] sm:$0xff]  ;;  %v3773_v40 = vld [vmem:[#allocation15 + $0x98] sm:$0xff] }
 0x406   :  { %v3436_v46 = vmul.f32 %v5696_v48, %v6453_v33  ;;  %3652 = vmatmul.mubr.f32.vlgmr.msra.gmra.mrb[4].mxu0 %v3439_v6  ;;  %vm3427_vm4 = vcmp.ge.f32.partialorder %v5696_v48, 0.0  ;;  %v5597_v17 = vpack.c.bf16 %v3550_v2, %v3548_v41  ;;  %v3556_v6 = vld [vmem:[#allocation12 + $0x368] sm:$0xff]  ;;  %v3772_v14 = vld [vmem:[#allocation15 + $0x90] sm:$0xff] }
 0x407   :  { %5564 = vmatpush1.bf16.msra.mxu0 %v5563_v47  ;;  %v3443_v58 = vsel %vm3426_vm5, %v5694_v43, %v3435_v52  ;;  %v3547_v43 = vld [vmem:[#allocation12 + $0x320] sm:$0xff]  ;;  %v3552_v47 = vld [vmem:[#allocation12 + $0x348] sm:$0xff]  ;;  %v3558_v52 = vld [vmem:[#allocation12 + $0x378] sm:$0xff] }
 0x408   :  { %v3444_v53 = vsel %vm3427_vm4, %v5696_v48, %v3436_v46  ;;  %5566 = vmatprep.subr.bf16.mxu0 %v5565_v34  ;;  %v3554_v48 = vld [vmem:[#allocation12 + $0x358] sm:$0xff]  ;;  %v5599_v49 = vpack.c.bf16 %v3549_v45, %v3547_v43  ;;  %v5605_v39 = vpack.c.bf16 %v3558_v52, %v3556_v6  ;;  %v3555_v46 = vld [vmem:[#allocation12 + $0x360] sm:$0xff]  ;;  %v3775_v6 = vld [vmem:[#allocation15 + $0xa8] sm:$0xff] }
 0x409   :  { %3657 = vmatprep.mubr.f32.mxu0 %v3444_v53  ;;  %v5601_v34 = vpack.c.bf16 %v3554_v48, %v3552_v47  ;;  %v3560_v53 = vld [vmem:[#allocation12 + $0x388] sm:$0xff]  ;;  %v5629_v47 = vpack.c.bf16 %v3773_v40, %v3772_v14  ;;  %v3756_v48 = vld [vmem:[#allocation15 + $0x10] sm:$0xff] }
 0x40a   :  { %3658 = vmatmul.mubr.f32.gmra.mrb[6].mxu0 %v3443_v58  ;;  %v3559_v58 = vld [vmem:[#allocation12 + $0x380] sm:$0xff]  ;;  %v3880_v14 = vld [vmem:[#allocation18 + $0x28] sm:$0xff] }
 0x40b   :  { %5568 = vmatpush1.bf16.msra.mxu0 %v5567_v56  ;;  %v3557_v56 = vld [vmem:[#allocation12 + $0x370] sm:$0xff] }
 0x40c   :  { %5570 = vmatprep.subr.bf16.mxu0 %v5569_v54  ;;  %v3562_v54 = vld [vmem:[#allocation12 + $0x398] sm:$0xff]  ;;  %v5607_v55 = vpack.c.bf16 %v3557_v56, %v3555_v46  ;;  %v5633_v46 = vpack.c.bf16 %v3775_v6, %v3774_v25  ;;  %v3758_v56 = vld [vmem:[#allocation15 + $0x20] sm:$0xff] }
 0x40d   :  { %v5609_v30 = vpack.c.bf16 %v3562_v54, %v3560_v53  ;;  %v3759_v53 = vld [vmem:[#allocation15 + $0x28] sm:$0xff] }
 0x40f   :  { %5572 = vmatpush1.bf16.msra.mxu0 %v5571_v21  ;;  %v3566_v21 = vld [vmem:[#allocation12 + $0x3b8] sm:$0xff] }
 0x410   :  { %5574 = vmatprep.subr.bf16.mxu0 %v5573_v27  ;;  %v5611_v27 = vpack.c.bf16 %v3561_v59, %v3559_v58  ;;  %v5613_v62 = vpack.c.bf16 %v3566_v21, %v3564_v60  ;;  %v5635_v58 = vpack.c.bf16 %v3759_v53, %v3758_v56  ;;  %v3761_v60 = vld [vmem:[#allocation15 + $0x38] sm:$0xff]  ;;  %v3778_v21 = vld [vmem:[#allocation15 + $0xc0] sm:$0xff] }
 0x413   :  { %5576 = vmatpush1.bf16.msra.mxu0 %v5575_v50  ;;  %v3570_v50 = vld [vmem:[#allocation12 + $0x3d8] sm:$0xff] }
 0x414   :  { %5578 = vmatprep.subr.bf16.mxu0 %v5577_v19  ;;  %v5615_v19 = vpack.c.bf16 %v3565_v0, %v3563_v63  ;;  %v5617_v3 = vpack.c.bf16 %v3570_v50, %v3568_v1  ;;  %v3762_v0 = vld [vmem:[#allocation15 + $0x40] sm:$0xff]  ;;  %v3763_v1 = vld [vmem:[#allocation15 + $0x48] sm:$0xff]  ;;  %v3780_v50 = vld [vmem:[#allocation15 + $0xd0] sm:$0xff] }
 0x417   :  { %5580 = vmatpush1.bf16.msra.mxu0 %v5579_v35  ;;  %v3574_v35 = vld [vmem:[#allocation12 + $0x3f8] sm:$0xff] }
 0x418   :  { %5582 = vmatprep.subr.bf16.mxu0 %v5581_v7  ;;  %v5619_v7 = vpack.c.bf16 %v3569_v5, %v3567_v4  ;;  %v5621_v8 = vpack.c.bf16 %v3574_v35, %v3572_v11  ;;  %v3764_v5 = vld [vmem:[#allocation15 + $0x50] sm:$0xff]  ;;  %v3765_v11 = vld [vmem:[#allocation15 + $0x58] sm:$0xff] }
 0x419   :  { %v5647_v35 = vpack.c.bf16 %v3765_v11, %v3764_v5 }
 0x41b   :  { %5584 = vmatpush1.bf16.msra.mxu0 %v5583_v18  ;;  %v3771_v18 = vld [vmem:[#allocation15 + $0x88] sm:$0xff] }
 0x41c   :  { %5586 = vmatprep.subr.bf16.mxu0 %v5585_v22  ;;  %v5623_v22 = vpack.c.bf16 %v3573_v42, %v3571_v9  ;;  %v5625_v61 = vpack.c.bf16 %v3771_v18, %v3770_v15  ;;  %v3766_v42 = vld [vmem:[#allocation15 + $0x60] sm:$0xff]  ;;  %v3767_v15 = vld [vmem:[#allocation15 + $0x68] sm:$0xff] }
 0x41d   :  { %v5651_v18 = vpack.c.bf16 %v3767_v15, %v3766_v42 }
 0x41f   :  { %5588 = vmatpush1.bf16.msra.mxu0 %v5587_v10  ;;  %v1723_v10 = vrot.slane %v6439_v29, %v1722_v12  ;;  %v3768_v12 = vld [vmem:[#allocation15 + $0x70] sm:$0xff] }
 0x420   :  { %5590 = vmatprep.subr.bf16.mxu0 %v5589_v31 }
 0x423   :  { %5592 = vmatpush1.bf16.msra.mxu0 %v5591_v37  ;;  %v3755_v37 = vld [vmem:[#allocation15 + $0x8] sm:$0xff] }
 0x424   :  { %5594 = vmatprep.subr.bf16.mxu0 %v5593_v20  ;;  %v5627_v43 = vpack.c.bf16 %v3755_v37, %v3754_v36  ;;  %v3878_v36 = vld [vmem:[#allocation18 + $0x18] sm:$0xff] }
 0x427   :  { %5596 = vmatpush1.bf16.msra.mxu0 %v5595_v38 }
 0x428   :  { %5598 = vmatprep.subr.bf16.mxu0 %v5597_v17 }
 0x42b   :  { %5600 = vmatpush1.bf16.msra.mxu0 %v5599_v49  ;;  %v3757_v49 = vld [vmem:[#allocation15 + $0x18] sm:$0xff] }
 0x42c   :  { %5602 = vmatprep.subr.bf16.mxu0 %v5601_v34 }
 0x42f   :  { %5604 = vmatpush1.bf16.msra.mxu0 %v5603_v32  ;;  %v5631_v32 = vpack.c.bf16 %v3757_v49, %v3756_v48 }
 0x430   :  { %5606 = vmatprep.subr.bf16.mxu0 %v5605_v39 }
 0x433   :  { %5608 = vmatpush1.bf16.msra.mxu0 %v5607_v55  ;;  %v3776_v55 = vld [vmem:[#allocation15 + $0xb0] sm:$0xff] }
 0x434   :  { %5610 = vmatprep.subr.bf16.mxu0 %v5609_v30  ;;  %v3777_v30 = vld [vmem:[#allocation15 + $0xb8] sm:$0xff] }
 0x435   :  { %v5637_v59 = vpack.c.bf16 %v3777_v30, %v3776_v55 }
 0x437   :  { %5612 = vmatpush1.bf16.msra.mxu0 %v5611_v27  ;;  %v3779_v27 = vld [vmem:[#allocation15 + $0xc8] sm:$0xff] }
 0x438   :  { %5614 = vmatprep.subr.bf16.mxu0 %v5613_v62  ;;  %v5641_v63 = vpack.c.bf16 %v3779_v27, %v3778_v21  ;;  %v3888_v21 = vld [vmem:[#allocation18 + $0x68] sm:$0xff] }
 0x43b   :  { %5616 = vmatpush1.bf16.msra.mxu0 %v5615_v19  ;;  %v3781_v19 = vld [vmem:[#allocation15 + $0xd8] sm:$0xff] }
 0x43c   :  { %5618 = vmatprep.subr.bf16.mxu0 %v5617_v3  ;;  %v5643_v3 = vpack.c.bf16 %v3763_v1, %v3762_v0  ;;  %v5645_v4 = vpack.c.bf16 %v3781_v19, %v3780_v50  ;;  %v3996_v50 = vld [vmem:[#allocation17] ss:$0 sm:$0xff] }
 0x43f   :  { %5620 = vmatpush1.bf16.msra.mxu0 %v5619_v7  ;;  %v3782_v7 = vld [vmem:[#allocation15 + $0xe0] sm:$0xff] }
 0x440   :  { %5622 = vmatprep.subr.bf16.mxu0 %v5621_v8  ;;  %v3783_v8 = vld [vmem:[#allocation15 + $0xe8] sm:$0xff] }
 0x441   :  { %v5649_v9 = vpack.c.bf16 %v3783_v8, %v3782_v7 }
 0x443   :  { %5624 = vmatpush1.bf16.msra.mxu0 %v5623_v22  ;;  %v3784_v22 = vld [vmem:[#allocation15 + $0xf0] sm:$0xff] }
 0x444   :  { %5626 = vmatprep.subr.bf16.mxu0 %v5625_v61  ;;  %v3785_v61 = vld [vmem:[#allocation15 + $0xf8] sm:$0xff] }
 0x445   :  { %v5653_v13 = vpack.c.bf16 %v3785_v61, %v3784_v22  ;;  %v3997_v22 = vld [vmem:[#allocation20] ss:$0 sm:$0xff] }
 0x47c   :  { %v3411_v31 = vpop.f32.mrb[4].mxu1 }
 0x47d   :  { %v5697_v23 = vadd.f32 %v3411_v31, %v1719_v44  ;;  %v3413_v16 = vpop.f32.mrb[5].mxu1  ;;  %v3875_v31 = vld [vmem:[#allocation18] sm:$0xff] }
 0x47e   :  { %v5698_v57 = vadd.f32 %v3413_v16, %v1723_v10  ;;  %v3877_v16 = vld [vmem:[#allocation18 + $0x10] sm:$0xff] }
 0x47f   :  { %v3433_v20 = vmul.f32 %v5697_v23, %v6453_v33  ;;  %vm3424_vm6 = vcmp.ge.f32.partialorder %v5697_v23, 0.0  ;;  %v5661_v37 = vpack.c.bf16 %v3878_v36, %v3877_v16 }
 0x480   :  { %v3434_v41 = vmul.f32 %v5698_v57, %v6453_v33  ;;  %v3417_v2 = vpop.f32.mrb[6].mxu1  ;;  %vm3425_vm7 = vcmp.ge.f32.partialorder %v5698_v57, 0.0 }
 0x481   :  { %v5699_v38 = vadd.f32 %v3417_v2, %v1719_v44  ;;  %v3419_v17 = vpop.f32.mrb[7].mxu1  ;;  %v3441_v34 = vsel %vm3424_vm6, %v5697_v23, %v3433_v20  ;;  %v3769_v44 = vld [vmem:[#allocation15 + $0x78] sm:$0xff]  ;;  %v3876_v23 = vld [vmem:[#allocation18 + $0x8] sm:$0xff]  ;;  %v3879_v20 = vld [vmem:[#allocation18 + $0x20] sm:$0xff] }
 0x482   :  { %v5700_v45 = vadd.f32 %v3419_v17, %v1723_v10  ;;  %v3442_v29 = vsel %vm3425_vm7, %v5698_v57, %v3434_v41  ;;  %v5655_v10 = vpack.c.bf16 %v3769_v44, %v3768_v12  ;;  %v5657_v57 = vpack.c.bf16 %v3876_v23, %v3875_v31  ;;  %v3881_v41 = vld [vmem:[#allocation18 + $0x30] sm:$0xff]  ;;  %v3882_v2 = vld [vmem:[#allocation18 + $0x38] sm:$0xff]  ;;  %v3883_v17 = vld [vmem:[#allocation18 + $0x40] sm:$0xff] }
 0x483   :  { %v3437_v51 = vmul.f32 %v5699_v38, %v6453_v33  ;;  %3728 = vmatprep.mubr.f32.mxu0 %v3442_v29  ;;  %vm3428_vm9 = vcmp.ge.f32.partialorder %v5699_v38, 0.0  ;;  %v5665_v40 = vpack.c.bf16 %v3880_v14, %v3879_v20  ;;  %v3575_v29 = vld [vmem:[#allocation14] sm:$0x3] }
 0x484   :  { %v3438_v52 = vmul.f32 %v5700_v45, %v6453_v33  ;;  %3729 = vmatmul.mubr.f32.vlgmr.msra.gmra.mrb[4].mxu0 %v3441_v34  ;;  %vm3429_vm8 = vcmp.ge.f32.partialorder %v5700_v45, 0.0  ;;  %v3760_v33 = vld [vmem:[#allocation15 + $0x30] sm:$0xff]  ;;  %5658 = vmatprep.subr.bf16.mxu1 %v5657_v57  ;;  %v3584_v48 = vrot.slane %v3575_v29, %v1714_v24  ;;  %v3745_v34 = vstv %s6495_s1 }
 0x485   :  { %5628 = vmatpush3.bf16.msra.mxu0 %v5627_v43  ;;  %v3445_v54 = vsel %vm3428_vm9, %v5699_v38, %v3437_v51  ;;  %v5639_v62 = vpack.c.bf16 %v3761_v60, %v3760_v33  ;;  %5660 = vmatpush3.bf16.msra.mxu1 %v5657_v57  ;;  %v5669_v38 = vpack.c.bf16 %v3882_v2, %v3881_v41  ;;  %v3884_v43 = vld [vmem:[#allocation18 + $0x48] sm:$0xff]  ;;  %v3887_v60 = vld [vmem:[#allocation18 + $0x60] sm:$0xff] }
 0x486   :  { %v3446_v39 = vsel %vm3429_vm8, %v5700_v45, %v3438_v52  ;;  %5630 = vmatprep.subr.bf16.mxu0 %v5629_v47  ;;  %5662 = vmatprep.subr.bf16.mxu1 %v5661_v37  ;;  %v5673_v45 = vpack.c.bf16 %v3884_v43, %v3883_v17  ;;  %v3580_v47 = vrot.slane %v3575_v29, %v1710_v28 }
 0x487   :  { %3734 = vmatprep.mubr.f32.mxu0 %v3446_v39  ;;  %v5681_v27 = vpack.c.bf16 %v3888_v21, %v3887_v60 }
 0x488   :  { %3735 = vmatmul.mubr.f32.gmra.mrb[6].mxu0 %v3445_v54 }
 0x489   :  { %5632 = vmatpush3.bf16.msra.mxu0 %v5631_v32  ;;  %5664 = vmatpush3.bf16.msra.mxu1 %v5661_v37 }
 0x48a   :  { %5634 = vmatprep.subr.bf16.mxu0 %v5633_v46  ;;  %5666 = vmatprep.subr.bf16.mxu1 %v5665_v40 }
 0x48d   :  { %5636 = vmatpush3.bf16.msra.mxu0 %v5635_v58  ;;  %5668 = vmatpush3.bf16.msra.mxu1 %v5665_v40  ;;  %v3885_v58 = vld [vmem:[#allocation18 + $0x50] sm:$0xff] }
 0x48e   :  { %5638 = vmatprep.subr.bf16.mxu0 %v5637_v59  ;;  %5670 = vmatprep.subr.bf16.mxu1 %v5669_v38  ;;  %v3886_v59 = vld [vmem:[#allocation18 + $0x58] sm:$0xff] }
 0x48f   :  { %v5677_v33 = vpack.c.bf16 %v3886_v59, %v3885_v58 }
 0x491   :  { %5640 = vmatpush3.bf16.msra.mxu0 %v5639_v62  ;;  %5672 = vmatpush3.bf16.msra.mxu1 %v5669_v38  ;;  %v3889_v62 = vld [vmem:[#allocation18 + $0x70] sm:$0xff] }
 0x492   :  { %5642 = vmatprep.subr.bf16.mxu0 %v5641_v63  ;;  %5674 = vmatprep.subr.bf16.mxu1 %v5673_v45  ;;  %v3890_v63 = vld [vmem:[#allocation18 + $0x78] sm:$0xff] }
 0x493   :  { %v5685_v0 = vpack.c.bf16 %v3890_v63, %v3889_v62 }
 0x495   :  { %5644 = vmatpush3.bf16.msra.mxu0 %v5643_v3  ;;  %5676 = vmatpush3.bf16.msra.mxu1 %v5673_v45 }
 0x496   :  { %5646 = vmatprep.subr.bf16.mxu0 %v5645_v4  ;;  %5678 = vmatprep.subr.bf16.mxu1 %v5677_v33  ;;  %v3870_v4 = vstv %s6496_s2  ;;  %s6038_s2 = scalar_lea.vmem %s3981_s23, 256 }
 0x497   :  { %p6039_p2 = scmp.ne.s32.totalorder %s3981_s23, %s6038_s2  ;;  %p6044_p4 = scmp.lt.s32.totalorder %s6038_s2, %s6038_s2 }
 0x499   :  { %5648 = vmatpush3.bf16.msra.mxu0 %v5647_v35  ;;  %5680 = vmatpush3.bf16.msra.mxu1 %v5677_v33  ;;  %p6045_p5 = por %p6044_p4, %p6043_p3 }
 0x49a   :  { %5650 = vmatprep.subr.bf16.mxu0 %v5649_v9  ;;  %5682 = vmatprep.subr.bf16.mxu1 %v5681_v27 }
 0x49b   :  { %p6046_p6 = pnand %p6045_p5, %p6039_p2 }
 0x49d   :  { %5652 = vmatpush3.bf16.msra.mxu0 %v5651_v18  ;;  %5684 = vmatpush3.bf16.msra.mxu1 %v5681_v27 }
 0x49e   :  { %5654 = vmatprep.subr.bf16.mxu0 %v5653_v13  ;;  %5686 = vmatprep.subr.bf16.mxu1 %v5685_v0 }
 0x4a1   :  { %5656 = vmatpush3.bf16.msra.mxu0 %v5655_v10  ;;  %5688 = vmatpush3.bf16.msra.mxu1 %v5685_v0 }
 0x557   :  { %v3730_v49 = vpop.f32.mrb[4].mxu0 }
 0x558   :  { %v5701_v51 = vadd.f32 %v3730_v49, %v3580_v47  ;;  %v3732_v25 = vpop.f32.mrb[5].mxu0 }
 0x559   :  { %v5702_v6 = vadd.f32 %v3732_v25, %v3584_v48 }
 0x55a   :  { %v3746_v52 = vmul.f32 %v5701_v51, %v3745_v34  ;;  %vm3741_vm10 = vcmp.ge.f32.partialorder %v5701_v51, 0.0 }
 0x55b   :  { %v3747_v32 = vmul.f32 %v5702_v6, %v3745_v34  ;;  %v3736_v39 = vpop.f32.mrb[6].mxu0  ;;  %vm3742_vm11 = vcmp.ge.f32.partialorder %v5702_v6, 0.0 }
 0x55c   :  { %v5703_v46 = vadd.f32 %v3736_v39, %v3580_v47  ;;  %v3738_v56 = vpop.f32.mrb[7].mxu0  ;;  %v3750_v54 = vsel %vm3741_vm10, %v5701_v51, %v3746_v52 }
 0x55d   :  { %v5704_v53 = vadd.f32 %v3738_v56, %v3584_v48  ;;  %v3751_v28 = vsel %vm3742_vm11, %v5702_v6, %v3747_v32 }
 0x55e   :  { %v3748_v26 = vmul.f32 %v5703_v46, %v3745_v34  ;;  %3857 = vmatprep.mubr.f32.mxu0 %v3751_v28  ;;  %vm3743_vm13 = vcmp.ge.f32.partialorder %v5703_v46, 0.0 }
 0x55f   :  { %v3749_v24 = vmul.f32 %v5704_v53, %v3745_v34  ;;  %3858 = vmatmul.mubr.f32.vlgmr.msra.gmra.mrb[8].mxu0 %v3750_v54  ;;  %vm3744_vm12 = vcmp.ge.f32.partialorder %v5704_v53, 0.0 }
 0x560   :  { %v3752_v30 = vsel %vm3743_vm13, %v5703_v46, %v3748_v26 }
 0x561   :  { %v3753_v55 = vsel %vm3744_vm12, %v5704_v53, %v3749_v24 }
 0x562   :  { %3862 = vmatprep.mubr.f32.mxu0 %v3753_v55 }
 0x563   :  { %3863 = vmatmul.mubr.f32.gmra.mrb[10].mxu0 %v3752_v30 }
 0x632   :  { %v4030_v1 = vpop.f32.mrb[8].mxu0 }
 0x633   :  { %v4031_v19 = vpop.f32.mrb[9].mxu0 }
 0x634   :  { %v4032_v3 = vadd.f32 %v4031_v19, %v4030_v1 }
 0x636   :  { %v3860_v5 = vadd.f32 %v4032_v3, %v3996_v50  ;;  %v4033_v11 = vpop.f32.mrb[10].mxu0 }
 0x637   :  { %v4034_v35 = vpop.f32.mrb[11].mxu0 }
 0x638   :  { %v4035_v7 = vadd.f32 %v4034_v35, %v4033_v11  ;;  %vm3868_vm14 = vcmp.ge.f32.partialorder %v3860_v5, 0.0  ;;  %v3871_v8 = vmul.f32 %v3870_v4, %v3860_v5 }
 0x63a   :  { %v3865_v9 = vadd.f32 %v4035_v7, %v3996_v50  ;;  %v3873_v42 = vsel %vm3868_vm14, %v3860_v5, %v3871_v8 }
 0x63b   :  { %4086 = vmatprep.mubr.f32.mxu1 %v3873_v42 }
 0x63c   :  { %vm3869_vm15 = vcmp.ge.f32.partialorder %v3865_v9, 0.0  ;;  %v3872_v15 = vmul.f32 %v3870_v4, %v3865_v9 }
 0x63e   :  { %v3874_v18 = vsel %vm3869_vm15, %v3865_v9, %v3872_v15 }
 0x63f   :  { %4087 = vmatmul.mubr.f32.vlgmr.msra.gmra.mrb[8].mxu1 %v3874_v18 }
 0x712   :  { %v4088_v61 = vpop.f32.mrb[8].mxu1 }
 0x713   :  { %v3970_v13 = vadd.f32 %v4088_v61, %v3997_v22  ;;  %v3964_v12 = vpop.f32.mrb[9].mxu1 }
 0x714   :  { %v3965_v44 = vadd.f32 %v3997_v22, %v3964_v12 }
 0x715   :  { %3974 = vst [vmem:[#allocation21 + $0x8] sm:$0xff] %v3970_v13 }
 0x716   :  { %3973 = vst [vmem:[#allocation21] sm:$0xff] %v3965_v44 }
 0x717   :  { %6049 = shalt.err (!%p6046_p6)
}
 0x718   :  { %s6050_s22 = scalar_lea.hbm %s6506_s12, 256 }
 0x719   :  { %p6051_p7 = scmp.ne.s32.totalorder %s6506_s12, %s6050_s22  ;;  %p6054_p8 = scmp.lt.u32.totalorder %s6050_s22, %s6506_s12 }
 0x71b   :  { %p6056_p9 = pnand %p6054_p8, %p6051_p7 }
 0x71d   :  { %6059 = shalt.err (!%p6056_p9)
}
 0x71e   :  { %3986 = dma.vmem_to_hbm [thread:$0]  %s3981_s23, 256, %s6506_s12, [#allocation8], %s6079_s6, %s6079_s6, %s6080_s18  }
 0x71f   :  { %6070 = dma.done.wait [#allocation8], 256  }
 0x720   :  { %6071 = vsyncadd [#allocation8], 4294967040 }
 0x721   :  { %3990 = vsyncpa [#allocation7], 1 }
 0x722   :  { %3991 = vsyncpa [#allocation10], 1 }
 0x723   :  { %3992 = vsyncpa [#allocation13], 1 }
 0x724   :  { %3993 = vsyncpa [#allocation16], 1 }
 0x725   :  { %3994 = vsyncpa [#allocation19], 1 }
 0x726   :  { %3995 = vsyncpa [#allocation8], 1 }

</bundles_post_ra>
